<compile_context>
chip_gen: v7x
topology: tpu7x:2x2x1
jax: 0.10.0
libtpu: 0.0.40
codegen_flags: <defaults>
</compile_context>

<pallas_src>
import jax
import jax.numpy as jnp
from jax.experimental import pallas as pl
from jax.experimental.pallas import tpu as pltpu

C_FEAT = 2048                 # se_resnext50 output channels (Linear in = 2048)
HID = 256                     # per-head hidden width
N_G, N_V, N_C = 168, 11, 7
N_CLS = N_G + N_V + N_C       # 186
N_PAD = 256                   # lane-dense padded classifier output width
GEM_EPS = 1e-6
BN_EPS = 1e-5
C_TILE = 512                  # K-tile of the channel/reduction axis (4 steps)


def _head_kernel(p_ref,                        # SMEM: GeM p, shape (1,)
                 x_ref,                        # (B, H*W, C_TILE) feats, f32
                 w1_ref,                       # (C_TILE, 4*HID) fused Linear
                 gamma_ref, beta_ref,          # fused BatchNorm1d affine
                 wcls_ref, bcls_ref,           # block-diag classifier (768,256)
                 cls_ref, arc_ref,             # outputs (B,256), (B,256)
                 acc_ref):                     # VMEM scratch (B, 4*HID) f32
    k = pl.program_id(0)
    p = p_ref[0]
    inv_p = 1.0 / p

    @pl.when(k == 0)
    def _():
        acc_ref[...] = jnp.zeros_like(acc_ref)

    # GeM over the full spatial map for this channel tile (channels are
    # independent, so tiling C is exact): (mean_hw clamp(x,eps)^p)^(1/p).
    x = x_ref[...]
    xc = jnp.maximum(x, GEM_EPS)
    xp = jnp.exp(p * jnp.log(xc))                              # x^p, runtime p
    pooled = jnp.exp(jnp.log(jnp.mean(xp, axis=1)) * inv_p)    # (B, C_TILE)

    # Partial product of the four fused Linear(2048,256) for this K tile.
    acc_ref[...] += jnp.dot(pooled, w1_ref[...],
                            preferred_element_type=jnp.float32)

    @pl.when(k == pl.num_programs(0) - 1)
    def _():
        hidden = acc_ref[...]                                  # (B, 1024)
        # BatchNorm1d, training-mode batch statistics (biased variance).
        # The Linear bias b1 cancels exactly under mean subtraction and is
        # dropped from the kernel entirely.
        mean = jnp.mean(hidden, axis=0, keepdims=True)
        var = jnp.mean((hidden - mean) ** 2, axis=0, keepdims=True)
        ybn = gamma_ref[...] * ((hidden - mean) * jax.lax.rsqrt(var + BN_EPS)) \
            + beta_ref[...]

        # Mish (numerically-stable softplus) on the g/v/c heads only
        # (first 768 columns); Dropout(p=0) is the identity.
        y_cls = ybn[:, :3 * HID]
        sp = jnp.where(y_cls > 20.0, y_cls,
                       jnp.log1p(jnp.exp(jnp.minimum(y_cls, 20.0))))
        ymish = y_cls * jnp.tanh(sp)

        cls_ref[...] = (jnp.dot(ymish, wcls_ref[...],
                                preferred_element_type=jnp.float32)
                        + bcls_ref[...]).astype(cls_ref.dtype)
        arc_ref[...] = ybn[:, 3 * HID:].astype(arc_ref.dtype)


def _fuse_params(params):
    """Build the kernel-layout (fused) parameters from torch-like params."""
    w1 = jnp.concatenate([params["w1_g"], params["w1_v"],
                          params["w1_c"], params["w1_arc"]], axis=1)  # (2048,1024)
    gamma = jnp.concatenate([params["gamma_g"], params["gamma_v"],
                             params["gamma_c"], params["gamma_arc"]])[None, :]
    beta = jnp.concatenate([params["beta_g"], params["beta_v"],
                            params["beta_c"], params["beta_arc"]])[None, :]
    wcls = jnp.zeros((3 * HID, N_PAD), jnp.float32)
    wcls = wcls.at[0 * HID:1 * HID, 0:N_G].set(params["w2_g"])
    wcls = wcls.at[1 * HID:2 * HID, N_G:N_G + N_V].set(params["w2_v"])
    wcls = wcls.at[2 * HID:3 * HID, N_G + N_V:N_CLS].set(params["w2_c"])
    bcls = jnp.zeros((1, N_PAD), jnp.float32)
    bcls = bcls.at[0, 0:N_G].set(params["b2_g"])
    bcls = bcls.at[0, N_G:N_G + N_V].set(params["b2_v"])
    bcls = bcls.at[0, N_G + N_V:N_CLS].set(params["b2_c"])
    # NOTE: b1 is intentionally omitted -- training-mode BN cancels it exactly.
    # Weights stay f32 for strict parity with the torch module (a bf16 w1
    # failed the accuracy check because BN normalization amplifies the
    # per-column quantization error by |h|/sigma).
    return {"p": params["p"], "w1": w1, "gamma": gamma, "beta": beta,
            "wcls": wcls, "bcls": bcls}


@jax.jit
def simple50_gem_arc_head(x_feat, fused):
    """x_feat: channels-last backbone features (B, H, W, 2048).

    Returns (x_g, x_v, x_c, x_arc).  Taking channels-last input removes the
    standalone NCHW->NHWC HBM transpose from the hot path; the backbone should
    be plumbed to emit channels-last features.
    """
    b, h, w, c = x_feat.shape
    assert c == C_FEAT
    hw = h * w
    x_bsc = x_feat.reshape(b, hw, c)          # contiguous reshape, no copy
    n_k = C_FEAT // C_TILE

    const2 = lambda k: (0, 0)

    flops = (2 * b * C_FEAT * 4 * HID          # fused head matmul
             + 2 * b * 3 * HID * N_PAD         # classifier matmul
             + 6 * b * hw * C_FEAT)            # GeM elementwise
    transcendentals = 2 * b * hw * C_FEAT + 3 * b * 3 * HID
    bytes_accessed = 4 * (x_bsc.size + fused["w1"].size + fused["wcls"].size
                          + b * N_PAD + b * HID)

    cls_out, arc_out = pl.pallas_call(
        _head_kernel,
        out_shape=(jax.ShapeDtypeStruct((b, N_PAD), jnp.float32),
                   jax.ShapeDtypeStruct((b, HID), jnp.float32)),
        grid_spec=pltpu.PrefetchScalarGridSpec(
            num_scalar_prefetch=0,
            grid=(n_k,),
            in_specs=[
                pl.BlockSpec(memory_space=pltpu.MemorySpace.SMEM),    # p
                pl.BlockSpec((b, hw, C_TILE), lambda k: (0, 0, k)),   # x tile
                pl.BlockSpec((C_TILE, 4 * HID), lambda k: (k, 0)),    # w1 tile
                pl.BlockSpec((1, 4 * HID), const2),                   # gamma
                pl.BlockSpec((1, 4 * HID), const2),                   # beta
                pl.BlockSpec((3 * HID, N_PAD), const2),               # wcls
                pl.BlockSpec((1, N_PAD), const2),                     # bcls
            ],
            out_specs=[
                pl.BlockSpec((b, N_PAD), const2),
                pl.BlockSpec((b, HID), const2),
            ],
            scratch_shapes=[pltpu.VMEM((b, 4 * HID), jnp.float32)],
        ),
        compiler_params=pltpu.CompilerParams(
            # TODO(synk): on v7x the second TensorCore stays idle; engaging it
            # needs per-core partial (B,1024) accumulators (BN stats span the
            # whole batch, so the batch axis cannot be naively parallelized).
            dimension_semantics=("arbitrary",),
            vmem_limit_bytes=32 * 1024 * 1024),
        cost_estimate=pl.CostEstimate(flops=flops,
                                      transcendentals=transcendentals,
                                      bytes_accessed=bytes_accessed),
    )(fused["p"], x_bsc, fused["w1"], fused["gamma"], fused["beta"],
      fused["wcls"], fused["bcls"])

    x_g = cls_out[:, :N_G]
    x_v = cls_out[:, N_G:N_G + N_V]
    x_c = cls_out[:, N_G + N_V:N_CLS]
    return x_g, x_v, x_c, arc_out


def _reference(x_feat, params):
    """Pure-JAX f32 reference of the same head (channels-last input)."""
    p = params["p"][0]
    hi = jax.lax.Precision.HIGHEST
    xcl = jnp.maximum(x_feat, GEM_EPS)
    pooled = jnp.mean(xcl ** p, axis=(1, 2)) ** (1.0 / p)       # (B, 2048)

    def bn_head(w1, b1, gamma, beta, mish):
        hdd = jnp.dot(pooled, w1, precision=hi) + b1
        m = jnp.mean(hdd, axis=0, keepdims=True)
        v = jnp.mean((hdd - m) ** 2, axis=0, keepdims=True)
        y = gamma * (hdd - m) / jnp.sqrt(v + BN_EPS) + beta
        if mish:
            y = y * jnp.tanh(jax.nn.softplus(y))
        return y

    y_g = bn_head(params["w1_g"], params["b1_g"],
                  params["gamma_g"], params["beta_g"], True)
    y_v = bn_head(params["w1_v"], params["b1_v"],
                  params["gamma_v"], params["beta_v"], True)
    y_c = bn_head(params["w1_c"], params["b1_c"],
                  params["gamma_c"], params["beta_c"], True)
    y_a = bn_head(params["w1_arc"], params["b1_arc"],
                  params["gamma_arc"], params["beta_arc"], False)
    return (jnp.dot(y_g, params["w2_g"], precision=hi) + params["b2_g"],
            jnp.dot(y_v, params["w2_v"], precision=hi) + params["b2_v"],
            jnp.dot(y_c, params["w2_c"], precision=hi) + params["b2_c"],
            y_a)


def _init_params(key):
    """Synthetic torch-like params. Linear weights stored as (in, out) == W.T."""
    ks = jax.random.split(key, 22)
    params = {"p": jnp.array([3.0], jnp.float32)}
    i = 0
    for name in ("g", "v", "c", "arc"):
        params[f"w1_{name}"] = 0.02 * jax.random.normal(
            ks[i], (C_FEAT, HID), jnp.float32); i += 1
        params[f"b1_{name}"] = 0.02 * jax.random.normal(
            ks[i], (HID,), jnp.float32); i += 1
        params[f"gamma_{name}"] = 1.0 + 0.1 * jax.random.normal(
            ks[i], (HID,), jnp.float32); i += 1
        params[f"beta_{name}"] = 0.1 * jax.random.normal(
            ks[i], (HID,), jnp.float32); i += 1
    for name, n_out in (("g", N_G), ("v", N_V), ("c", N_C)):
        params[f"w2_{name}"] = 0.05 * jax.random.normal(
            ks[i], (HID, n_out), jnp.float32); i += 1
        params[f"b2_{name}"] = 0.05 * jax.random.normal(
            ks[i], (n_out,), jnp.float32); i += 1
    return params


if __name__ == "__main__":
    key = jax.random.PRNGKey(0)
    kx, kp = jax.random.split(key)
    B, H, W = 8, 4, 4
    # Backbone feature-map stand-in (post-ReLU-like, nonnegative),
    # channels-last so the head needs no transpose.
    x_feat = jax.nn.relu(
        jax.random.normal(kx, (B, H, W, C_FEAT), jnp.float32))
    params = _init_params(kp)
    fused = _fuse_params(params)

    outs = simple50_gem_arc_head(x_feat, fused)
    jax.block_until_ready(outs)

    refs = _reference(x_feat, params)
    for out, ref in zip(outs, refs):
        assert out.shape == ref.shape
        assert jnp.allclose(out, ref, rtol=2e-2, atol=2e-2), (
            float(jnp.max(jnp.abs(out - ref))))

    x_g, x_v, x_c, x_arc = outs
    assert x_g.shape == (B, N_G) and x_v.shape == (B, N_V)
    assert x_c.shape == (B, N_C) and x_arc.shape == (B, HID)
    print("KERNEL_OK")
</pallas_src>

<mosaic_0001>
module attributes {stable_mosaic.version = 11 : i64} {
  func.func @_head_kernel(%arg0: i32, %arg1: memref<1xf32, #tpu.memory_space<smem>>, %arg2: memref<8x16x512xf32, #tpu.memory_space<vmem>>, %arg3: memref<512x1024xf32, #tpu.memory_space<vmem>>, %arg4: memref<1x1024xf32, #tpu.memory_space<vmem>>, %arg5: memref<1x1024xf32, #tpu.memory_space<vmem>>, %arg6: memref<768x256xf32, #tpu.memory_space<vmem>>, %arg7: memref<1x256xf32, #tpu.memory_space<vmem>>, %arg8: memref<8x256xf32, #tpu.memory_space<vmem>>, %arg9: memref<8x256xf32, #tpu.memory_space<vmem>>, %arg10: memref<8x1024xf32, #tpu.memory_space<vmem>>) attributes {dimension_semantics = [#tpu.dimension_semantics<arbitrary>], iteration_bounds = array<i64: 4>, scalar_prefetch = 0 : i64, scratch_operands = 1 : i64, tpu.core_type = #tpu.core_type<tc>, window_params = [{transform_indices = @transform_0, window_bounds = array<i64: 1>}, {transform_indices = @transform_1, window_bounds = array<i64: 8, 16, 512>}, {transform_indices = @transform_2, window_bounds = array<i64: 512, 1024>}, {pipeline_mode = #tpu.pipeline_mode<synchronous>, transform_indices = @transform_3, window_bounds = array<i64: 1, 1024>}, {pipeline_mode = #tpu.pipeline_mode<synchronous>, transform_indices = @transform_4, window_bounds = array<i64: 1, 1024>}, {pipeline_mode = #tpu.pipeline_mode<synchronous>, transform_indices = @transform_5, window_bounds = array<i64: 768, 256>}, {pipeline_mode = #tpu.pipeline_mode<synchronous>, transform_indices = @transform_6, window_bounds = array<i64: 1, 256>}, {pipeline_mode = #tpu.pipeline_mode<synchronous>, transform_indices = @transform_7, window_bounds = array<i64: 8, 256>}, {pipeline_mode = #tpu.pipeline_mode<synchronous>, transform_indices = @transform_8, window_bounds = array<i64: 8, 256>}]} {
    %c0 = arith.constant 0 : index
    %0 = memref.load %arg1[%c0] : memref<1xf32, #tpu.memory_space<smem>>
    %cst = arith.constant 1.000000e+00 : f32
    %1 = arith.divf %cst, %0 : f32
    %c0_i32 = arith.constant 0 : i32
    %2 = arith.cmpi eq, %arg0, %c0_i32 : i32
    %3 = arith.extui %2 : i1 to i32
    %c0_i32_0 = arith.constant 0 : i32
    %4 = arith.cmpi ne, %3, %c0_i32_0 : i32
    scf.if %4 {
      %cst_15 = arith.constant 0.000000e+00 : f32
      %27 = vector.broadcast %cst_15 : f32 to vector<8x1024xf32>
      %c0_16 = arith.constant 0 : index
      %c0_17 = arith.constant 0 : index
      %28 = vector.load %arg10[%c0_16, %c0_17] : memref<8x1024xf32, #tpu.memory_space<vmem>>, vector<8x1024xf32>
      tpu.vector_store %arg10[%c0_16, %c0_17], %27 {strides = array<i32>} : memref<8x1024xf32, #tpu.memory_space<vmem>>, vector<8x1024xf32>,
    } else {
    }
    %c0_1 = arith.constant 0 : index
    %c0_2 = arith.constant 0 : index
    %c0_3 = arith.constant 0 : index
    %5 = vector.load %arg2[%c0_1, %c0_2, %c0_3] : memref<8x16x512xf32, #tpu.memory_space<vmem>>, vector<8x16x512xf32>
    %cst_4 = arith.constant 9.99999997E-7 : f32
    %6 = vector.broadcast %cst_4 : f32 to vector<8x16x512xf32>
    %7 = arith.maximumf %5, %6 : vector<8x16x512xf32>
    %8 = math.log %7 : vector<8x16x512xf32>
    %9 = vector.broadcast %0 : f32 to vector<8x16x512xf32>
    %10 = arith.mulf %9, %8 : vector<8x16x512xf32>
    %11 = math.exp %10 : vector<8x16x512xf32>
    %cst_5 = arith.constant dense<0.000000e+00> : vector<8x512xf32>
    %12 = vector.multi_reduction <add>, %11, %cst_5 [1] : vector<8x16x512xf32> to vector<8x512xf32>
    %cst_6 = arith.constant 1.600000e+01 : f32
    %13 = vector.broadcast %cst_6 : f32 to vector<8x512xf32>
    %14 = arith.divf %12, %13 : vector<8x512xf32>
    %15 = math.log %14 : vector<8x512xf32>
    %16 = vector.broadcast %1 : f32 to vector<8x512xf32>
    %17 = arith.mulf %15, %16 : vector<8x512xf32>
    %18 = math.exp %17 : vector<8x512xf32>
    %c0_7 = arith.constant 0 : index
    %c0_8 = arith.constant 0 : index
    %19 = vector.load %arg10[%c0_7, %c0_8] : memref<8x1024xf32, #tpu.memory_space<vmem>>, vector<8x1024xf32>
    %c0_9 = arith.constant 0 : index
    %c0_10 = arith.constant 0 : index
    %20 = vector.load %arg3[%c0_9, %c0_10] : memref<512x1024xf32, #tpu.memory_space<vmem>>, vector<512x1024xf32>
    %cst_11 = arith.constant dense<0.000000e+00> : vector<8x1024xf32>
    %21 = tpu.matmul %18, %20, %cst_11 {dimension_numbers = #tpu.dot_dimension_numbers<[1], [0], [0], [1], [0, 0, 1, 1], [], []>} : vector<8x512xf32>, vector<512x1024xf32>, vector<8x1024xf32> -> vector<8x1024xf32>
    %22 = arith.addf %19, %21 : vector<8x1024xf32>
    %c0_12 = arith.constant 0 : index
    %c0_13 = arith.constant 0 : index
    %23 = vector.load %arg10[%c0_12, %c0_13] : memref<8x1024xf32, #tpu.memory_space<vmem>>, vector<8x1024xf32>
    tpu.vector_store %arg10[%c0_12, %c0_13], %22 {strides = array<i32>} : memref<8x1024xf32, #tpu.memory_space<vmem>>, vector<8x1024xf32>,
    %c3_i32 = arith.constant 3 : i32
    %24 = arith.cmpi eq, %arg0, %c3_i32 : i32
    %25 = arith.extui %24 : i1 to i32
    %c0_i32_14 = arith.constant 0 : i32
    %26 = arith.cmpi ne, %25, %c0_i32_14 : i32
    scf.if %26 {
      %c0_15 = arith.constant 0 : index
      %c0_16 = arith.constant 0 : index
      %27 = vector.load %arg10[%c0_15, %c0_16] : memref<8x1024xf32, #tpu.memory_space<vmem>>, vector<8x1024xf32>
      %cst_17 = arith.constant dense<0.000000e+00> : vector<1024xf32>
      %28 = vector.multi_reduction <add>, %27, %cst_17 [0] : vector<8x1024xf32> to vector<1024xf32>
      %29 = vector.shape_cast %28 : vector<1024xf32> to vector<1x1024xf32>
      %cst_18 = arith.constant 8.000000e+00 : f32
      %30 = vector.broadcast %cst_18 : f32 to vector<1x1024xf32>
      %31 = arith.divf %29, %30 : vector<1x1024xf32>
      %32 = vector.broadcast %31 : vector<1x1024xf32> to vector<8x1024xf32>
      %33 = arith.subf %27, %32 : vector<8x1024xf32>
      %34 = arith.mulf %33, %33 : vector<8x1024xf32>
      %cst_19 = arith.constant dense<0.000000e+00> : vector<1024xf32>
      %35 = vector.multi_reduction <add>, %34, %cst_19 [0] : vector<8x1024xf32> to vector<1024xf32>
      %36 = vector.shape_cast %35 : vector<1024xf32> to vector<1x1024xf32>
      %cst_20 = arith.constant 8.000000e+00 : f32
      %37 = vector.broadcast %cst_20 : f32 to vector<1x1024xf32>
      %38 = arith.divf %36, %37 : vector<1x1024xf32>
      %c0_21 = arith.constant 0 : index
      %c0_22 = arith.constant 0 : index
      %39 = vector.load %arg4[%c0_21, %c0_22] : memref<1x1024xf32, #tpu.memory_space<vmem>>, vector<1x1024xf32>
      %40 = vector.broadcast %31 : vector<1x1024xf32> to vector<8x1024xf32>
      %41 = arith.subf %27, %40 : vector<8x1024xf32>
      %cst_23 = arith.constant 9.99999974E-6 : f32
      %42 = vector.broadcast %cst_23 : f32 to vector<1x1024xf32>
      %43 = arith.addf %38, %42 : vector<1x1024xf32>
      %44 = math.rsqrt %43 : vector<1x1024xf32>
      %45 = vector.broadcast %44 : vector<1x1024xf32> to vector<8x1024xf32>
      %46 = arith.mulf %41, %45 : vector<8x1024xf32>
      %47 = vector.broadcast %39 : vector<1x1024xf32> to vector<8x1024xf32>
      %48 = arith.mulf %47, %46 : vector<8x1024xf32>
      %c0_24 = arith.constant 0 : index
      %c0_25 = arith.constant 0 : index
      %49 = vector.load %arg5[%c0_24, %c0_25] : memref<1x1024xf32, #tpu.memory_space<vmem>>, vector<1x1024xf32>
      %50 = vector.broadcast %49 : vector<1x1024xf32> to vector<8x1024xf32>
      %51 = arith.addf %48, %50 : vector<8x1024xf32>
      %52 = vector.extract_strided_slice %51 {offsets = [0, 0], sizes = [8, 768], strides = [1, 1]} : vector<8x1024xf32> to vector<8x768xf32>
      %cst_26 = arith.constant 2.000000e+01 : f32
      %53 = vector.broadcast %cst_26 : f32 to vector<8x768xf32>
      %54 = arith.cmpf ogt, %52, %53 : vector<8x768xf32>
      %cst_27 = arith.constant 2.000000e+01 : f32
      %55 = vector.broadcast %cst_27 : f32 to vector<8x768xf32>
      %56 = arith.minimumf %52, %55 : vector<8x768xf32>
      %57 = math.exp %56 : vector<8x768xf32>
      %58 = math.log1p %57 : vector<8x768xf32>
      %59 = arith.select %54, %52, %58 : vector<8x768xi1>, vector<8x768xf32>
      %60 = math.tanh %59 : vector<8x768xf32>
      %61 = arith.mulf %52, %60 : vector<8x768xf32>
      %c0_28 = arith.constant 0 : index
      %c0_29 = arith.constant 0 : index
      %62 = vector.load %arg6[%c0_28, %c0_29] : memref<768x256xf32, #tpu.memory_space<vmem>>, vector<768x256xf32>
      %cst_30 = arith.constant dense<0.000000e+00> : vector<8x256xf32>
      %63 = tpu.matmul %61, %62, %cst_30 {dimension_numbers = #tpu.dot_dimension_numbers<[1], [0], [0], [1], [0, 0, 1, 1], [], []>} : vector<8x768xf32>, vector<768x256xf32>, vector<8x256xf32> -> vector<8x256xf32>
      %c0_31 = arith.constant 0 : index
      %c0_32 = arith.constant 0 : index
      %64 = vector.load %arg7[%c0_31, %c0_32] : memref<1x256xf32, #tpu.memory_space<vmem>>, vector<1x256xf32>
      %65 = vector.broadcast %64 : vector<1x256xf32> to vector<8x256xf32>
      %66 = arith.addf %63, %65 : vector<8x256xf32>
      %c0_33 = arith.constant 0 : index
      %c0_34 = arith.constant 0 : index
      %67 = vector.load %arg8[%c0_33, %c0_34] : memref<8x256xf32, #tpu.memory_space<vmem>>, vector<8x256xf32>
      tpu.vector_store %arg8[%c0_33, %c0_34], %66 {strides = array<i32>} : memref<8x256xf32, #tpu.memory_space<vmem>>, vector<8x256xf32>,
      %68 = vector.extract_strided_slice %51 {offsets = [0, 768], sizes = [8, 256], strides = [1, 1]} : vector<8x1024xf32> to vector<8x256xf32>
      %c0_35 = arith.constant 0 : index
      %c0_36 = arith.constant 0 : index
      %69 = vector.load %arg9[%c0_35, %c0_36] : memref<8x256xf32, #tpu.memory_space<vmem>>, vector<8x256xf32>
      tpu.vector_store %arg9[%c0_35, %c0_36], %68 {strides = array<i32>} : memref<8x256xf32, #tpu.memory_space<vmem>>, vector<8x256xf32>,
    } else {
    }
    return
  }
  func.func @transform_0(%arg0: i32) -> i32 {
    %c0_i32 = arith.constant 0 : i32
    %c0_i32_0 = arith.constant 0 : i32
    return %c0_i32 : i32
  }
  func.func @transform_1(%arg0: i32) -> (i32, i32, i32) {
    %c0_i32 = arith.constant 0 : i32
    %c0_i32_0 = arith.constant 0 : i32
    %c0_i32_1 = arith.constant 0 : i32
    return %c0_i32, %c0_i32_0, %arg0 : i32, i32, i32
  }
  func.func @transform_2(%arg0: i32) -> (i32, i32) {
    %c0_i32 = arith.constant 0 : i32
    %c0_i32_0 = arith.constant 0 : i32
    return %arg0, %c0_i32 : i32, i32
  }
  func.func @transform_3(%arg0: i32) -> (i32, i32) {
    %c0_i32 = arith.constant 0 : i32
    %c0_i32_0 = arith.constant 0 : i32
    %c0_i32_1 = arith.constant 0 : i32
    return %c0_i32, %c0_i32_0 : i32, i32
  }
  func.func @transform_4(%arg0: i32) -> (i32, i32) {
    %c0_i32 = arith.constant 0 : i32
    %c0_i32_0 = arith.constant 0 : i32
    %c0_i32_1 = arith.constant 0 : i32
    return %c0_i32, %c0_i32_0 : i32, i32
  }
  func.func @transform_5(%arg0: i32) -> (i32, i32) {
    %c0_i32 = arith.constant 0 : i32
    %c0_i32_0 = arith.constant 0 : i32
    %c0_i32_1 = arith.constant 0 : i32
    return %c0_i32, %c0_i32_0 : i32, i32
  }
  func.func @transform_6(%arg0: i32) -> (i32, i32) {
    %c0_i32 = arith.constant 0 : i32
    %c0_i32_0 = arith.constant 0 : i32
    %c0_i32_1 = arith.constant 0 : i32
    return %c0_i32, %c0_i32_0 : i32, i32
  }
  func.func @transform_7(%arg0: i32) -> (i32, i32) {
    %c0_i32 = arith.constant 0 : i32
    %c0_i32_0 = arith.constant 0 : i32
    %c0_i32_1 = arith.constant 0 : i32
    return %c0_i32, %c0_i32_0 : i32, i32
  }
  func.func @transform_8(%arg0: i32) -> (i32, i32) {
    %c0_i32 = arith.constant 0 : i32
    %c0_i32_0 = arith.constant 0 : i32
    %c0_i32_1 = arith.constant 0 : i32
    return %c0_i32, %c0_i32_0 : i32, i32
  }
}

</mosaic_0001>

<bundles_post_ra>
// kernel: simple50_gem_arc_head.1
= control target key start
LH: loop header
LB: loop body
LE: loop exit
PB: predicated region body
PF: predicated region fallthrough
CT: control target
= control target key end

     0   :  { %s7021_s0 = inlined_call_operand.<no memory space> [shape: f32[1], index: 0, kind: input, shape index: {}]   ;;  %s7022_s1 = inlined_call_operand.vmem [shape: f32[8,16,2048], index: 1, kind: input, shape index: {}]   ;;  %s7023_s2 = inlined_call_operand.hbm [shape: f32[2048,1024], index: 2, kind: input, shape index: {}]   ;;  %s7024_s3 = inlined_call_operand.hbm [shape: f32[1,1024], index: 3, kind: input, shape index: {}]   ;;  %s7025_s4 = inlined_call_operand.hbm [shape: f32[1,1024], index: 4, kind: input, shape index: {}]   ;;  %s7026_s5 = inlined_call_operand.hbm [shape: f32[768,256], index: 5, kind: input, shape index: {}]   ;;  %s7027_s6 = inlined_call_operand.hbm [shape: f32[1,256], index: 6, kind: input, shape index: {}]   ;;  %s7028_s7 = inlined_call_operand.vmem [shape: f32[8,256], index: 7, kind: output, shape index: {0}]   ;;  %s7029_s8 = inlined_call_operand.hbm [shape: f32[8,256], index: 8, kind: output, shape index: {1}]  }
   0x1   :  { %7099 = sst [smem:[#allocation70_spill]] %s7024_s3 }
   0x2   :  { %14 = sst [smem:[#allocation3]] %s7021_s0 }
   0x3   :  { %15 = vsyncpa [#allocation6], 0 }
   0x4   :  { %17 = vsyncpa [#allocation6 + $0x1], 0 }
   0x5   :  { %18 = vsyncpa [#allocation9], 0 }
   0x6   :  { %19 = vsyncpa [#allocation12], 0 }
   0x7   :  { %20 = vsyncpa [#allocation7], 0  ;;  %s5039_s29 = smov 0   ;;  %s5041_s30 = smov 0  }
   0x8   :  { %s5043_s9 = smov 0   ;;  %s5045_s10 = smov 0  }
   0x9 LB: > { %s5058_s0 = sadd.s32 4294967295, %s4978_s10   ;;  %s5061_s11 = sadd.s32 1, %s4978_s10   ;;  %s4978_s10 = sphi %s5045_s10, %s7314_s10   ;;  %s4974_s9 = sphi %s5043_s9, %s7313_s9   ;;  %s4970_s30 = sphi %s5041_s30, %s7312_s30   ;;  %s4966_s29 = sphi %s5039_s29, %s7311_s29  }
   0xa   : > { %s51_s12 = ssub.s32 %s4978_s10, %s5061_s11  ;;  %s54_s13 = sadd.s32 1, %s4974_s9 }
   0xb   : > { %p52_p0 = scmp.eq.s32.totalorder %s51_s12, 0  ;;  %p61_p1 = scmp.ne.s32.totalorder %s4974_s9, %s4970_s30 }
   0xc   : > { %p62_p2 = scmp.eq.s32.totalorder %s4978_s10, 0  ;;  %p93_p3 = scmp.ne.s32.totalorder %s4970_s30, %s4966_s29 }
   0xd   : > { %s5071_s14 = scalar_select %p52_p0, %s4974_s9, %s54_s13  }
   0xe   : > { %p5073_p4 = por %p62_p2, %p61_p1  ;;  %p7030_p5 = scmp.eq.s32.totalorder %s5058_s0, 0 }
   0xf   : > { %p3492_p6 = scmp.ge.s32.totalorder %s4978_s10, 1  ;;  %p230_p7 = scmp.lt.s32.totalorder %s4978_s10, 5 }
  0x10   : > { %s7100_s15 = scalar_select %p5073_p4, 1, 0 }
  0x11   : > { %p5082_p8 = por %p7030_p5, %p93_p3  ;;  %p5087_p10 = pnand %p3492_p6, %p230_p7 }
  0x12   : > { %s4980_s18 = smov [#allocation8]   ;;  %s4981_s20 = smov [#allocation11]  }
  0x13   : > { %s7101_s16 = scalar_select %p5082_p8, 1, 0 }
  0x14   : > { %s7102_s17 = scalar_select %p5087_p10, 1, 0 }
  0x15   : > { %s246_s19 = sshll.u32 %s4980_s18, 4  ;;  %p4263_p11 = pneg %p5087_p10  ;;  %s247_s19 = int_to_ptr.vmem [resolvable:$true] %s246_s19 }
  0x16   : > { %s267_s21 = sshll.u32 %s4981_s20, 4  ;;  %s4982_s23 = smov [#allocation10]   ;;  %s5099_s21 = int_to_ptr.vmem [resolvable:$true] %s267_s21 }
  0x17   : > { %p5095_p12 = pnand %p4263_p11, %p7030_p5  ;;  %s5101_s24 = sshll.u32 %s4982_s23, 4  ;;  %s258_s24 = int_to_ptr.vmem [resolvable:$true] %s5101_s24 }
  0x18   : > { %s7104_s3 = sld [smem:[#allocation70_spill]] }
  0x19   : > { %p5111_p0 = pneg %p5095_p12 }
  0x1e   : > { %s4766_s27 = scalar_lea.hbm %s7104_s3, 128 }
  0x1f   : > { %p4767_p13 = scmp.ne.s32.totalorder %s7104_s3, %s4766_s27  ;;  %p4773_p3 = scmp.lt.u32.totalorder %s4766_s27, %s7104_s3 }
  0x21   : > { %p4769_p1 = pnand %p5111_p0, %p4767_p13 }
  0x23   : > { %p4770_p2 = pneg %p4769_p1 }
  0x25   : > { %p4775_p6 = pnand %p4773_p3, %p4770_p2 }
  0x27   : > { %4778 = shalt.err (!%p4775_p6)
}
  0x28   : > { %s4779_s20 = scalar_lea.vmem %s247_s19, 128  ;;  %p4787_p5 = scmp.lt.s32.totalorder %s247_s19, %s247_s19 }
  0x29   : > { %p4780_p7 = scmp.ne.s32.totalorder %s247_s19, %s4779_s20  ;;  %p4788_p8 = scmp.lt.s32.totalorder %s4779_s20, %s4779_s20 }
  0x2b   : > { %p4782_p11 = pnand %p4780_p7, %p5111_p0  ;;  %p4789_p10 = por %p4788_p8, %p4787_p5 }
  0x2d   : > { %p4783_p9 = pneg %p4782_p11 }
  0x2f   : > { %p4790_p4 = pnand %p4789_p10, %p4783_p9 }
  0x31   : > { %4793 = shalt.err (!%p4790_p4)
}
  0x32   : > { %4266 = dma.hbm_to_vmem [thread:$0]  (!%p5095_p12), %s7104_s3, 128, %s247_s19, [#allocation9]  }
  0x33   : > { %s4794_s28 = scalar_lea.hbm %s7026_s5, 24576 }
  0x34   : > { %p4795_p13 = scmp.ne.s32.totalorder %s7026_s5, %s4794_s28  ;;  %p4801_p4 = scmp.lt.u32.totalorder %s4794_s28, %s7026_s5 }
  0x36   : > { %p4797_p1 = pnand %p4795_p13, %p5111_p0 }
  0x38   : > { %p4798_p5 = pneg %p4797_p1 }
  0x3a   : > { %p4803_p8 = pnand %p4801_p4, %p4798_p5 }
  0x3c   : > { %4806 = shalt.err (!%p4803_p8)
}
  0x3d   : > { %s4807_s19 = scalar_lea.vmem %s5099_s21, 24576  ;;  %p4815_p3 = scmp.lt.s32.totalorder %s5099_s21, %s5099_s21 }
  0x3e   : > { %p4808_p9 = scmp.ne.s32.totalorder %s5099_s21, %s4807_s19  ;;  %p4816_p6 = scmp.lt.s32.totalorder %s4807_s19, %s4807_s19 }
  0x40   : > { %p4810_p10 = pnand %p4808_p9, %p5111_p0  ;;  %p4817_p7 = por %p4816_p6, %p4815_p3 }
  0x42   : > { %p4811_p2 = pneg %p4810_p10 }
  0x44   : > { %p4818_p11 = pnand %p4817_p7, %p4811_p2 }
  0x46   : > { %4821 = shalt.err (!%p4818_p11)
}
  0x47   : > { %s4983_s23 = smov 256   ;;  %s4984_s25 = smov 16  }
  0x48   : > { %4272 = dma.hbm_to_vmem [thread:$0]  (!%p5095_p12), %s7026_s5, 24576, %s5099_s21, [#allocation12], %s4983_s23, %s4983_s23, %s4984_s25  }
  0x49   : > { %s4822_s13 = scalar_lea.hbm %s7025_s4, 128 }
  0x4a   : > { %p4823_p13 = scmp.ne.s32.totalorder %s7025_s4, %s4822_s13  ;;  %p4829_p4 = scmp.lt.u32.totalorder %s4822_s13, %s7025_s4 }
  0x4c   : > { %p4825_p1 = pnand %p4823_p13, %p5111_p0 }
  0x4e   : > { %p4826_p5 = pneg %p4825_p1 }
  0x50   : > { %p4831_p8 = pnand %p4829_p4, %p4826_p5 }
  0x52   : > { %4834 = shalt.err (!%p4831_p8)
}
  0x53   : > { %s4835_s26 = scalar_lea.vmem %s258_s24, 128  ;;  %p4843_p3 = scmp.lt.s32.totalorder %s258_s24, %s258_s24 }
  0x54   : > { %p4836_p9 = scmp.ne.s32.totalorder %s258_s24, %s4835_s26  ;;  %p4844_p6 = scmp.lt.s32.totalorder %s4835_s26, %s4835_s26 }
  0x56   : > { %p4838_p10 = pnand %p4836_p9, %p5111_p0  ;;  %p4845_p7 = por %p4844_p6, %p4843_p3 }
  0x58   : > { %p4839_p2 = pneg %p4838_p10 }
  0x5a   : > { %p4846_p11 = pnand %p4845_p7, %p4839_p2 }
  0x5c   : > { %4849 = shalt.err (!%p4846_p11)
}
  0x5d   : > { %4269 = dma.hbm_to_vmem [thread:$0]  (!%p5095_p12), %s7025_s4, 128, %s258_s24, [#allocation9]  }
  0x5e   : > { %s4985_s3 = smov [#allocation13]   ;;  %s4850_s29 = scalar_lea.hbm %s7027_s6, 32 }
  0x5f   : > { %s281_s25 = sshll.u32 %s4985_s3, 4  ;;  %p4851_p13 = scmp.ne.s32.totalorder %s7027_s6, %s4850_s29  ;;  %s282_s25 = int_to_ptr.vmem [resolvable:$true] %s281_s25 }
  0x60   : > { %p4857_p4 = scmp.lt.u32.totalorder %s4850_s29, %s7027_s6 }
  0x61   : > { %p4853_p1 = pnand %p4851_p13, %p5111_p0 }
  0x63   : > { %p4854_p5 = pneg %p4853_p1 }
  0x65   : > { %p4859_p8 = pnand %p4857_p4, %p4854_p5 }
  0x67   : > { %4862 = shalt.err (!%p4859_p8)
}
  0x68   : > { %s4863_s24 = scalar_lea.vmem %s282_s25, 32  ;;  %p4871_p3 = scmp.lt.s32.totalorder %s282_s25, %s282_s25 }
  0x69   : > { %p4864_p9 = scmp.ne.s32.totalorder %s282_s25, %s4863_s24  ;;  %p4872_p6 = scmp.lt.s32.totalorder %s4863_s24, %s4863_s24 }
  0x6b   : > { %p4866_p10 = pnand %p4864_p9, %p5111_p0  ;;  %p4873_p7 = por %p4872_p6, %p4871_p3 }
  0x6d   : > { %p4867_p2 = pneg %p4866_p10 }
  0x6f   : > { %p4874_p11 = pnand %p4873_p7, %p4867_p2 }
  0x71   : > { %4877 = shalt.err (!%p4874_p11)
}
  0x72   : > { %4275 = dma.hbm_to_vmem [thread:$0]  (!%p5095_p12), %s7027_s6, 32, %s282_s25, [#allocation12]  }
  0x73   : > { %p3497_p13 = scmp.ge.s32.totalorder %s4978_s10, 4 }
  0x74   : > { %p7106_p1 = scmp.ne.s32.totalorder (!%p3497_p13), %s7100_s15, 0 }
  0x75   : > { %288 = sbr.rel (%p3497_p13) target bundleno = 187 (0xbb), region = 36 }
  0x7c   : > { %291 = sbr.rel (!%p7106_p1) target bundleno = 160 (0xa0), region = 40  ;;  %s293_s12 = sand.u32 (%p7106_p1), 1, %s4974_s9  }
  0x7d   : > { %s3518_s23 = sshll.u32 (%p7106_p1), %s4978_s10, 5  ;;  %s3498_s3 = sshll.u32 (%p7106_p1), %s293_s12, 9 }
  0x7e   : > { %s5195_s29 = scalar_lea.vmem (%p7106_p1), %s7022_s1, %s3518_s23  ;;  %s5200_s22 = scalar_lea.vmem (%p7106_p1), [#allocation4], %s3498_s3 }
  0x7f   : > { %v311_v0 = vld [vmem:[%s5195_s29] sm:$0xff] (%p7106_p1)  ;;  %v313_v1 = vld [vmem:[%s5195_s29 + $0x8] sm:$0xff] (%p7106_p1)  ;;  %v315_v2 = vld [vmem:[%s5195_s29 + $0x10] sm:$0xff] (%p7106_p1) }
  0x80   : > { %312 = vst [vmem:[%s5200_s22] sm:$0xff] (%p7106_p1), %v311_v0  ;;  %314 = vst [vmem:[%s5200_s22 + $0x8] sm:$0xff] (%p7106_p1), %v313_v1  ;;  %v317_v3 = vld [vmem:[%s5195_s29 + $0x18] sm:$0xff] (%p7106_p1)  ;;  %v319_v4 = vld [vmem:[%s5195_s29 + $0x80] sm:$0xff] (%p7106_p1) }
  0x81   : > { %316 = vst [vmem:[%s5200_s22 + $0x10] sm:$0xff] (%p7106_p1), %v315_v2  ;;  %v321_v5 = vld [vmem:[%s5195_s29 + $0x88] sm:$0xff] (%p7106_p1)  ;;  %318 = vst [vmem:[%s5200_s22 + $0x18] sm:$0xff] (%p7106_p1), %v317_v3  ;;  %v323_v6 = vld [vmem:[%s5195_s29 + $0x90] sm:$0xff] (%p7106_p1) }
  0x82   : > { %320 = vst [vmem:[%s5200_s22 + $0x20] sm:$0xff] (%p7106_p1), %v319_v4  ;;  %322 = vst [vmem:[%s5200_s22 + $0x28] sm:$0xff] (%p7106_p1), %v321_v5  ;;  %v325_v7 = vld [vmem:[%s5195_s29 + $0x98] sm:$0xff] (%p7106_p1)  ;;  %v327_v8 = vld [vmem:[%s5195_s29 + $0x100] sm:$0xff] (%p7106_p1) }
  0x83   : > { %324 = vst [vmem:[%s5200_s22 + $0x30] sm:$0xff] %v323_v6  ;;  %326 = vst [vmem:[%s5200_s22 + $0x38] sm:$0xff] %v325_v7  ;;  %v329_v9 = vld [vmem:[%s5195_s29 + $0x108] sm:$0xff]  ;;  %v331_v10 = vld [vmem:[%s5195_s29 + $0x110] sm:$0xff] }
  0x84   : > { %328 = vst [vmem:[%s5200_s22 + $0x40] sm:$0xff] %v327_v8  ;;  %v333_v11 = vld [vmem:[%s5195_s29 + $0x118] sm:$0xff]  ;;  %330 = vst [vmem:[%s5200_s22 + $0x48] sm:$0xff] %v329_v9  ;;  %v335_v12 = vld [vmem:[%s5195_s29 + $0x180] sm:$0xff] }
  0x85   : > { %332 = vst [vmem:[%s5200_s22 + $0x50] sm:$0xff] %v331_v10  ;;  %334 = vst [vmem:[%s5200_s22 + $0x58] sm:$0xff] %v333_v11  ;;  %v337_v13 = vld [vmem:[%s5195_s29 + $0x188] sm:$0xff]  ;;  %v339_v14 = vld [vmem:[%s5195_s29 + $0x190] sm:$0xff] }
  0x86   : > { %336 = vst [vmem:[%s5200_s22 + $0x60] sm:$0xff] %v335_v12  ;;  %338 = vst [vmem:[%s5200_s22 + $0x68] sm:$0xff] %v337_v13  ;;  %v341_v15 = vld [vmem:[%s5195_s29 + $0x198] sm:$0xff]  ;;  %v343_v16 = vld [vmem:[%s5195_s29 + $0x200] sm:$0xff] }
  0x87   : > { %340 = vst [vmem:[%s5200_s22 + $0x70] sm:$0xff] %v339_v14  ;;  %v345_v17 = vld [vmem:[%s5195_s29 + $0x208] sm:$0xff]  ;;  %342 = vst [vmem:[%s5200_s22 + $0x78] sm:$0xff] %v341_v15  ;;  %v347_v18 = vld [vmem:[%s5195_s29 + $0x210] sm:$0xff] }
  0x88   : > { %344 = vst [vmem:[%s5200_s22 + $0x80] sm:$0xff] %v343_v16  ;;  %346 = vst [vmem:[%s5200_s22 + $0x88] sm:$0xff] %v345_v17  ;;  %v349_v19 = vld [vmem:[%s5195_s29 + $0x218] sm:$0xff]  ;;  %v351_v20 = vld [vmem:[%s5195_s29 + $0x280] sm:$0xff] }
  0x89   : > { %348 = vst [vmem:[%s5200_s22 + $0x90] sm:$0xff] %v347_v18  ;;  %350 = vst [vmem:[%s5200_s22 + $0x98] sm:$0xff] %v349_v19  ;;  %v353_v21 = vld [vmem:[%s5195_s29 + $0x288] sm:$0xff]  ;;  %v355_v22 = vld [vmem:[%s5195_s29 + $0x290] sm:$0xff] }
  0x8a   : > { %352 = vst [vmem:[%s5200_s22 + $0xa0] sm:$0xff] %v351_v20  ;;  %v357_v23 = vld [vmem:[%s5195_s29 + $0x298] sm:$0xff]  ;;  %354 = vst [vmem:[%s5200_s22 + $0xa8] sm:$0xff] %v353_v21  ;;  %v359_v24 = vld [vmem:[%s5195_s29 + $0x300] sm:$0xff] }
  0x8b   : > { %356 = vst [vmem:[%s5200_s22 + $0xb0] sm:$0xff] %v355_v22  ;;  %358 = vst [vmem:[%s5200_s22 + $0xb8] sm:$0xff] %v357_v23  ;;  %v361_v25 = vld [vmem:[%s5195_s29 + $0x308] sm:$0xff]  ;;  %v363_v26 = vld [vmem:[%s5195_s29 + $0x310] sm:$0xff] }
  0x8c   : > { %360 = vst [vmem:[%s5200_s22 + $0xc0] sm:$0xff] %v359_v24  ;;  %362 = vst [vmem:[%s5200_s22 + $0xc8] sm:$0xff] %v361_v25  ;;  %v365_v27 = vld [vmem:[%s5195_s29 + $0x318] sm:$0xff]  ;;  %v367_v28 = vld [vmem:[%s5195_s29 + $0x380] sm:$0xff] }
  0x8d   : > { %364 = vst [vmem:[%s5200_s22 + $0xd0] sm:$0xff] %v363_v26  ;;  %v369_v29 = vld [vmem:[%s5195_s29 + $0x388] sm:$0xff]  ;;  %366 = vst [vmem:[%s5200_s22 + $0xd8] sm:$0xff] %v365_v27  ;;  %v371_v30 = vld [vmem:[%s5195_s29 + $0x390] sm:$0xff] }
  0x8e   : > { %368 = vst [vmem:[%s5200_s22 + $0xe0] sm:$0xff] %v367_v28  ;;  %370 = vst [vmem:[%s5200_s22 + $0xe8] sm:$0xff] %v369_v29  ;;  %v373_v31 = vld [vmem:[%s5195_s29 + $0x398] sm:$0xff]  ;;  %v375_v32 = vld [vmem:[%s5195_s29 + $0x400] sm:$0xff] }
  0x8f   : > { %372 = vst [vmem:[%s5200_s22 + $0xf0] sm:$0xff] %v371_v30  ;;  %374 = vst [vmem:[%s5200_s22 + $0xf8] sm:$0xff] %v373_v31  ;;  %v377_v33 = vld [vmem:[%s5195_s29 + $0x408] sm:$0xff]  ;;  %v379_v34 = vld [vmem:[%s5195_s29 + $0x410] sm:$0xff] }
  0x90   : > { %376 = vst [vmem:[%s5200_s22 + $0x100] sm:$0xff] %v375_v32  ;;  %v381_v35 = vld [vmem:[%s5195_s29 + $0x418] sm:$0xff]  ;;  %378 = vst [vmem:[%s5200_s22 + $0x108] sm:$0xff] %v377_v33  ;;  %v383_v36 = vld [vmem:[%s5195_s29 + $0x480] sm:$0xff] }
  0x91   : > { %380 = vst [vmem:[%s5200_s22 + $0x110] sm:$0xff] %v379_v34  ;;  %382 = vst [vmem:[%s5200_s22 + $0x118] sm:$0xff] %v381_v35  ;;  %v385_v37 = vld [vmem:[%s5195_s29 + $0x488] sm:$0xff]  ;;  %v387_v38 = vld [vmem:[%s5195_s29 + $0x490] sm:$0xff] }
  0x92   : > { %384 = vst [vmem:[%s5200_s22 + $0x120] sm:$0xff] %v383_v36  ;;  %386 = vst [vmem:[%s5200_s22 + $0x128] sm:$0xff] %v385_v37  ;;  %v389_v39 = vld [vmem:[%s5195_s29 + $0x498] sm:$0xff]  ;;  %v391_v40 = vld [vmem:[%s5195_s29 + $0x500] sm:$0xff] }
  0x93   : > { %388 = vst [vmem:[%s5200_s22 + $0x130] sm:$0xff] %v387_v38  ;;  %v393_v41 = vld [vmem:[%s5195_s29 + $0x508] sm:$0xff]  ;;  %390 = vst [vmem:[%s5200_s22 + $0x138] sm:$0xff] %v389_v39  ;;  %v395_v42 = vld [vmem:[%s5195_s29 + $0x510] sm:$0xff] }
  0x94   : > { %392 = vst [vmem:[%s5200_s22 + $0x140] sm:$0xff] %v391_v40  ;;  %394 = vst [vmem:[%s5200_s22 + $0x148] sm:$0xff] %v393_v41  ;;  %v397_v43 = vld [vmem:[%s5195_s29 + $0x518] sm:$0xff]  ;;  %v399_v44 = vld [vmem:[%s5195_s29 + $0x580] sm:$0xff] }
  0x95   : > { %396 = vst [vmem:[%s5200_s22 + $0x150] sm:$0xff] %v395_v42  ;;  %398 = vst [vmem:[%s5200_s22 + $0x158] sm:$0xff] %v397_v43  ;;  %v401_v45 = vld [vmem:[%s5195_s29 + $0x588] sm:$0xff]  ;;  %v403_v46 = vld [vmem:[%s5195_s29 + $0x590] sm:$0xff] }
  0x96   : > { %400 = vst [vmem:[%s5200_s22 + $0x160] sm:$0xff] %v399_v44  ;;  %v405_v47 = vld [vmem:[%s5195_s29 + $0x598] sm:$0xff]  ;;  %402 = vst [vmem:[%s5200_s22 + $0x168] sm:$0xff] %v401_v45  ;;  %v407_v48 = vld [vmem:[%s5195_s29 + $0x600] sm:$0xff] }
  0x97   : > { %404 = vst [vmem:[%s5200_s22 + $0x170] sm:$0xff] %v403_v46  ;;  %406 = vst [vmem:[%s5200_s22 + $0x178] sm:$0xff] %v405_v47  ;;  %v409_v49 = vld [vmem:[%s5195_s29 + $0x608] sm:$0xff]  ;;  %v411_v50 = vld [vmem:[%s5195_s29 + $0x610] sm:$0xff] }
  0x98   : > { %408 = vst [vmem:[%s5200_s22 + $0x180] sm:$0xff] %v407_v48  ;;  %410 = vst [vmem:[%s5200_s22 + $0x188] sm:$0xff] %v409_v49  ;;  %v413_v51 = vld [vmem:[%s5195_s29 + $0x618] sm:$0xff]  ;;  %v415_v52 = vld [vmem:[%s5195_s29 + $0x680] sm:$0xff] }
  0x99   : > { %412 = vst [vmem:[%s5200_s22 + $0x190] sm:$0xff] %v411_v50  ;;  %v417_v53 = vld [vmem:[%s5195_s29 + $0x688] sm:$0xff]  ;;  %414 = vst [vmem:[%s5200_s22 + $0x198] sm:$0xff] %v413_v51  ;;  %v419_v54 = vld [vmem:[%s5195_s29 + $0x690] sm:$0xff] }
  0x9a   : > { %416 = vst [vmem:[%s5200_s22 + $0x1a0] sm:$0xff] %v415_v52  ;;  %418 = vst [vmem:[%s5200_s22 + $0x1a8] sm:$0xff] %v417_v53  ;;  %v421_v55 = vld [vmem:[%s5195_s29 + $0x698] sm:$0xff]  ;;  %v423_v56 = vld [vmem:[%s5195_s29 + $0x700] sm:$0xff] }
  0x9b   : > { %420 = vst [vmem:[%s5200_s22 + $0x1b0] sm:$0xff] %v419_v54  ;;  %422 = vst [vmem:[%s5200_s22 + $0x1b8] sm:$0xff] %v421_v55  ;;  %v425_v57 = vld [vmem:[%s5195_s29 + $0x708] sm:$0xff]  ;;  %v427_v58 = vld [vmem:[%s5195_s29 + $0x710] sm:$0xff] }
  0x9c   : > { %424 = vst [vmem:[%s5200_s22 + $0x1c0] sm:$0xff] %v423_v56  ;;  %v429_v59 = vld [vmem:[%s5195_s29 + $0x718] sm:$0xff]  ;;  %426 = vst [vmem:[%s5200_s22 + $0x1c8] sm:$0xff] %v425_v57  ;;  %v431_v60 = vld [vmem:[%s5195_s29 + $0x780] sm:$0xff] }
  0x9d   : > { %428 = vst [vmem:[%s5200_s22 + $0x1d0] sm:$0xff] %v427_v58  ;;  %430 = vst [vmem:[%s5200_s22 + $0x1d8] sm:$0xff] %v429_v59  ;;  %v433_v61 = vld [vmem:[%s5195_s29 + $0x788] sm:$0xff]  ;;  %v435_v62 = vld [vmem:[%s5195_s29 + $0x790] sm:$0xff] }
  0x9e   : > { %432 = vst [vmem:[%s5200_s22 + $0x1e0] sm:$0xff] %v431_v60  ;;  %434 = vst [vmem:[%s5200_s22 + $0x1e8] sm:$0xff] %v433_v61  ;;  %v437_v63 = vld [vmem:[%s5195_s29 + $0x798] sm:$0xff] }
  0x9f   : > { %436 = vst [vmem:[%s5200_s22 + $0x1f0] sm:$0xff] %v435_v62  ;;  %438 = vst [vmem:[%s5200_s22 + $0x1f8] sm:$0xff] %v437_v63 }
  0xa0 PF: > { %s445_s25 = sand.u32 1, %s4974_s9   ;;  %s3520_s13 = sshll.u32 %s4978_s10, 16 }
  0xa1   : > { %s3501_s18 = sshll.u32 %s445_s25, 12  ;;  %s5332_s24 = scalar_lea.hbm %s7023_s2, %s3520_s13 }
  0xa2   : > { %s449_s26 = scalar_lea.vmem [#allocation5], %s3501_s18  ;;  %s5336_s12 = scalar_lea.sflag [#allocation6], %s445_s25 }
  0xa3   : > { %s457_s21 = sshll.u32 %s449_s26, 4  ;;  %s4878_s23 = scalar_lea.hbm %s5332_s24, 65536  ;;  %s5334_s21 = int_to_ptr.vmem [resolvable:$true] %s457_s21 }
  0xa4   : > { %p4879_p12 = scmp.ne.s32.totalorder %s5332_s24, %s4878_s23  ;;  %p7107_p0 = scmp.ne.s32.totalorder %s7100_s15, 0 }
  0xa5   : > { %s4882_s27 = scalar_lea.hbm %s7023_s2, 262144  ;;  %p4883_p8 = scmp.lt.u32.totalorder %s5332_s24, %s7023_s2 }
  0xa6   : > { %p4880_p5 = pnand %p4879_p12, %p7107_p0  ;;  %p4884_p9 = scmp.lt.u32.totalorder %s4882_s27, %s4878_s23 }
  0xa7   : > { %p4886_p2 = scmp.lt.u32.totalorder %s4878_s23, %s5332_s24 }
  0xa8   : > { %p4881_p4 = pneg %p4880_p5  ;;  %p4885_p10 = por %p4884_p9, %p4883_p8 }
  0xaa   : > { %p4887_p3 = por %p4886_p2, %p4885_p10 }
  0xac   : > { %p4888_p6 = pnand %p4887_p3, %p4881_p4 }
  0xae   : > { %4891 = shalt.err (!%p4888_p6)
}
  0xaf   : > { %s4892_s22 = scalar_lea.vmem %s5334_s21, 65536  ;;  %s4986_s25 = smov [#allocation5]  }
  0xb0   : > { %p4893_p7 = scmp.ne.s32.totalorder %s5334_s21, %s4892_s22  ;;  %s4896_s13 = sshll.u32 %s4986_s25, 4  ;;  %s4897_s13 = int_to_ptr.vmem [resolvable:$false] %s4896_s13 }
  0xb1   : > { %s4898_s18 = scalar_lea.vmem %s4897_s13, 131072  ;;  %p4899_p1 = scmp.lt.s32.totalorder %s5334_s21, %s4897_s13 }
  0xb2   : > { %p4894_p11 = pnand %p4893_p7, %p7107_p0  ;;  %p4900_p12 = scmp.lt.s32.totalorder %s4898_s18, %s4892_s22 }
  0xb4   : > { %p4895_p13 = pneg %p4894_p11  ;;  %p4901_p5 = por %p4900_p12, %p4899_p1 }
  0xb6   : > { %p4902_p8 = pnand %p4901_p5, %p4895_p13 }
  0xb8   : > { %4905 = shalt.err (!%p4902_p8)
}
  0xb9   : > { %s4987_s20 = smov 1024   ;;  %s4988_s19 = smov 64  }
  0xba   : > { %4249 = dma.hbm_to_vmem [thread:$0]  (%p7107_p0), %s5332_s24, 65536, %s5334_s21, %s5336_s12, %s4987_s20, %s4987_s20, %s4988_s19  }
  0xbb PF: > { %p7108_p4 = scmp.ne.s32.totalorder %s7102_s17, 0 }
  0xbd   : > { %469 = sbr.rel (%p7108_p4) target bundleno = 1356 (0x54c), region = 67 }
  0xc4   : > { %s472_s26 = sand.u32 1, %s4970_s30   ;;  %p7109_p9 = scmp.ne.s32.totalorder %s7101_s16, 0 }
  0xc5   : > { %s3506_s23 = sshll.u32 %s472_s26, 9  ;;  %s3507_s10 = sshll.u32 %s472_s26, 12 }
  0xc6   : > { %s5363_s3 = scalar_lea.vmem [#allocation4], %s3506_s23  ;;  %s479_s27 = scalar_lea.sflag [#allocation6], %s472_s26 }
  0xc7   : > { %s5365_s28 = scalar_lea.vmem [#allocation5], %s3507_s10 }
  0xc8   : > { %4949 = dma.done.wait (%p7109_p9), %s479_s27, 65536  }
  0xc9   : > { %4951 = vsyncadd (%p7109_p9), %s479_s27, 4294901760  ;;  %p7110_p0 = scmp.eq.s32.totalorder %s5058_s0, 0 }
  0xcb   : > { %4953 = dma.done.wait (%p7110_p0), [#allocation9], 256   ;;  %p7111_p10 = pmov %p7110_p0 }
  0xcc   : > { %p7112_p2 = pmov %p7110_p0 }
  0xcd   : > { %4955 = vsyncadd (%p7111_p10), [#allocation9], 4294967040 }
  0xce   : > { %4957 = dma.done.wait (%p7112_p2), [#allocation12], 24608   ;;  %p7113_p3 = pmov %p7110_p0 }
  0xcf   : > { %s532_s15 = sld [smem:[#allocation3]]  ;;  %p7114_p6 = scmp.ne.s32.totalorder %s5058_s0, 0 }
  0xd0   : > { %4959 = vsyncadd (%p7113_p3), [#allocation12], 4294942688  ;;  %v4989_v2 = vmov (!%p7114_p6), 0.0  }
  0xd1   : > { %540 = vst [vmem:[#allocation2] sm:$0xff] (!%p7114_p6), %v4989_v2  ;;  %541 = vst [vmem:[#allocation2 + $0x8] sm:$0xff] (!%p7114_p6), %v4989_v2 }
  0xd2   : > { %542 = vst [vmem:[#allocation2 + $0x10] sm:$0xff] (!%p7114_p6), %v4989_v2  ;;  %543 = vst [vmem:[#allocation2 + $0x18] sm:$0xff] (!%p7114_p6), %v4989_v2 }
  0xd3   : > { %544 = vst [vmem:[#allocation2 + $0x20] sm:$0xff] (!%p7114_p6), %v4989_v2  ;;  %545 = vst [vmem:[#allocation2 + $0x28] sm:$0xff] (!%p7114_p6), %v4989_v2 }
  0xd4   : > { %546 = vst [vmem:[#allocation2 + $0x30] sm:$0xff] (!%p7114_p6), %v4989_v2  ;;  %547 = vst [vmem:[#allocation2 + $0x38] sm:$0xff] (!%p7114_p6), %v4989_v2 }
  0xd5   : > { %v5379_v0 = vstv %s532_s15 }
  0xd6   : > { %4328 = vrcp.f32 %v5379_v0 }
  0xe0   : > { %v4329_v1 = vpop.eup %4328 }
  0xe1   : > { %4239 = vpush %v4329_v1 }
 0x10c   : > { %539 = sbr.rel (%p7114_p6) target bundleno = 275 (0x113), region = 95 }
 0x112   : > { %s5382_s16 = spop %4239 }
 0x113 PF: > { %v1424_v3 = vld [vmem:[%s5365_s28 + $0x8] sm:$0xff]  ;;  %v1426_v5 = vld [vmem:[%s5365_s28 + $0x18] sm:$0xff]  ;;  %v1423_v8 = vld [vmem:[%s5365_s28] sm:$0xff]  ;;  %vm1967_vm0 = vcmask 1041409   ;;  %vm1969_vm1 = vcmask 1042434   ;;  %vm1971_vm2 = vcmask 1043459  }
 0x114   : > { %v1432_v4 = vld [vmem:[%s5365_s28 + $0x48] sm:$0xff]  ;;  %v1434_v7 = vld [vmem:[%s5365_s28 + $0x58] sm:$0xff]  ;;  %v1431_v9 = vld [vmem:[%s5365_s28 + $0x40] sm:$0xff]  ;;  %vm1973_vm3 = vcmask 1044484   ;;  %vm1975_vm4 = vcmask 1045509   ;;  %vm1977_vm5 = vcmask 1046534  }
 0x115   : > { %v3521_v6 = vpack.c.bf16 %v1432_v4, %v1424_v3  ;;  %v3649_v10 = vpack.c.bf16 %v1434_v7, %v1426_v5  ;;  %v3523_v11 = vpack.c.bf16 %v1431_v9, %v1423_v8  ;;  %v1425_v12 = vld [vmem:[%s5365_s28 + $0x10] sm:$0xff]  ;;  %v1440_v14 = vld [vmem:[%s5365_s28 + $0x88] sm:$0xff]  ;;  %v1442_v17 = vld [vmem:[%s5365_s28 + $0x98] sm:$0xff]  ;;  %vm1979_vm6 = vcmask 1047559   ;;  %p3513_p7 = scmp.ne.s32.totalorder %s5058_s0, 3 }
 0x116   : > { %v1433_v13 = vld [vmem:[%s5365_s28 + $0x50] sm:$0xff]  ;;  %v1448_v16 = vld [vmem:[%s5365_s28 + $0xc8] sm:$0xff]  ;;  %v1450_v18 = vld [vmem:[%s5365_s28 + $0xd8] sm:$0xff] }
 0x117   : > { %3522 = vmatprep.subr.bf16.mxu0 %v3521_v6  ;;  %v3651_v15 = vpack.c.bf16 %v1433_v13, %v1425_v12  ;;  %3650 = vmatprep.subr.bf16.mxu1 %v3649_v10  ;;  %v3525_v19 = vpack.c.bf16 %v1448_v16, %v1440_v14  ;;  %v3653_v20 = vpack.c.bf16 %v1450_v18, %v1442_v17  ;;  %v1439_v21 = vld [vmem:[%s5365_s28 + $0x80] sm:$0xff]  ;;  %v1441_v23 = vld [vmem:[%s5365_s28 + $0x90] sm:$0xff]  ;;  %v1456_v26 = vld [vmem:[%s5365_s28 + $0x108] sm:$0xff] }
 0x118   : > { %3524 = vmatpush1.bf16.msra.mxu0 %v3523_v11  ;;  %v1447_v22 = vld [vmem:[%s5365_s28 + $0xc0] sm:$0xff]  ;;  %v1449_v25 = vld [vmem:[%s5365_s28 + $0xd0] sm:$0xff]  ;;  %v1464_v27 = vld [vmem:[%s5365_s28 + $0x148] sm:$0xff] }
 0x119   : > { %3652 = vmatpush1.bf16.msra.mxu1 %v3651_v15  ;;  %v3527_v24 = vpack.c.bf16 %v1447_v22, %v1439_v21  ;;  %3526 = vmatprep.subr.bf16.mxu0 %v3525_v19  ;;  %v3655_v28 = vpack.c.bf16 %v1449_v25, %v1441_v23  ;;  %v3529_v29 = vpack.c.bf16 %v1464_v27, %v1456_v26  ;;  %v1458_v30 = vld [vmem:[%s5365_s28 + $0x118] sm:$0xff]  ;;  %v1455_v32 = vld [vmem:[%s5365_s28 + $0x100] sm:$0xff]  ;;  %v1457_v35 = vld [vmem:[%s5365_s28 + $0x110] sm:$0xff] }
 0x11a   : > { %3654 = vmatprep.subr.bf16.mxu1 %v3653_v20  ;;  %v1466_v31 = vld [vmem:[%s5365_s28 + $0x158] sm:$0xff]  ;;  %v1463_v34 = vld [vmem:[%s5365_s28 + $0x140] sm:$0xff]  ;;  %v1465_v36 = vld [vmem:[%s5365_s28 + $0x150] sm:$0xff] }
 0x11b   : > { %v3657_v33 = vpack.c.bf16 %v1466_v31, %v1458_v30  ;;  %v3531_v37 = vpack.c.bf16 %v1463_v34, %v1455_v32  ;;  %v1472_v38 = vld [vmem:[%s5365_s28 + $0x188] sm:$0xff]  ;;  %v1474_v40 = vld [vmem:[%s5365_s28 + $0x198] sm:$0xff]  ;;  %v3659_v41 = vpack.c.bf16 %v1465_v36, %v1457_v35  ;;  %v1471_v44 = vld [vmem:[%s5365_s28 + $0x180] sm:$0xff] }
 0x11c   : > { %3528 = vmatpush1.bf16.msra.mxu0 %v3527_v24  ;;  %v1480_v39 = vld [vmem:[%s5365_s28 + $0x1c8] sm:$0xff]  ;;  %v1482_v43 = vld [vmem:[%s5365_s28 + $0x1d8] sm:$0xff]  ;;  %v1479_v45 = vld [vmem:[%s5365_s28 + $0x1c0] sm:$0xff] }
 0x11d   : > { %3656 = vmatpush1.bf16.msra.mxu1 %v3655_v28  ;;  %3530 = vmatprep.subr.bf16.mxu0 %v3529_v29  ;;  %v3533_v42 = vpack.c.bf16 %v1480_v39, %v1472_v38  ;;  %v3661_v46 = vpack.c.bf16 %v1482_v43, %v1474_v40  ;;  %v1473_v47 = vld [vmem:[%s5365_s28 + $0x190] sm:$0xff]  ;;  %v1488_v49 = vld [vmem:[%s5365_s28 + $0x208] sm:$0xff]  ;;  %v1490_v51 = vld [vmem:[%s5365_s28 + $0x218] sm:$0xff]  ;;  %v3535_v53 = vpack.c.bf16 %v1479_v45, %v1471_v44 }
 0x11e   : > { %3658 = vmatprep.subr.bf16.mxu1 %v3657_v33  ;;  %v1481_v48 = vld [vmem:[%s5365_s28 + $0x1d0] sm:$0xff]  ;;  %v1496_v50 = vld [vmem:[%s5365_s28 + $0x248] sm:$0xff]  ;;  %v1498_v52 = vld [vmem:[%s5365_s28 + $0x258] sm:$0xff] }
 0x11f   : > { %v3663_v54 = vpack.c.bf16 %v1481_v48, %v1473_v47  ;;  %v3537_v55 = vpack.c.bf16 %v1496_v50, %v1488_v49  ;;  %v1487_v56 = vld [vmem:[%s5365_s28 + $0x200] sm:$0xff]  ;;  %v1489_v58 = vld [vmem:[%s5365_s28 + $0x210] sm:$0xff]  ;;  %v3665_v59 = vpack.c.bf16 %v1498_v52, %v1490_v51  ;;  %v1504_v61 = vld [vmem:[%s5365_s28 + $0x288] sm:$0xff] }
 0x120   : > { %3532 = vmatpush1.bf16.msra.mxu0 %v3531_v37  ;;  %v1495_v57 = vld [vmem:[%s5365_s28 + $0x240] sm:$0xff]  ;;  %v1497_v60 = vld [vmem:[%s5365_s28 + $0x250] sm:$0xff]  ;;  %v1512_v62 = vld [vmem:[%s5365_s28 + $0x2c8] sm:$0xff] }
 0x121   : > { %3660 = vmatpush1.bf16.msra.mxu1 %v3659_v41  ;;  %3534 = vmatprep.subr.bf16.mxu0 %v3533_v42  ;;  %v1506_v63 = vld [vmem:[%s5365_s28 + $0x298] sm:$0xff]  ;;  %v3539_v2 = vpack.c.bf16 %v1495_v57, %v1487_v56  ;;  %v3667_v3 = vpack.c.bf16 %v1497_v60, %v1489_v58  ;;  %v3541_v4 = vpack.c.bf16 %v1512_v62, %v1504_v61  ;;  %v1503_v5 = vld [vmem:[%s5365_s28 + $0x280] sm:$0xff]  ;;  %v1505_v7 = vld [vmem:[%s5365_s28 + $0x290] sm:$0xff] }
 0x122   : > { %3662 = vmatprep.subr.bf16.mxu1 %v3661_v46  ;;  %v1514_v1 = vld [vmem:[%s5365_s28 + $0x2d8] sm:$0xff]  ;;  %v1511_v6 = vld [vmem:[%s5365_s28 + $0x2c0] sm:$0xff]  ;;  %v1513_v9 = vld [vmem:[%s5365_s28 + $0x2d0] sm:$0xff] }
 0x123   : > { %v3669_v8 = vpack.c.bf16 %v1514_v1, %v1506_v63  ;;  %v1520_v10 = vld [vmem:[%s5365_s28 + $0x308] sm:$0xff]  ;;  %v1522_v12 = vld [vmem:[%s5365_s28 + $0x318] sm:$0xff]  ;;  %v3543_v14 = vpack.c.bf16 %v1511_v6, %v1503_v5  ;;  %v3671_v15 = vpack.c.bf16 %v1513_v9, %v1505_v7  ;;  %v1519_v17 = vld [vmem:[%s5365_s28 + $0x300] sm:$0xff] }
 0x124   : > { %3536 = vmatpush1.bf16.msra.mxu0 %v3535_v53  ;;  %v1528_v11 = vld [vmem:[%s5365_s28 + $0x348] sm:$0xff]  ;;  %v1530_v13 = vld [vmem:[%s5365_s28 + $0x358] sm:$0xff]  ;;  %v1527_v18 = vld [vmem:[%s5365_s28 + $0x340] sm:$0xff] }
 0x125   : > { %3664 = vmatpush1.bf16.msra.mxu1 %v3663_v54  ;;  %3538 = vmatprep.subr.bf16.mxu0 %v3537_v55  ;;  %v3545_v16 = vpack.c.bf16 %v1528_v11, %v1520_v10  ;;  %v1521_v19 = vld [vmem:[%s5365_s28 + $0x310] sm:$0xff]  ;;  %v3673_v20 = vpack.c.bf16 %v1530_v13, %v1522_v12  ;;  %v1536_v22 = vld [vmem:[%s5365_s28 + $0x388] sm:$0xff]  ;;  %v1538_v24 = vld [vmem:[%s5365_s28 + $0x398] sm:$0xff]  ;;  %v3547_v26 = vpack.c.bf16 %v1527_v18, %v1519_v17 }
 0x126   : > { %3666 = vmatprep.subr.bf16.mxu1 %v3665_v59  ;;  %v1529_v21 = vld [vmem:[%s5365_s28 + $0x350] sm:$0xff]  ;;  %v1544_v23 = vld [vmem:[%s5365_s28 + $0x3c8] sm:$0xff]  ;;  %v1546_v25 = vld [vmem:[%s5365_s28 + $0x3d8] sm:$0xff] }
 0x127   : > { %v3675_v27 = vpack.c.bf16 %v1529_v21, %v1521_v19  ;;  %v3549_v28 = vpack.c.bf16 %v1544_v23, %v1536_v22  ;;  %v1535_v29 = vld [vmem:[%s5365_s28 + $0x380] sm:$0xff]  ;;  %v1537_v31 = vld [vmem:[%s5365_s28 + $0x390] sm:$0xff]  ;;  %v3677_v32 = vpack.c.bf16 %v1546_v25, %v1538_v24  ;;  %v1552_v34 = vld [vmem:[%s5365_s28 + $0x408] sm:$0xff] }
 0x128   : > { %3540 = vmatpush1.bf16.msra.mxu0 %v3539_v2  ;;  %v1543_v30 = vld [vmem:[%s5365_s28 + $0x3c0] sm:$0xff]  ;;  %v1545_v33 = vld [vmem:[%s5365_s28 + $0x3d0] sm:$0xff]  ;;  %v1560_v35 = vld [vmem:[%s5365_s28 + $0x448] sm:$0xff] }
 0x129   : > { %3668 = vmatpush1.bf16.msra.mxu1 %v3667_v3  ;;  %3542 = vmatprep.subr.bf16.mxu0 %v3541_v4  ;;  %v1554_v36 = vld [vmem:[%s5365_s28 + $0x418] sm:$0xff]  ;;  %v3551_v38 = vpack.c.bf16 %v1543_v30, %v1535_v29  ;;  %v3679_v39 = vpack.c.bf16 %v1545_v33, %v1537_v31  ;;  %v3553_v40 = vpack.c.bf16 %v1560_v35, %v1552_v34  ;;  %v1551_v41 = vld [vmem:[%s5365_s28 + $0x400] sm:$0xff]  ;;  %v1553_v43 = vld [vmem:[%s5365_s28 + $0x410] sm:$0xff] }
 0x12a   : > { %3670 = vmatprep.subr.bf16.mxu1 %v3669_v8  ;;  %v1562_v37 = vld [vmem:[%s5365_s28 + $0x458] sm:$0xff]  ;;  %v1559_v42 = vld [vmem:[%s5365_s28 + $0x440] sm:$0xff]  ;;  %v1561_v45 = vld [vmem:[%s5365_s28 + $0x450] sm:$0xff] }
 0x12b   : > { %v3681_v44 = vpack.c.bf16 %v1562_v37, %v1554_v36  ;;  %v1568_v46 = vld [vmem:[%s5365_s28 + $0x488] sm:$0xff]  ;;  %v1570_v48 = vld [vmem:[%s5365_s28 + $0x498] sm:$0xff]  ;;  %v3555_v50 = vpack.c.bf16 %v1559_v42, %v1551_v41  ;;  %v3683_v51 = vpack.c.bf16 %v1561_v45, %v1553_v43  ;;  %v1567_v53 = vld [vmem:[%s5365_s28 + $0x480] sm:$0xff] }
 0x12c   : > { %3544 = vmatpush1.bf16.msra.mxu0 %v3543_v14  ;;  %v1576_v47 = vld [vmem:[%s5365_s28 + $0x4c8] sm:$0xff]  ;;  %v1578_v49 = vld [vmem:[%s5365_s28 + $0x4d8] sm:$0xff]  ;;  %v1575_v54 = vld [vmem:[%s5365_s28 + $0x4c0] sm:$0xff] }
 0x12d   : > { %3672 = vmatpush1.bf16.msra.mxu1 %v3671_v15  ;;  %3546 = vmatprep.subr.bf16.mxu0 %v3545_v16  ;;  %v3557_v52 = vpack.c.bf16 %v1576_v47, %v1568_v46  ;;  %v1569_v55 = vld [vmem:[%s5365_s28 + $0x490] sm:$0xff]  ;;  %v3685_v56 = vpack.c.bf16 %v1578_v49, %v1570_v48  ;;  %v1584_v58 = vld [vmem:[%s5365_s28 + $0x508] sm:$0xff]  ;;  %v1586_v60 = vld [vmem:[%s5365_s28 + $0x518] sm:$0xff]  ;;  %v3559_v62 = vpack.c.bf16 %v1575_v54, %v1567_v53 }
 0x12e   : > { %3674 = vmatprep.subr.bf16.mxu1 %v3673_v20  ;;  %v1577_v57 = vld [vmem:[%s5365_s28 + $0x4d0] sm:$0xff]  ;;  %v1592_v59 = vld [vmem:[%s5365_s28 + $0x548] sm:$0xff]  ;;  %v1594_v61 = vld [vmem:[%s5365_s28 + $0x558] sm:$0xff] }
 0x12f   : > { %v1583_v63 = vld [vmem:[%s5365_s28 + $0x500] sm:$0xff]  ;;  %v3687_v1 = vpack.c.bf16 %v1577_v57, %v1569_v55  ;;  %v3561_v2 = vpack.c.bf16 %v1592_v59, %v1584_v58  ;;  %v1585_v4 = vld [vmem:[%s5365_s28 + $0x510] sm:$0xff]  ;;  %v3689_v6 = vpack.c.bf16 %v1594_v61, %v1586_v60  ;;  %v1600_v7 = vld [vmem:[%s5365_s28 + $0x588] sm:$0xff] }
 0x130   : > { %3548 = vmatpush1.bf16.msra.mxu0 %v3547_v26  ;;  %v1591_v3 = vld [vmem:[%s5365_s28 + $0x540] sm:$0xff]  ;;  %v1593_v5 = vld [vmem:[%s5365_s28 + $0x550] sm:$0xff]  ;;  %v1608_v8 = vld [vmem:[%s5365_s28 + $0x5c8] sm:$0xff] }
 0x131   : > { %3676 = vmatpush1.bf16.msra.mxu1 %v3675_v27  ;;  %3550 = vmatprep.subr.bf16.mxu0 %v3549_v28  ;;  %v1602_v9 = vld [vmem:[%s5365_s28 + $0x598] sm:$0xff]  ;;  %v1599_v11 = vld [vmem:[%s5365_s28 + $0x580] sm:$0xff]  ;;  %v3563_v13 = vpack.c.bf16 %v1591_v3, %v1583_v63  ;;  %v1601_v14 = vld [vmem:[%s5365_s28 + $0x590] sm:$0xff]  ;;  %v3691_v17 = vpack.c.bf16 %v1593_v5, %v1585_v4  ;;  %v3565_v18 = vpack.c.bf16 %v1608_v8, %v1600_v7 }
 0x132   : > { %3678 = vmatprep.subr.bf16.mxu1 %v3677_v32  ;;  %v1610_v10 = vld [vmem:[%s5365_s28 + $0x5d8] sm:$0xff]  ;;  %v1607_v12 = vld [vmem:[%s5365_s28 + $0x5c0] sm:$0xff]  ;;  %v1609_v15 = vld [vmem:[%s5365_s28 + $0x5d0] sm:$0xff] }
 0x133   : > { %v1616_v16 = vld [vmem:[%s5365_s28 + $0x608] sm:$0xff]  ;;  %v1618_v20 = vld [vmem:[%s5365_s28 + $0x618] sm:$0xff]  ;;  %v3693_v22 = vpack.c.bf16 %v1610_v10, %v1602_v9  ;;  %v5487_v23 = vld [vmem:[%s5365_s28 + $0x600] sm:$0xff]  ;;  %v3567_v30 = vpack.c.bf16 %v1607_v12, %v1599_v11  ;;  %v3695_v37 = vpack.c.bf16 %v1609_v15, %v1601_v14 }
 0x134   : > { %3552 = vmatpush1.bf16.msra.mxu0 %v3551_v38  ;;  %v1624_v19 = vld [vmem:[%s5365_s28 + $0x648] sm:$0xff]  ;;  %v1626_v21 = vld [vmem:[%s5365_s28 + $0x658] sm:$0xff]  ;;  %v5490_v24 = vld [vmem:[%s5365_s28 + $0x640] sm:$0xff] }
 0x135   : > { %3680 = vmatpush1.bf16.msra.mxu1 %v3679_v39  ;;  %3554 = vmatprep.subr.bf16.mxu0 %v3553_v40  ;;  %v549_v25 = vld [vmem:[%s5363_s3 + $0x8] sm:$0xff]  ;;  %v5497_v31 = vld [vmem:[%s5365_s28 + $0x610] sm:$0xff]  ;;  %v3569_v38 = vpack.c.bf16 %v1624_v19, %v1616_v16  ;;  %v3697_v43 = vpack.c.bf16 %v1626_v21, %v1618_v20  ;;  %v1642_v45 = vld [vmem:[%s5365_s28 + $0x6d8] sm:$0xff]  ;;  %v3571_v48 = vpack.c.bf16 %v5490_v24, %v5487_v23 }
 0x136   : > { %3682 = vmatprep.subr.bf16.mxu1 %v3681_v44  ;;  %v553_v26 = vld [vmem:[%s5363_s3 + $0x28] sm:$0xff]  ;;  %v613_v29 = vmax.f32 %v549_v25, 1e-06  ;;  %v5500_v32 = vld [vmem:[%s5365_s28 + $0x650] sm:$0xff]  ;;  %v1634_v44 = vld [vmem:[%s5365_s28 + $0x698] sm:$0xff] }
 0x137   : > { %v557_v27 = vld [vmem:[%s5363_s3 + $0x48] sm:$0xff]  ;;  %v617_v36 = vmax.f32 %v553_v26, 1e-06  ;;  %v5518_v49 = vld [vmem:[%s5365_s28 + $0x680] sm:$0xff]  ;;  %v5526_v54 = vld [vmem:[%s5365_s28 + $0x690] sm:$0xff]  ;;  %v3699_v60 = vpack.c.bf16 %v5500_v32, %v5497_v31  ;;  %v3701_v3 = vpack.c.bf16 %v1642_v45, %v1634_v44 }
 0x138   : > { %3556 = vmatpush1.bf16.msra.mxu0 %v3555_v50  ;;  %v561_v28 = vld [vmem:[%s5363_s3 + $0x68] sm:$0xff]  ;;  %v621_v42 = vmax.f32 %v557_v27, 1e-06  ;;  %4330 = vlog2.f32 %v613_v29  ;;  %v5521_v50 = vld [vmem:[%s5365_s28 + $0x6c0] sm:$0xff]  ;;  %v5529_v55 = vld [vmem:[%s5365_s28 + $0x6d0] sm:$0xff] }
 0x139   : > { %3684 = vmatpush1.bf16.msra.mxu1 %v3683_v51  ;;  %3558 = vmatprep.subr.bf16.mxu0 %v3557_v52  ;;  %v5503_v33 = vld [vmem:[%s5365_s28 + $0x688] sm:$0xff]  ;;  %v625_v47 = vmax.f32 %v561_v28, 1e-06  ;;  %4332 = vlog2.f32 %v617_v36  ;;  %v1650_v63 = vld [vmem:[%s5365_s28 + $0x718] sm:$0xff]  ;;  %v5543_v5 = vld [vmem:[%s5365_s28 + $0x700] sm:$0xff]  ;;  %v3575_v12 = vpack.c.bf16 %v5521_v50, %v5518_v49 }
 0x13a   : > { %3686 = vmatprep.subr.bf16.mxu1 %v3685_v56  ;;  %v5506_v34 = vld [vmem:[%s5365_s28 + $0x6c8] sm:$0xff]  ;;  %4334 = vlog2.f32 %v621_v42  ;;  %v1658_v4 = vld [vmem:[%s5365_s28 + $0x758] sm:$0xff]  ;;  %v5547_v8 = vld [vmem:[%s5365_s28 + $0x740] sm:$0xff] }
 0x13b   : > { %v565_v35 = vld [vmem:[%s5363_s3 + $0x88] sm:$0xff]  ;;  %4336 = vlog2.f32 %v625_v47  ;;  %v3573_v61 = vpack.c.bf16 %v5506_v34, %v5503_v33  ;;  %v5550_v9 = vld [vmem:[%s5365_s28 + $0x710] sm:$0xff]  ;;  %v1666_v20 = vld [vmem:[%s5365_s28 + $0x798] sm:$0xff]  ;;  %v3705_v23 = vpack.c.bf16 %v1658_v4, %v1650_v63  ;;  %v3579_v29 = vpack.c.bf16 %v5547_v8, %v5543_v5 }
 0x13c   : > { %3560 = vmatpush1.bf16.msra.mxu0 %v3559_v62  ;;  %v569_v39 = vld [vmem:[%s5363_s3 + $0xa8] sm:$0xff]  ;;  %v629_v53 = vmax.f32 %v565_v35, 1e-06  ;;  %v1674_v24 = vld [vmem:[%s5365_s28 + $0x7d8] sm:$0xff]  ;;  %v5570_v25 = vld [vmem:[%s5365_s28 + $0x780] sm:$0xff] }
 0x13d   : > { %3688 = vmatpush1.bf16.msra.mxu1 %v3687_v1  ;;  %3562 = vmatprep.subr.bf16.mxu0 %v3561_v2  ;;  %v573_v40 = vld [vmem:[%s5363_s3 + $0xc8] sm:$0xff]  ;;  %v633_v57 = vmax.f32 %v569_v39, 1e-06  ;;  %v5573_v26 = vld [vmem:[%s5365_s28 + $0x7c0] sm:$0xff]  ;;  %v5580_v31 = vld [vmem:[%s5365_s28 + $0x790] sm:$0xff] }
 0x13e   : > { %3690 = vmatprep.subr.bf16.mxu1 %v3689_v6  ;;  %v577_v41 = vld [vmem:[%s5363_s3 + $0xe8] sm:$0xff]  ;;  %v637_v58 = vmax.f32 %v573_v40, 1e-06  ;;  %4338 = vlog2.f32 %v629_v53  ;;  %v1673_v32 = vld [vmem:[%s5365_s28 + $0x7d0] sm:$0xff]  ;;  %v3583_v42 = vpack.c.bf16 %v5573_v26, %v5570_v25  ;;  %v1690_v49 = vld [vmem:[%s5365_s28 + $0x858] sm:$0xff] }
 0x13f   : > { %v581_v46 = vld [vmem:[%s5363_s3 + $0x108] sm:$0xff]  ;;  %v641_v59 = vmax.f32 %v577_v41, 1e-06  ;;  %4340 = vlog2.f32 %v633_v57  ;;  %v3709_v41 = vpack.c.bf16 %v1674_v24, %v1666_v20  ;;  %v3711_v45 = vpack.c.bf16 %v1673_v32, %v5580_v31 }
 0x140   : > { %3564 = vmatpush1.bf16.msra.mxu0 %v3563_v13  ;;  %v585_v51 = vld [vmem:[%s5363_s3 + $0x128] sm:$0xff]  ;;  %v645_v2 = vmax.f32 %v581_v46, 1e-06  ;;  %4342 = vlog2.f32 %v637_v58  ;;  %v5556_v13 = vld [vmem:[%s5365_s28 + $0x750] sm:$0xff] }
 0x141   : > { %3692 = vmatpush1.bf16.msra.mxu1 %v3691_v17  ;;  %3566 = vmatprep.subr.bf16.mxu0 %v3565_v18  ;;  %v589_v52 = vld [vmem:[%s5363_s3 + $0x148] sm:$0xff]  ;;  %v649_v7 = vmax.f32 %v585_v51, 1e-06  ;;  %4344 = vlog2.f32 %v641_v59  ;;  %v3703_v17 = vpack.c.bf16 %v5529_v55, %v5526_v54 }
 0x142   : > { %3694 = vmatprep.subr.bf16.mxu1 %v3693_v22  ;;  %v5532_v56 = vld [vmem:[%s5365_s28 + $0x708] sm:$0xff]  ;;  %v653_v11 = vmax.f32 %v589_v52, 1e-06  ;;  %4346 = vlog2.f32 %v645_v2  ;;  %v4331_v28 = vpop.eup %4330 }
 0x143   : > { %v1656_v62 = vld [vmem:[%s5365_s28 + $0x748] sm:$0xff]  ;;  %4348 = vlog2.f32 %v649_v7  ;;  %v4333_v34 = vpop.eup %4332 }
 0x144   : > { %3568 = vmatpush1.bf16.msra.mxu0 %v3567_v30  ;;  %v593_v1 = vld [vmem:[%s5363_s3 + $0x168] sm:$0xff]  ;;  %v3577_v18 = vpack.c.bf16 %v1656_v62, %v5532_v56  ;;  %v3707_v30 = vpack.c.bf16 %v5556_v13, %v5550_v9  ;;  %4350 = vlog2.f32 %v653_v11  ;;  %v4335_v40 = vpop.eup %4334 }
 0x145   : > { %3696 = vmatpush1.bf16.msra.mxu1 %v3695_v37  ;;  %3570 = vmatprep.subr.bf16.mxu0 %v3569_v38  ;;  %v597_v6 = vld [vmem:[%s5363_s3 + $0x188] sm:$0xff]  ;;  %v657_v16 = vmax.f32 %v593_v1, 1e-06  ;;  %v679_v37 = vmul.f32 0.6931472, %v4331_v28  ;;  %v4337_v44 = vpop.eup %4336 }
 0x146   : > { %3698 = vmatprep.subr.bf16.mxu1 %v3697_v43  ;;  %v601_v10 = vld [vmem:[%s5363_s3 + $0x1a8] sm:$0xff]  ;;  %v661_v22 = vmax.f32 %v597_v6, 1e-06  ;;  %v687_v43 = vmul.f32 0.6931472, %v4333_v34 }
 0x147   : > { %v5559_v14 = vld [vmem:[%s5365_s28 + $0x788] sm:$0xff]  ;;  %v665_v27 = vmax.f32 %v601_v10, 1e-06  ;;  %4352 = vlog2.f32 %v657_v16  ;;  %v695_v46 = vmul.f32 0.6931472, %v4335_v40  ;;  %v806_v47 = vmul.f32 %v679_v37, %v5379_v0 }
 0x148   : > { %3572 = vmatpush1.bf16.msra.mxu0 %v3571_v48  ;;  %v605_v15 = vld [vmem:[%s5363_s3 + $0x1c8] sm:$0xff]  ;;  %4354 = vlog2.f32 %v661_v22  ;;  %v1682_v48 = vld [vmem:[%s5365_s28 + $0x818] sm:$0xff]  ;;  %v4339_v50 = vpop.eup %4338  ;;  %v703_v51 = vmul.f32 0.6931472, %v4337_v44  ;;  %v810_v52 = vmul.f32 %v687_v43, %v5379_v0 }
 0x149   : > { %3700 = vmatpush1.bf16.msra.mxu1 %v3699_v60  ;;  %3574 = vmatprep.subr.bf16.mxu0 %v3573_v61  ;;  %v1672_v19 = vld [vmem:[%s5365_s28 + $0x7c8] sm:$0xff]  ;;  %v669_v33 = vmax.f32 %v605_v15, 1e-06  ;;  %4356 = vlog2.f32 %v665_v27  ;;  %v4341_v54 = vpop.eup %4340  ;;  %v711_v55 = vmul.f32 0.6931472, %v4339_v50  ;;  %v814_v56 = vmul.f32 %v695_v46, %v5379_v0 }
 0x14a   : > { %v609_v21 = vld [vmem:[%s5363_s3 + $0x1e8] sm:$0xff]  ;;  %3702 = vmatprep.subr.bf16.mxu1 %v3701_v3  ;;  %v3581_v35 = vpack.c.bf16 %v1672_v19, %v5559_v14  ;;  %v871_v57 = vmul.f32 1.442695, %v806_v47  ;;  %v4343_v58 = vpop.eup %4342  ;;  %v719_v59 = vmul.f32 0.6931472, %v4341_v54  ;;  %v818_v60 = vmul.f32 %v703_v51, %v5379_v0  ;;  %v552_v54 = vld [vmem:[%s5363_s3 + $0x20] sm:$0xff] }
 0x14b   : > { %v673_v36 = vmax.f32 %v609_v21, 1e-06  ;;  %v1680_v38 = vld [vmem:[%s5365_s28 + $0x808] sm:$0xff]  ;;  %4358 = vlog2.f32 %v669_v33  ;;  %v879_v61 = vmul.f32 1.442695, %v810_v52  ;;  %v3713_v62 = vpack.c.bf16 %v1690_v49, %v1682_v48  ;;  %v4345_v63 = vpop.eup %4344  ;;  %v548_v48 = vld [vmem:[%s5363_s3] sm:$0xff] }
 0x14c   : > { %3576 = vmatpush1.bf16.msra.mxu0 %v3575_v12  ;;  %v1688_v39 = vld [vmem:[%s5365_s28 + $0x848] sm:$0xff]  ;;  %v727_v1 = vmul.f32 0.6931472, %v4343_v58  ;;  %v822_v2 = vmul.f32 %v711_v55, %v5379_v0  ;;  %v887_v3 = vmul.f32 1.442695, %v814_v56  ;;  %v4347_v4 = vpop.eup %4346  ;;  %v826_v6 = vmul.f32 %v719_v59, %v5379_v0 }
 0x14d   : > { %3704 = vmatpush1.bf16.msra.mxu1 %v3703_v17  ;;  %3578 = vmatprep.subr.bf16.mxu0 %v3577_v18  ;;  %v3585_v53 = vpack.c.bf16 %v1688_v39, %v1680_v38  ;;  %4360 = vlog2.f32 %v673_v36  ;;  %v735_v5 = vmul.f32 0.6931472, %v4345_v63  ;;  %v895_v7 = vmul.f32 1.442695, %v818_v60  ;;  %v4349_v8 = vpop.eup %4348 }
 0x14e   : > { %3706 = vmatprep.subr.bf16.mxu1 %v3705_v23  ;;  %4362 = vpow2.f32 %v871_v57  ;;  %v743_v9 = vmul.f32 0.6931472, %v4347_v4  ;;  %v830_v10 = vmul.f32 %v727_v1, %v5379_v0  ;;  %v903_v11 = vmul.f32 1.442695, %v822_v2  ;;  %v4351_v12 = vpop.eup %4350 }
 0x14f   : > { %4364 = vpow2.f32 %v879_v61  ;;  %v751_v13 = vmul.f32 0.6931472, %v4349_v8  ;;  %v834_v14 = vmul.f32 %v735_v5, %v5379_v0  ;;  %v911_v15 = vmul.f32 1.442695, %v826_v6  ;;  %v556_v61 = vld [vmem:[%s5363_s3 + $0x40] sm:$0xff] }
 0x150   : > { %3580 = vmatpush1.bf16.msra.mxu0 %v3579_v29  ;;  %4366 = vpow2.f32 %v887_v3  ;;  %v759_v17 = vmul.f32 0.6931472, %v4351_v12  ;;  %v838_v18 = vmul.f32 %v743_v9, %v5379_v0  ;;  %v919_v19 = vmul.f32 1.442695, %v830_v10  ;;  %v560_v6 = vld [vmem:[%s5363_s3 + $0x60] sm:$0xff] }
 0x151   : > { %3708 = vmatpush1.bf16.msra.mxu1 %v3707_v30  ;;  %3582 = vmatprep.subr.bf16.mxu0 %v3581_v35  ;;  %4368 = vpow2.f32 %v895_v7  ;;  %v4353_v16 = vpop.eup %4352  ;;  %v842_v22 = vmul.f32 %v751_v13, %v5379_v0  ;;  %v927_v23 = vmul.f32 1.442695, %v834_v14  ;;  %v612_v56 = vmax.f32 %v548_v48, 1e-06  ;;  %v564_v7 = vld [vmem:[%s5363_s3 + $0x80] sm:$0xff] }
 0x152   : > { %3710 = vmatprep.subr.bf16.mxu1 %v3709_v41  ;;  %4370 = vpow2.f32 %v903_v11  ;;  %v4355_v20 = vpop.eup %4354  ;;  %v767_v21 = vmul.f32 0.6931472, %v4353_v16  ;;  %v846_v26 = vmul.f32 %v759_v17, %v5379_v0  ;;  %v935_v27 = vmul.f32 1.442695, %v838_v18 }
 0x153   : > { %4372 = vpow2.f32 %v911_v15  ;;  %v4357_v24 = vpop.eup %4356  ;;  %v775_v25 = vmul.f32 0.6931472, %v4355_v20  ;;  %v943_v31 = vmul.f32 1.442695, %v842_v22  ;;  %v616_v63 = vmax.f32 %v552_v54, 1e-06 }
 0x154   : > { %3584 = vmatpush1.bf16.msra.mxu0 %v3583_v42  ;;  %4374 = vpow2.f32 %v919_v19  ;;  %v783_v29 = vmul.f32 0.6931472, %v4357_v24  ;;  %v850_v30 = vmul.f32 %v767_v21, %v5379_v0  ;;  %v951_v35 = vmul.f32 1.442695, %v846_v26  ;;  %v5613_v15 = vld [vmem:[%s5363_s3 + $0xa0] sm:$0xff] }
 0x155   : > { %3712 = vmatpush1.bf16.msra.mxu1 %v3711_v45  ;;  %3586 = vmatprep.subr.bf16.mxu0 %v3585_v53  ;;  %v4359_v28 = vpop.eup %4358  ;;  %4376 = vpow2.f32 %v927_v23  ;;  %v854_v34 = vmul.f32 %v775_v25, %v5379_v0  ;;  %v620_v9 = vmax.f32 %v556_v61, 1e-06  ;;  %v624_v18 = vmax.f32 %v560_v6, 1e-06  ;;  %v572_v54 = vld [vmem:[%s5363_s3 + $0xc0] sm:$0xff] }
 0x156   : > { %3714 = vmatprep.subr.bf16.mxu1 %v3713_v62  ;;  %v791_v33 = vmul.f32 0.6931472, %v4359_v28  ;;  %4378 = vpow2.f32 %v935_v27  ;;  %v858_v37 = vmul.f32 %v783_v29, %v5379_v0  ;;  %v959_v38 = vmul.f32 1.442695, %v850_v30 }
 0x157   : > { %v4361_v32 = vpop.eup %4360  ;;  %4380 = vpow2.f32 %v943_v31  ;;  %v967_v41 = vmul.f32 1.442695, %v854_v34  ;;  %v628_v19 = vmax.f32 %v564_v7, 1e-06  ;;  %v632_v28 = vmax.f32 %v5613_v15, 1e-06 }
 0x158   : > { %v799_v36 = vmul.f32 0.6931472, %v4361_v32  ;;  %v4363_v39 = vpop.eup %4362  ;;  %v862_v40 = vmul.f32 %v791_v33, %v5379_v0  ;;  %4382 = vpow2.f32 %v951_v35  ;;  %v975_v44 = vmul.f32 1.442695, %v858_v37  ;;  %v580_v7 = vld [vmem:[%s5363_s3 + $0x100] sm:$0xff] }
 0x159   : > { %v4365_v42 = vpop.eup %4364  ;;  %4384 = vpow2.f32 %v959_v38  ;;  %v584_v15 = vld [vmem:[%s5363_s3 + $0x120] sm:$0xff] }
 0x15a   : > { %v866_v43 = vmul.f32 %v799_v36, %v5379_v0  ;;  %v4367_v45 = vpop.eup %4366  ;;  %4386 = vpow2.f32 %v967_v41  ;;  %v983_v46 = vmul.f32 1.442695, %v862_v40  ;;  %v1004_v47 = vadd.f32 %v4365_v42, %v4363_v39 }
 0x15b   : > { %v4369_v49 = vpop.eup %4368  ;;  %4388 = vpow2.f32 %v975_v44 }
 0x15c   : > { %v991_v50 = vmul.f32 1.442695, %v866_v43  ;;  %v4371_v51 = vpop.eup %4370  ;;  %4390 = vpow2.f32 %v983_v46  ;;  %v1005_v52 = vrot.slane %v1004_v47, 4  ;;  %v1032_v53 = vadd.f32 %v4369_v49, %v4367_v45 }
 0x15d   : > { %v4373_v55 = vpop.eup %4372 }
 0x15e   : > { %4392 = vpow2.f32 %v991_v50  ;;  %v4375_v57 = vpop.eup %4374  ;;  %v1006_v58 = vadd.f32 %v1005_v52, %v1004_v47  ;;  %v1033_v59 = vrot.slane %v1032_v53, 4  ;;  %v1060_v60 = vadd.f32 %v4373_v55, %v4371_v51 }
 0x15f   : > { %v4377_v62 = vpop.eup %4376  ;;  %4394 = vlog2.f32 %v612_v56 }
 0x160   : > { %v4379_v1 = vpop.eup %4378  ;;  %v1007_v2 = vrot.slane %v1006_v58, 2  ;;  %v1034_v3 = vadd.f32 %v1033_v59, %v1032_v53  ;;  %v1061_v4 = vrot.slane %v1060_v60, 4  ;;  %v1088_v5 = vadd.f32 %v4377_v62, %v4375_v57  ;;  %v576_v62 = vld [vmem:[%s5363_s3 + $0xe0] sm:$0xff] }
 0x161   : > { %v4381_v8 = vpop.eup %4380  ;;  %4396 = vlog2.f32 %v616_v63 }
 0x162   : > { %v4383_v10 = vpop.eup %4382  ;;  %v1008_v11 = vadd.f32 %v1007_v2, %v1006_v58  ;;  %v1035_v12 = vrot.slane %v1034_v3, 2  ;;  %v1062_v13 = vadd.f32 %v1061_v4, %v1060_v60  ;;  %v1089_v14 = vrot.slane %v1088_v5, 4 }
 0x163   : > { %v4385_v16 = vpop.eup %4384  ;;  %v1116_v17 = vadd.f32 %v4381_v8, %v4379_v1  ;;  %4398 = vlog2.f32 %v620_v9  ;;  %v636_v2 = vmax.f32 %v572_v54, 1e-06  ;;  %v640_v9 = vmax.f32 %v576_v62, 1e-06 }
 0x164   : > { %v4387_v20 = vpop.eup %4386  ;;  %v1009_v21 = vrot.slane %v1008_v11, 1  ;;  %v1036_v22 = vadd.f32 %v1035_v12, %v1034_v3  ;;  %v1063_v23 = vrot.slane %v1062_v13, 2  ;;  %v1090_v24 = vadd.f32 %v1089_v14, %v1088_v5 }
 0x165   : > { %v4389_v25 = vpop.eup %4388  ;;  %v1117_v26 = vrot.slane %v1116_v17, 4  ;;  %v1144_v27 = vadd.f32 %v4385_v16, %v4383_v10  ;;  %4400 = vlog2.f32 %v624_v18  ;;  %v588_v16 = vld [vmem:[%s5363_s3 + $0x140] sm:$0xff] }
 0x166   : > { %v4391_v29 = vpop.eup %4390  ;;  %v1010_v30 = vadd.f32 %v1009_v21, %v1008_v11  ;;  %v1037_v31 = vrot.slane %v1036_v22, 1  ;;  %v1064_v32 = vadd.f32 %v1063_v23, %v1062_v13  ;;  %v1091_v33 = vrot.slane %v1090_v24, 2  ;;  %v596_v23 = vld [vmem:[%s5363_s3 + $0x180] sm:$0xff] }
 0x167   : > { %v1118_v35 = vadd.f32 %v1117_v26, %v1116_v17  ;;  %v1145_v36 = vrot.slane %v1144_v27, 4  ;;  %v1172_v37 = vadd.f32 %v4389_v25, %v4387_v20  ;;  %v644_v17 = vmax.f32 %v580_v7, 1e-06 }
 0x168   : > { %v4393_v34 = vpop.eup %4392  ;;  %v1038_v38 = vadd.f32 %v1037_v31, %v1036_v22  ;;  %v1065_v39 = vrot.slane %v1064_v32, 1  ;;  %v1092_v40 = vadd.f32 %v1091_v33, %v1090_v24  ;;  %v1223_v45 = vmul.f32 0.0625, %v1010_v30  ;;  %v592_v22 = vld [vmem:[%s5363_s3 + $0x160] sm:$0xff] }
 0x169   : > { %v1200_v41 = vadd.f32 %v4393_v34, %v4391_v29  ;;  %v1119_v42 = vrot.slane %v1118_v35, 2  ;;  %v1146_v43 = vadd.f32 %v1145_v36, %v1144_v27  ;;  %v1173_v44 = vrot.slane %v1172_v37, 4  ;;  %v4395_v50 = vpop.eup %4394 }
 0x16a   : > { %v1066_v46 = vadd.f32 %v1065_v39, %v1064_v32  ;;  %v1093_v47 = vrot.slane %v1092_v40, 1  ;;  %v1227_v49 = vmul.f32 0.0625, %v1038_v38  ;;  %4402 = vlog2.f32 %v1223_v45 }
 0x16b   : > { %v1201_v48 = vrot.slane %v1200_v41, 4  ;;  %v1120_v51 = vadd.f32 %v1119_v42, %v1118_v35  ;;  %v1147_v52 = vrot.slane %v1146_v43, 2  ;;  %v1174_v53 = vadd.f32 %v1173_v44, %v1172_v37  ;;  %v4397_v58 = vpop.eup %4396  ;;  %v600_v42 = vld [vmem:[%s5363_s3 + $0x1a0] sm:$0xff] }
 0x16c   : > { %v1094_v55 = vadd.f32 %v1093_v47, %v1092_v40  ;;  %v1231_v57 = vmul.f32 0.0625, %v1066_v46  ;;  %4404 = vlog2.f32 %v1227_v49  ;;  %v5622_v21 = vstv %s5382_s16 }
 0x16d   : > { %v1202_v56 = vadd.f32 %v1201_v48, %v1200_v41  ;;  %v1121_v59 = vrot.slane %v1120_v51, 1  ;;  %v1148_v60 = vadd.f32 %v1147_v52, %v1146_v43  ;;  %v1175_v61 = vrot.slane %v1174_v53, 2  ;;  %v4399_v3 = vpop.eup %4398  ;;  %v604_v43 = vld [vmem:[%s5363_s3 + $0x1c0] sm:$0xff] }
 0x16e   : > { %4406 = vlog2.f32 %v628_v19  ;;  %v1235_v1 = vmul.f32 0.0625, %v1094_v55  ;;  %v648_v26 = vmax.f32 %v584_v15, 1e-06  ;;  %v652_v27 = vmax.f32 %v588_v16, 1e-06 }
 0x16f   : > { %v1203_v63 = vrot.slane %v1202_v56, 2  ;;  %4408 = vlog2.f32 %v1231_v57  ;;  %v1122_v4 = vadd.f32 %v1121_v59, %v1120_v51  ;;  %v1149_v5 = vrot.slane %v1148_v60, 1  ;;  %v4401_v10 = vpop.eup %4400 }
 0x170   : > { %v1176_v6 = vadd.f32 %v1175_v61, %v1174_v53  ;;  %4410 = vlog2.f32 %v1235_v1  ;;  %v677_v31 = vmul.f32 0.6931472, %v4395_v50  ;;  %v656_v34 = vmax.f32 %v592_v22, 1e-06  ;;  %v608_v53 = vld [vmem:[%s5363_s3 + $0x1e0] sm:$0xff] }
 0x171   : > { %v1204_v8 = vadd.f32 %v1203_v63, %v1202_v56  ;;  %v1150_v11 = vadd.f32 %v1149_v5, %v1148_v60  ;;  %v1239_v13 = vmul.f32 0.0625, %v1122_v4  ;;  %4412 = vlog2.f32 %v632_v28 }
 0x172   : > { %v1177_v12 = vrot.slane %v1176_v6, 1  ;;  %4414 = vlog2.f32 %v636_v2  ;;  %v660_v35 = vmax.f32 %v596_v23, 1e-06  ;;  %v685_v38 = vmul.f32 0.6931472, %v4397_v58 }
 0x173   : > { %v1205_v14 = vrot.slane %v1204_v8, 1  ;;  %v1243_v19 = vmul.f32 0.0625, %v1150_v11  ;;  %4416 = vlog2.f32 %v1239_v13  ;;  %v693_v39 = vmul.f32 0.6931472, %v4399_v3 }
 0x174   : > { %v1178_v18 = vadd.f32 %v1177_v12, %v1176_v6  ;;  %4418 = vlog2.f32 %v640_v9  ;;  %v4403_v24 = vpop.eup %4402  ;;  %v701_v44 = vmul.f32 0.6931472, %v4401_v10  ;;  %v805_v48 = vmul.f32 %v677_v31, %v5379_v0 }
 0x175   : > { %v1206_v20 = vadd.f32 %v1205_v14, %v1204_v8  ;;  %4420 = vlog2.f32 %v1243_v19  ;;  %v1257_v30 = vmul.f32 0.6931472, %v4403_v24  ;;  %v664_v55 = vmax.f32 %v600_v42, 1e-06 }
 0x176   : > { %v1247_v25 = vmul.f32 0.0625, %v1178_v18  ;;  %v4405_v28 = vpop.eup %4404  ;;  %4422 = vlog2.f32 %v644_v17  ;;  %v668_v56 = vmax.f32 %v604_v43, 1e-06  ;;  %v809_v57 = vmul.f32 %v685_v38, %v5379_v0 }
 0x177   : > { %v1251_v29 = vmul.f32 0.0625, %v1206_v20  ;;  %v1265_v33 = vmul.f32 0.6931472, %v4405_v28  ;;  %v1320_v37 = vmul.f32 %v5622_v21, %v1257_v30  ;;  %v813_v61 = vmul.f32 %v693_v39, %v5379_v0 }
 0x178   : > { %v4407_v32 = vpop.eup %4406  ;;  %4424 = vlog2.f32 %v1247_v25  ;;  %v672_v1 = vmax.f32 %v608_v53, 1e-06  ;;  %v817_v2 = vmul.f32 %v701_v44, %v5379_v0  ;;  %v869_v6 = vmul.f32 1.442695, %v805_v48 }
 0x179   : > { %v4409_v36 = vpop.eup %4408  ;;  %4426 = vlog2.f32 %v1251_v29  ;;  %v1324_v41 = vmul.f32 %v5622_v21, %v1265_v33  ;;  %v1353_v46 = vmul.f32 1.442695, %v1320_v37  ;;  %v709_v47 = vmul.f32 0.6931472, %v4407_v32 }
 0x17a   : > { %v1273_v40 = vmul.f32 0.6931472, %v4409_v36  ;;  %4428 = vlog2.f32 %v648_v26  ;;  %v4411_v45 = vpop.eup %4410  ;;  %v877_v10 = vmul.f32 1.442695, %v809_v57  ;;  %v885_v14 = vmul.f32 1.442695, %v813_v61 }
 0x17b   : > { %4430 = vlog2.f32 %v652_v27  ;;  %v4413_v49 = vpop.eup %4412  ;;  %v1281_v50 = vmul.f32 0.6931472, %v4411_v45  ;;  %v1361_v52 = vmul.f32 1.442695, %v1324_v41  ;;  %v821_v5 = vmul.f32 %v709_v47, %v5379_v0 }
 0x17c   : > { %v1328_v51 = vmul.f32 %v5622_v21, %v1273_v40  ;;  %4432 = vlog2.f32 %v656_v34  ;;  %v4415_v54 = vpop.eup %4414  ;;  %v717_v12 = vmul.f32 0.6931472, %v4413_v49  ;;  %v893_v23 = vmul.f32 1.442695, %v817_v2 }
 0x17d   : > { %4434 = vpow2.f32 %v1353_v46  ;;  %v4417_v58 = vpop.eup %4416  ;;  %v1332_v59 = vmul.f32 %v5622_v21, %v1281_v50  ;;  %v725_v13 = vmul.f32 0.6931472, %v4415_v54  ;;  %v901_v43 = vmul.f32 1.442695, %v821_v5 }
 0x17e   : > { %4436 = vpow2.f32 %v1361_v52  ;;  %v1369_v60 = vmul.f32 1.442695, %v1328_v51  ;;  %v4419_v62 = vpop.eup %4418  ;;  %v1289_v63 = vmul.f32 0.6931472, %v4417_v58  ;;  %v825_v31 = vmul.f32 %v717_v12, %v5379_v0 }
 0x17f   : > { %4438 = vlog2.f32 %v660_v35  ;;  %v4421_v3 = vpop.eup %4420  ;;  %v1377_v4 = vmul.f32 1.442695, %v1332_v59  ;;  %v733_v22 = vmul.f32 0.6931472, %v4419_v62  ;;  %v829_v35 = vmul.f32 %v725_v13, %v5379_v0 }
 0x180   : > { %4440 = vpow2.f32 %v1369_v60  ;;  %v4423_v7 = vpop.eup %4422  ;;  %v1297_v8 = vmul.f32 0.6931472, %v4421_v3  ;;  %v1336_v9 = vmul.f32 %v5622_v21, %v1289_v63  ;;  %v909_v47 = vmul.f32 1.442695, %v825_v31  ;;  %v5671_v31 = vld [vmem:[%s5365_s28 + $0x810] sm:$0xff] }
 0x181   : > { %4442 = vlog2.f32 %v664_v55  ;;  %v741_v27 = vmul.f32 0.6931472, %v4423_v7  ;;  %v833_v39 = vmul.f32 %v733_v22, %v5379_v0  ;;  %v917_v51 = vmul.f32 1.442695, %v829_v35 }
 0x182   : > { %v4425_v11 = vpop.eup %4424  ;;  %4444 = vpow2.f32 %v1377_v4  ;;  %v1340_v17 = vmul.f32 %v5622_v21, %v1297_v8  ;;  %v1385_v18 = vmul.f32 1.442695, %v1336_v9 }
 0x183   : > { %v4427_v15 = vpop.eup %4426  ;;  %v1305_v16 = vmul.f32 0.6931472, %v4425_v11  ;;  %4446 = vlog2.f32 %v668_v56  ;;  %v837_v42 = vmul.f32 %v741_v27, %v5379_v0  ;;  %v925_v55 = vmul.f32 1.442695, %v833_v39 }
 0x184   : > { %v4429_v19 = vpop.eup %4428  ;;  %v1313_v20 = vmul.f32 0.6931472, %v4427_v15  ;;  %4448 = vlog2.f32 %v672_v1  ;;  %v1393_v26 = vmul.f32 1.442695, %v1340_v17 }
 0x185   : > { %v4431_v24 = vpop.eup %4430  ;;  %v1344_v25 = vmul.f32 %v5622_v21, %v1305_v16  ;;  %4450 = vpow2.f32 %v1385_v18  ;;  %v749_v30 = vmul.f32 0.6931472, %v4429_v19  ;;  %v933_v59 = vmul.f32 1.442695, %v837_v42  ;;  %v5689_v42 = vld [vmem:[%s5365_s28 + $0x880] sm:$0xff] }
 0x186   : > { %v4433_v28 = vpop.eup %4432  ;;  %v1348_v29 = vmul.f32 %v5622_v21, %v1313_v20  ;;  %4452 = vpow2.f32 %v869_v6  ;;  %v757_v34 = vmul.f32 0.6931472, %v4431_v24 }
 0x187   : > { %v4435_v32 = vpop.eup %4434  ;;  %4454 = vpow2.f32 %v1393_v26  ;;  %v1401_v33 = vmul.f32 1.442695, %v1344_v25  ;;  %v765_v38 = vmul.f32 0.6931472, %v4433_v28  ;;  %v841_v46 = vmul.f32 %v749_v30, %v5379_v0  ;;  %v5668_v30 = vld [vmem:[%s5365_s28 + $0x840] sm:$0xff] }
 0x188   : > { %v4437_v36 = vpop.eup %4436  ;;  %v1409_v37 = vmul.f32 1.442695, %v1348_v29  ;;  %4456 = vpow2.f32 %v877_v10  ;;  %v845_v50 = vmul.f32 %v757_v34, %v5379_v0  ;;  %v5665_v29 = vld [vmem:[%s5365_s28 + $0x800] sm:$0xff] }
 0x189   : > { %v4439_v40 = vpop.eup %4438  ;;  %4458 = vpow2.f32 %v1401_v33  ;;  %v1981_v41 = vsel %vm1967_vm0, %v4437_v36, %v4435_v32  ;;  %v849_v54 = vmul.f32 %v765_v38, %v5379_v0  ;;  %v941_v63 = vmul.f32 1.442695, %v841_v46  ;;  %v5674_v36 = vld [vmem:[%s5365_s28 + $0x850] sm:$0xff]  ;;  %v5680_v38 = vld [vmem:[%s5365_s28 + $0x8c8] sm:$0xff] }
 0x18a   : > { %v4441_v44 = vpop.eup %4440  ;;  %4460 = vpow2.f32 %v1409_v37  ;;  %v773_v45 = vmul.f32 0.6931472, %v4439_v40  ;;  %v949_v3 = vmul.f32 1.442695, %v845_v50  ;;  %v5677_v37 = vld [vmem:[%s5365_s28 + $0x888] sm:$0xff]  ;;  %v5683_v40 = vld [vmem:[%s5365_s28 + $0x898] sm:$0xff] }
 0x18b   : > { %v4443_v48 = vpop.eup %4442  ;;  %v1982_v49 = vsel %vm1969_vm1, %v4441_v44, %v1981_v41  ;;  %4462 = vpow2.f32 %v885_v14  ;;  %v957_v7 = vmul.f32 1.442695, %v849_v54  ;;  %v5686_v41 = vld [vmem:[%s5365_s28 + $0x8d8] sm:$0xff]  ;;  %v5698_v50 = vld [vmem:[%s5365_s28 + $0x8d0] sm:$0xff] }
 0x18c   : > { %v4445_v52 = vpop.eup %4444  ;;  %v781_v53 = vmul.f32 0.6931472, %v4443_v48  ;;  %4464 = vpow2.f32 %v893_v23  ;;  %v853_v58 = vmul.f32 %v773_v45, %v5379_v0  ;;  %v5692_v48 = vld [vmem:[%s5365_s28 + $0x8c0] sm:$0xff] }
 0x18d   : > { %v4447_v56 = vpop.eup %4446  ;;  %v1983_v57 = vsel %vm1971_vm2, %v4445_v52, %v1982_v49  ;;  %4466 = vpow2.f32 %v901_v43  ;;  %v5695_v49 = vld [vmem:[%s5365_s28 + $0x890] sm:$0xff] }
 0x18e   : > { %v4449_v60 = vpop.eup %4448  ;;  %v789_v61 = vmul.f32 0.6931472, %v4447_v56  ;;  %v857_v62 = vmul.f32 %v781_v53, %v5379_v0  ;;  %4468 = vpow2.f32 %v909_v47  ;;  %v965_v10 = vmul.f32 1.442695, %v853_v58 }
 0x18f   : > { %v4451_v1 = vpop.eup %4450  ;;  %v797_v2 = vmul.f32 0.6931472, %v4449_v60  ;;  %4470 = vpow2.f32 %v917_v51 }
 0x190   : > { %v4453_v4 = vpop.eup %4452  ;;  %v1984_v5 = vsel %vm1973_vm3, %v4451_v1, %v1983_v57  ;;  %v861_v6 = vmul.f32 %v789_v61, %v5379_v0  ;;  %4472 = vpow2.f32 %v925_v55  ;;  %v973_v13 = vmul.f32 1.442695, %v857_v62  ;;  %v5707_v55 = vld [vmem:[%s5365_s28 + $0x908] sm:$0xff]  ;;  %v5713_v62 = vld [vmem:[%s5365_s28 + $0x918] sm:$0xff] }
 0x191   : > { %v4455_v8 = vpop.eup %4454  ;;  %v865_v9 = vmul.f32 %v797_v2, %v5379_v0  ;;  %4474 = vpow2.f32 %v933_v59  ;;  %v5710_v61 = vld [vmem:[%s5365_s28 + $0x948] sm:$0xff] }
 0x192   : > { %v4457_v11 = vpop.eup %4456  ;;  %v1985_v12 = vsel %vm1975_vm4, %v4455_v8, %v1984_v5  ;;  %4476 = vpow2.f32 %v941_v63  ;;  %v981_v15 = vmul.f32 1.442695, %v861_v6  ;;  %v5716_v63 = vld [vmem:[%s5365_s28 + $0x958] sm:$0xff] }
 0x193   : > { %v4459_v14 = vpop.eup %4458  ;;  %4478 = vpow2.f32 %v949_v3  ;;  %v997_v16 = vadd.f32 %v4457_v11, %v4453_v4  ;;  %v989_v19 = vmul.f32 1.442695, %v865_v9  ;;  %v5725_v11 = vld [vmem:[%s5365_s28 + $0x900] sm:$0xff] }
 0x194   : > { %v4461_v17 = vpop.eup %4460  ;;  %v1986_v18 = vsel %vm1977_vm5, %v4459_v14, %v1985_v12  ;;  %4480 = vpow2.f32 %v957_v7  ;;  %v5728_v12 = vld [vmem:[%s5365_s28 + $0x940] sm:$0xff] }
 0x195   : > { %v4463_v20 = vpop.eup %4462  ;;  %v5660_v22 = vsel %vm1979_vm6, %v4461_v17, %v1986_v18  ;;  %4482 = vpow2.f32 %v965_v10  ;;  %v998_v23 = vrot.slane %v997_v16, 4 }
 0x196   : > { %7115 = vst [vmem:[#allocation19_spill] sm:$0xff] %v5660_v22  ;;  %v4465_v24 = vpop.eup %4464  ;;  %2070 = vmatprep.mubr.f32.mxu0 %v5660_v22  ;;  %2212 = vmatprep.mubr.f32.mxu1 %v5660_v22  ;;  %4484 = vpow2.f32 %v973_v13  ;;  %v5848_v22 = vld [vmem:[%s5365_s28 + $0xb18] sm:$0xff] }
 0x197   : > { %v4467_v25 = vpop.eup %4466  ;;  %4486 = vpow2.f32 %v981_v15  ;;  %v999_v26 = vadd.f32 %v998_v23, %v997_v16  ;;  %v1025_v27 = vadd.f32 %v4465_v24, %v4463_v20  ;;  %v5816_v16 = vld [vmem:[%s5365_s28 + $0xa98] sm:$0xff]  ;;  %7127 = vst [vmem:[#allocation31_spill] sm:$0xff] %v5848_v22  ;;  %v5908_v22 = vld [vmem:[%s5365_s28 + $0xbd0] sm:$0xff] }
 0x198   : > { %v4469_v28 = vpop.eup %4468  ;;  %4488 = vpow2.f32 %v989_v19  ;;  %7119 = vst [vmem:[#allocation23_spill] sm:$0xff] %v5816_v16  ;;  %7140 = vst [vmem:[#allocation44_spill] sm:$0xff] %v5908_v22  ;;  %v583_v22 = vld [vmem:[%s5363_s3 + $0x118] sm:$0xff] }
 0x199   : > { %v4471_v32 = vpop.eup %4470  ;;  %v1000_v33 = vrot.slane %v999_v26, 2  ;;  %v1026_v34 = vrot.slane %v1025_v27, 4  ;;  %v1053_v35 = vadd.f32 %v4469_v28, %v4467_v25 }
 0x19a   : > { %v4473_v39 = vpop.eup %4472 }
 0x19b   : > { %v4475_v43 = vpop.eup %4474  ;;  %v1001_v44 = vadd.f32 %v1000_v33, %v999_v26  ;;  %v1027_v45 = vadd.f32 %v1026_v34, %v1025_v27  ;;  %v1054_v46 = vrot.slane %v1053_v35, 4  ;;  %v1081_v47 = vadd.f32 %v4473_v39, %v4471_v32 }
 0x19c   : > { %v4477_v51 = vpop.eup %4476 }
 0x19d   : > { %v4479_v56 = vpop.eup %4478  ;;  %v1002_v57 = vrot.slane %v1001_v44, 1  ;;  %v1028_v58 = vrot.slane %v1027_v45, 2  ;;  %v1055_v59 = vadd.f32 %v1054_v46, %v1053_v35  ;;  %v1082_v60 = vrot.slane %v1081_v47, 4 }
 0x19e   : > { %v4481_v1 = vpop.eup %4480  ;;  %v1109_v2 = vadd.f32 %v4477_v51, %v4475_v43  ;;  %v5737_v43 = vld [vmem:[%s5365_s28 + $0x910] sm:$0xff] }
 0x19f   : > { %v4483_v6 = vpop.eup %4482  ;;  %v1003_v7 = vadd.f32 %v1002_v57, %v1001_v44  ;;  %v1029_v8 = vadd.f32 %v1028_v58, %v1027_v45  ;;  %v1056_v9 = vrot.slane %v1055_v59, 2  ;;  %v1083_v10 = vadd.f32 %v1082_v60, %v1081_v47  ;;  %v5740_v44 = vld [vmem:[%s5365_s28 + $0x950] sm:$0xff]  ;;  %v5746_v60 = vld [vmem:[%s5365_s28 + $0x9c8] sm:$0xff] }
 0x1a0   : > { %v4485_v13 = vpop.eup %4484  ;;  %v1110_v14 = vrot.slane %v1109_v2, 4  ;;  %v1137_v15 = vadd.f32 %v4481_v1, %v4479_v56 }
 0x1a1   : > { %v4487_v18 = vpop.eup %4486  ;;  %v1030_v19 = vrot.slane %v1029_v8, 1  ;;  %v1057_v20 = vadd.f32 %v1056_v9, %v1055_v59  ;;  %v1084_v23 = vrot.slane %v1083_v10, 2  ;;  %v1165_v24 = vadd.f32 %v4485_v13, %v4483_v6  ;;  %v5743_v59 = vld [vmem:[%s5365_s28 + $0x988] sm:$0xff]  ;;  %v5754_v9 = vld [vmem:[%s5365_s28 + $0x9d8] sm:$0xff] }
 0x1a2   : > { %v4489_v25 = vpop.eup %4488  ;;  %v1111_v26 = vadd.f32 %v1110_v14, %v1109_v2  ;;  %v1138_v27 = vrot.slane %v1137_v15, 4  ;;  %v1222_v28 = vmul.f32 0.0625, %v1003_v7 }
 0x1a3   : > { %v1031_v33 = vadd.f32 %v1030_v19, %v1029_v8  ;;  %v1058_v34 = vrot.slane %v1057_v20, 1  ;;  %v1085_v35 = vadd.f32 %v1084_v23, %v1083_v10  ;;  %v1166_v39 = vrot.slane %v1165_v24, 4  ;;  %v5751_v8 = vld [vmem:[%s5365_s28 + $0x998] sm:$0xff]  ;;  %v5763_v19 = vld [vmem:[%s5365_s28 + $0x990] sm:$0xff] }
 0x1a4   : > { %v1112_v45 = vrot.slane %v1111_v26, 2  ;;  %v1139_v46 = vadd.f32 %v1138_v27, %v1137_v15  ;;  %v1193_v47 = vadd.f32 %v4489_v25, %v4487_v18  ;;  %4490 = vlog2.f32 %v1222_v28  ;;  %v5757_v15 = vld [vmem:[%s5365_s28 + $0x980] sm:$0xff]  ;;  %v5771_v27 = vld [vmem:[%s5365_s28 + $0xa08] sm:$0xff]  ;;  %v559_v25 = vld [vmem:[%s5363_s3 + $0x58] sm:$0xff] }
 0x1a5   : > { %v1059_v51 = vadd.f32 %v1058_v34, %v1057_v20  ;;  %v1086_v56 = vrot.slane %v1085_v35, 1  ;;  %v1167_v57 = vadd.f32 %v1166_v39, %v1165_v24  ;;  %v1226_v58 = vmul.f32 0.0625, %v1031_v33  ;;  %v5760_v18 = vld [vmem:[%s5365_s28 + $0x9c0] sm:$0xff]  ;;  %v5774_v28 = vld [vmem:[%s5365_s28 + $0xa48] sm:$0xff]  ;;  %v551_v33 = vld [vmem:[%s5363_s3 + $0x18] sm:$0xff] }
 0x1a6   : > { %v1113_v1 = vadd.f32 %v1112_v45, %v1111_v26  ;;  %v1140_v2 = vrot.slane %v1139_v46, 2  ;;  %v1194_v6 = vrot.slane %v1193_v47, 4  ;;  %v5768_v26 = vld [vmem:[%s5365_s28 + $0x9d0] sm:$0xff]  ;;  %v5780_v45 = vld [vmem:[%s5365_s28 + $0xa18] sm:$0xff]  ;;  %v5810_v39 = vld [vmem:[%s5365_s28 + $0xac8] sm:$0xff] }
 0x1a7   : > { %v1087_v10 = vadd.f32 %v1086_v56, %v1085_v35  ;;  %v1168_v13 = vrot.slane %v1167_v57, 2  ;;  %v1230_v14 = vmul.f32 0.0625, %v1059_v51  ;;  %4492 = vlog2.f32 %v1226_v58  ;;  %v5789_v51 = vld [vmem:[%s5363_s3 + $0x38] sm:$0xff] }
 0x1a8   : > { %v1114_v20 = vrot.slane %v1113_v1, 1  ;;  %v1141_v23 = vadd.f32 %v1140_v2, %v1139_v46  ;;  %v1195_v24 = vadd.f32 %v1194_v6, %v1193_v47  ;;  %v5783_v46 = vld [vmem:[%s5365_s28 + $0xa58] sm:$0xff]  ;;  %v5786_v47 = vld [vmem:[%s5365_s28 + $0xa00] sm:$0xff]  ;;  %v619_v4 = vmax.f32 %v5789_v51, 1e-06 }
 0x1a9   : > { %v1169_v34 = vadd.f32 %v1168_v13, %v1167_v57  ;;  %v1234_v35 = vmul.f32 0.0625, %v1087_v10  ;;  %4494 = vlog2.f32 %v1230_v14  ;;  %v5794_v6 = vld [vmem:[%s5365_s28 + $0xa40] sm:$0xff]  ;;  %v5797_v10 = vld [vmem:[%s5365_s28 + $0xa10] sm:$0xff]  ;;  %v5807_v57 = vld [vmem:[%s5365_s28 + $0xa88] sm:$0xff] }
 0x1aa   : > { %v1115_v56 = vadd.f32 %v1114_v20, %v1113_v1  ;;  %v1142_v58 = vrot.slane %v1141_v23, 1  ;;  %v1196_v2 = vrot.slane %v1195_v24, 2  ;;  %7116 = vst [vmem:[#allocation20_spill] sm:$0xff] %v5797_v10  ;;  %v5800_v13 = vld [vmem:[%s5365_s28 + $0xa50] sm:$0xff]  ;;  %7118 = vst [vmem:[#allocation22_spill] sm:$0xff] %v5807_v57  ;;  %v5819_v1 = vld [vmem:[%s5365_s28 + $0xad8] sm:$0xff] }
 0x1ab   : > { %7117 = vst [vmem:[#allocation21_spill] sm:$0xff] %v5800_v13  ;;  %v1170_v14 = vrot.slane %v1169_v34, 1  ;;  %4496 = vlog2.f32 %v1234_v35  ;;  %7120 = vst [vmem:[#allocation24_spill] sm:$0xff] %v5819_v1  ;;  %v5822_v20 = vld [vmem:[%s5365_s28 + $0xa80] sm:$0xff]  ;;  %v5855_v13 = vld [vmem:[%s5365_s28 + $0xb58] sm:$0xff] }
 0x1ac   : > { %v1143_v7 = vadd.f32 %v1142_v58, %v1141_v23  ;;  %v1197_v32 = vadd.f32 %v1196_v2, %v1195_v24  ;;  %v1238_v17 = vmul.f32 0.0625, %v1115_v56  ;;  %7121 = vst [vmem:[#allocation25_spill] sm:$0xff] %v5822_v20  ;;  %v5829_v24 = vld [vmem:[%s5365_s28 + $0xac0] sm:$0xff]  ;;  %v5832_v56 = vld [vmem:[%s5365_s28 + $0xa90] sm:$0xff]  ;;  %v615_v2 = vmax.f32 %v551_v33, 1e-06 }
 0x1ad   : > { %v1171_v5 = vadd.f32 %v1170_v14, %v1169_v34  ;;  %7122 = vst [vmem:[#allocation26_spill] sm:$0xff] %v5829_v24  ;;  %7123 = vst [vmem:[#allocation27_spill] sm:$0xff] %v5832_v56  ;;  %v5835_v58 = vld [vmem:[%s5365_s28 + $0xad0] sm:$0xff]  ;;  %v5838_v34 = vld [vmem:[%s5365_s28 + $0xb08] sm:$0xff]  ;;  %v623_v33 = vmax.f32 %v559_v25, 1e-06 }
 0x1ae   : > { %7124 = vst [vmem:[#allocation28_spill] sm:$0xff] %v5835_v58  ;;  %v4491_v35 = vpop.eup %4490  ;;  %v1198_v3 = vrot.slane %v1197_v32, 1  ;;  %v1242_v54 = vmul.f32 0.0625, %v1143_v7  ;;  %4498 = vlog2.f32 %v1238_v17  ;;  %7125 = vst [vmem:[#allocation29_spill] sm:$0xff] %v5838_v34  ;;  %v5841_v14 = vld [vmem:[%s5365_s28 + $0xb48] sm:$0xff]  ;;  %v5844_v23 = vld [vmem:[%s5363_s3 + $0x78] sm:$0xff] }
 0x1af   : > { %7126 = vst [vmem:[#allocation30_spill] sm:$0xff] %v5841_v14  ;;  %v1246_v53 = vmul.f32 0.0625, %v1171_v5  ;;  %v1255_v52 = vmul.f32 0.6931472, %v4491_v35  ;;  %4500 = vlog2.f32 %v615_v2  ;;  %7128 = vst [vmem:[#allocation32_spill] sm:$0xff] %v5855_v13  ;;  %v5858_v5 = vld [vmem:[%s5365_s28 + $0xb00] sm:$0xff] }
 0x1b0   : > { %v1199_v17 = vadd.f32 %v1198_v3, %v1197_v32  ;;  %4502 = vlog2.f32 %v1242_v54  ;;  %7129 = vst [vmem:[#allocation33_spill] sm:$0xff] %v5858_v5  ;;  %v5861_v51 = vld [vmem:[%s5365_s28 + $0xb40] sm:$0xff]  ;;  %v5864_v25 = vld [vmem:[%s5363_s3 + $0x98] sm:$0xff]  ;;  %v5872_v2 = vld [vmem:[%s5365_s28 + $0xb10] sm:$0xff] }
 0x1b1   : > { %7130 = vst [vmem:[#allocation34_spill] sm:$0xff] %v5861_v51  ;;  %v4493_v35 = vpop.eup %4492  ;;  %4504 = vlog2.f32 %v1246_v53  ;;  %v1319_v54 = vmul.f32 %v5622_v21, %v1255_v52  ;;  %7131 = vst [vmem:[#allocation35_spill] sm:$0xff] %v5872_v2  ;;  %v5875_v10 = vld [vmem:[%s5365_s28 + $0xb50] sm:$0xff]  ;;  %v5878_v7 = vld [vmem:[%s5365_s28 + $0xb88] sm:$0xff]  ;;  %v627_v53 = vmax.f32 %v5844_v23, 1e-06 }
 0x1b2   : > { %7132 = vst [vmem:[#allocation36_spill] sm:$0xff] %v5875_v10  ;;  %7133 = vst [vmem:[#allocation37_spill] sm:$0xff] %v5878_v7  ;;  %v1250_v16 = vmul.f32 0.0625, %v1199_v17  ;;  %v1263_v1 = vmul.f32 0.6931472, %v4493_v35  ;;  %v5883_v52 = vld [vmem:[%s5365_s28 + $0xbc8] sm:$0xff]  ;;  %4506 = vlog2.f32 %v619_v4 }
 0x1b3   : > { %7134 = vst [vmem:[#allocation38_spill] sm:$0xff] %v5883_v52  ;;  %v5886_v3 = vld [vmem:[%s5365_s28 + $0xb98] sm:$0xff]  ;;  %v4495_v32 = vpop.eup %4494  ;;  %v1351_v56 = vmul.f32 1.442695, %v1319_v54  ;;  %v5894_v17 = vld [vmem:[%s5365_s28 + $0xb80] sm:$0xff]  ;;  %4508 = vlog2.f32 %v623_v33  ;;  %v5905_v58 = vld [vmem:[%s5365_s28 + $0xb90] sm:$0xff] }
 0x1b4   : > { %7135 = vst [vmem:[#allocation39_spill] sm:$0xff] %v5886_v3  ;;  %v5889_v20 = vld [vmem:[%s5365_s28 + $0xbd8] sm:$0xff]  ;;  %7137 = vst [vmem:[#allocation41_spill] sm:$0xff] %v5894_v17  ;;  %v1271_v34 = vmul.f32 0.6931472, %v4495_v32  ;;  %4510 = vlog2.f32 %v1250_v16  ;;  %v1323_v14 = vmul.f32 %v5622_v21, %v1263_v1  ;;  %v5902_v54 = vld [vmem:[%s5365_s28 + $0xbc0] sm:$0xff] }
 0x1b5   : > { %7136 = vst [vmem:[#allocation40_spill] sm:$0xff] %v5889_v20  ;;  %v571_v35 = vld [vmem:[%s5363_s3 + $0xb8] sm:$0xff]  ;;  %7138 = vst [vmem:[#allocation42_spill] sm:$0xff] %v5902_v54  ;;  %v4497_v13 = vpop.eup %4496  ;;  %v5917_v33 = vld [vmem:[%s5365_s28 + $0xc08] sm:$0xff]  ;;  %v631_v5 = vmax.f32 %v5864_v25, 1e-06  ;;  %4512 = vpow2.f32 %v1351_v56 }
 0x1b6   : > { %7139 = vst [vmem:[#allocation43_spill] sm:$0xff] %v5905_v58  ;;  %7141 = vst [vmem:[#allocation45_spill] sm:$0xff] %v5917_v33  ;;  %v5920_v32 = vld [vmem:[%s5365_s28 + $0xc48] sm:$0xff]  ;;  %v575_v4 = vld [vmem:[%s5363_s3 + $0xd8] sm:$0xff]  ;;  %v1279_v51 = vmul.f32 0.6931472, %v4497_v13  ;;  %v1327_v24 = vmul.f32 %v5622_v21, %v1271_v34  ;;  %4514 = vlog2.f32 %v627_v53 }
 0x1b7   : > { %7142 = vst [vmem:[#allocation46_spill] sm:$0xff] %v5920_v32  ;;  %v1359_v23 = vmul.f32 1.442695, %v1323_v14  ;;  %v5926_v2 = vld [vmem:[%s5365_s28 + $0xc18] sm:$0xff]  ;;  %v5936_v20 = vld [vmem:[%s5365_s28 + $0xc00] sm:$0xff]  ;;  %v5946_v3 = vld [vmem:[%s5365_s28 + $0xc10] sm:$0xff] }
 0x1b8   : > { %7143 = vst [vmem:[#allocation47_spill] sm:$0xff] %v5926_v2  ;;  %v5929_v16 = vld [vmem:[%s5365_s28 + $0xc58] sm:$0xff]  ;;  %7145 = vst [vmem:[#allocation49_spill] sm:$0xff] %v5936_v20  ;;  %v5939_v13 = vld [vmem:[%s5365_s28 + $0xc40] sm:$0xff]  ;;  %v635_v34 = vmax.f32 %v571_v35, 1e-06  ;;  %v4499_v14 = vpop.eup %4498  ;;  %v1331_v25 = vmul.f32 %v5622_v21, %v1279_v51 }
 0x1b9   : > { %7144 = vst [vmem:[#allocation48_spill] sm:$0xff] %v5929_v16  ;;  %7146 = vst [vmem:[#allocation50_spill] sm:$0xff] %v5939_v13  ;;  %v579_v56 = vld [vmem:[%s5363_s3 + $0xf8] sm:$0xff]  ;;  %4516 = vpow2.f32 %v1359_v23  ;;  %v1367_v7 = vmul.f32 1.442695, %v1327_v24  ;;  %v5949_v58 = vld [vmem:[%s5365_s28 + $0xc50] sm:$0xff]  ;;  %v4501_v17 = vpop.eup %4500 }
 0x1ba   : > { %7147 = vst [vmem:[#allocation51_spill] sm:$0xff] %v5946_v3  ;;  %7148 = vst [vmem:[#allocation52_spill] sm:$0xff] %v5949_v58  ;;  %v1287_v54 = vmul.f32 0.6931472, %v4499_v14  ;;  %v5955_v35 = vld [vmem:[%s5365_s28 + $0xc88] sm:$0xff]  ;;  %4518 = vlog2.f32 %v631_v5  ;;  %v4503_v23 = vpop.eup %4502  ;;  %v5963_v32 = vld [vmem:[%s5365_s28 + $0xc98] sm:$0xff] }
 0x1bb   : > { %7149 = vst [vmem:[#allocation53_spill] sm:$0xff] %v5955_v35  ;;  %v5958_v24 = vld [vmem:[%s5365_s28 + $0xcc8] sm:$0xff]  ;;  %v639_v51 = vmax.f32 %v575_v4, 1e-06  ;;  %4520 = vpow2.f32 %v1367_v7  ;;  %v1375_v1 = vmul.f32 1.442695, %v1331_v25  ;;  %v4505_v2 = vpop.eup %4504 }
 0x1bc   : > { %7150 = vst [vmem:[#allocation54_spill] sm:$0xff] %v5958_v24  ;;  %7151 = vst [vmem:[#allocation55_spill] sm:$0xff] %v5963_v32  ;;  %v5966_v14 = vld [vmem:[%s5365_s28 + $0xcd8] sm:$0xff]  ;;  %v643_v53 = vmax.f32 %v579_v56, 1e-06  ;;  %v1335_v52 = vmul.f32 %v5622_v21, %v1287_v54  ;;  %v5972_v4 = vld [vmem:[%s5365_s28 + $0xc80] sm:$0xff]  ;;  %4522 = vlog2.f32 %v635_v34  ;;  %v4507_v33 = vpop.eup %4506 }
 0x1bd   : > { %7152 = vst [vmem:[#allocation56_spill] sm:$0xff] %v5966_v14  ;;  %v1295_v16 = vmul.f32 0.6931472, %v4503_v23  ;;  %7153 = vst [vmem:[#allocation57_spill] sm:$0xff] %v5972_v4  ;;  %v5975_v7 = vld [vmem:[%s5365_s28 + $0xcc0] sm:$0xff]  ;;  %v587_v25 = vld [vmem:[%s5363_s3 + $0x138] sm:$0xff]  ;;  %4524 = vpow2.f32 %v1375_v1  ;;  %v4509_v23 = vpop.eup %4508 }
 0x1be   : > { %7154 = vst [vmem:[#allocation58_spill] sm:$0xff] %v5975_v7  ;;  %v1303_v20 = vmul.f32 0.6931472, %v4505_v2  ;;  %v647_v54 = vmax.f32 %v583_v22, 1e-06  ;;  %v591_v58 = vld [vmem:[%s5363_s3 + $0x158] sm:$0xff]  ;;  %4526 = vlog2.f32 %v639_v51  ;;  %v4511_v34 = vpop.eup %4510 }
 0x1bf   : > { %v1339_v13 = vmul.f32 %v5622_v21, %v1295_v16  ;;  %v1383_v5 = vmul.f32 1.442695, %v1335_v52  ;;  %v595_v10 = vld [vmem:[%s5363_s3 + $0x178] sm:$0xff]  ;;  %v5989_v1 = vld [vmem:[%s5365_s28 + $0xc90] sm:$0xff]  ;;  %v651_v16 = vmax.f32 %v587_v25, 1e-06  ;;  %4528 = vlog2.f32 %v643_v53  ;;  %v4513_v51 = vpop.eup %4512 }
 0x1c0   : > { %v1343_v57 = vmul.f32 %v5622_v21, %v1303_v20  ;;  %7155 = vst [vmem:[#allocation59_spill] sm:$0xff] %v5989_v1  ;;  %v5992_v56 = vld [vmem:[%s5365_s28 + $0xcd0] sm:$0xff]  ;;  %v599_v22 = vld [vmem:[%s5363_s3 + $0x198] sm:$0xff]  ;;  %v1311_v52 = vmul.f32 0.6931472, %v4511_v34  ;;  %v4515_v2 = vpop.eup %4514 }
 0x1c1   : > { %4530 = vpow2.f32 %v1383_v5  ;;  %v1391_v3 = vmul.f32 1.442695, %v1339_v13  ;;  %v683_v32 = vmul.f32 0.6931472, %v4501_v17  ;;  %v655_v35 = vmax.f32 %v591_v58, 1e-06 }
 0x1c2   : > { %v1399_v14 = vmul.f32 1.442695, %v1343_v57  ;;  %v691_v20 = vmul.f32 0.6931472, %v4507_v33  ;;  %4532 = vlog2.f32 %v647_v54  ;;  %v1347_v4 = vmul.f32 %v5622_v21, %v1311_v52  ;;  %v603_v25 = vld [vmem:[%s5363_s3 + $0x1b8] sm:$0xff] }
 0x1c3   : > { %4534 = vpow2.f32 %v1391_v3  ;;  %v607_v24 = vld [vmem:[%s5363_s3 + $0x1d8] sm:$0xff]  ;;  %v699_v53 = vmul.f32 0.6931472, %v4509_v23  ;;  %v4517_v34 = vpop.eup %4516  ;;  %v659_v13 = vmax.f32 %v595_v10, 1e-06  ;;  %v808_v3 = vmul.f32 %v683_v32, %v5379_v0 }
 0x1c4   : > { %4536 = vpow2.f32 %v1399_v14  ;;  %v663_v17 = vmax.f32 %v599_v22, 1e-06  ;;  %v707_v5 = vmul.f32 0.6931472, %v4515_v2  ;;  %v4519_v57 = vpop.eup %4518  ;;  %v1407_v58 = vmul.f32 1.442695, %v1347_v4 }
 0x1c5   : > { %v1968_v33 = vsel %vm1967_vm0, %v4517_v34, %v4513_v51  ;;  %v611_v54 = vld [vmem:[%s5363_s3 + $0x1f8] sm:$0xff]  ;;  %4538 = vlog2.f32 %v651_v16  ;;  %v4521_v52 = vpop.eup %4520  ;;  %v667_v7 = vmax.f32 %v603_v25, 1e-06  ;;  %v715_v1 = vmul.f32 0.6931472, %v4519_v57  ;;  %v6007_v51 = vld [vmem:[%s5365_s28 + $0xd08] sm:$0xff] }
 0x1c6   : > { %4540 = vlog2.f32 %v655_v35  ;;  %v812_v23 = vmul.f32 %v691_v20, %v5379_v0  ;;  %v4523_v14 = vpop.eup %4522  ;;  %v1970_v10 = vsel %vm1969_vm1, %v4521_v52, %v1968_v33  ;;  %v671_v2 = vmax.f32 %v607_v24, 1e-06  ;;  %7156 = vst [vmem:[#allocation60_spill] sm:$0xff] %v6007_v51  ;;  %v6010_v34 = vld [vmem:[%s5365_s28 + $0xd48] sm:$0xff] }
 0x1c7   : > { %4542 = vpow2.f32 %v1407_v58  ;;  %v816_v4 = vmul.f32 %v699_v53, %v5379_v0  ;;  %v4525_v22 = vpop.eup %4524  ;;  %7157 = vst [vmem:[#allocation61_spill] sm:$0xff] %v6010_v34  ;;  %v675_v16 = vmax.f32 %v611_v54, 1e-06  ;;  %v723_v32 = vmul.f32 0.6931472, %v4523_v14  ;;  %v6022_v14 = vld [vmem:[%s5365_s28 + $0xd58] sm:$0xff] }
 0x1c8   : > { %4544 = vlog2.f32 %v659_v13  ;;  %v820_v35 = vmul.f32 %v707_v5, %v5379_v0  ;;  %v4527_v20 = vpop.eup %4526  ;;  %v1972_v25 = vsel %vm1971_vm2, %v4525_v22, %v1970_v10  ;;  %v824_v24 = vmul.f32 %v715_v1, %v5379_v0  ;;  %v6019_v5 = vld [vmem:[%s5365_s28 + $0xd18] sm:$0xff]  ;;  %7159 = vst [vmem:[#allocation63_spill] sm:$0xff] %v6022_v14 }
 0x1c9   : > { %4546 = vlog2.f32 %v663_v17  ;;  %v875_v57 = vmul.f32 1.442695, %v808_v3  ;;  %v4529_v53 = vpop.eup %4528  ;;  %v731_v58 = vmul.f32 0.6931472, %v4527_v20  ;;  %v828_v33 = vmul.f32 %v723_v32, %v5379_v0  ;;  %7158 = vst [vmem:[#allocation62_spill] sm:$0xff] %v6019_v5  ;;  %v6027_v32 = vld [vmem:[%s5365_s28 + $0xd00] sm:$0xff] }
 0x1ca   : > { %4548 = vlog2.f32 %v667_v7  ;;  %v883_v54 = vmul.f32 1.442695, %v812_v23  ;;  %v739_v17 = vmul.f32 0.6931472, %v4529_v53  ;;  %v891_v1 = vmul.f32 1.442695, %v816_v4 }
 0x1cb   : > { %v4531_v52 = vpop.eup %4530  ;;  %4550 = vlog2.f32 %v671_v2  ;;  %v832_v10 = vmul.f32 %v731_v58, %v5379_v0  ;;  %v899_v23 = vmul.f32 1.442695, %v820_v35  ;;  %7160 = vst [vmem:[#allocation64_spill] sm:$0xff] %v6027_v32  ;;  %v6030_v20 = vld [vmem:[%s5365_s28 + $0xd40] sm:$0xff]  ;;  %v907_v4 = vmul.f32 1.442695, %v824_v24 }
 0x1cc   : > { %v4533_v3 = vpop.eup %4532  ;;  %v1974_v7 = vsel %vm1973_vm3, %v4531_v52, %v1972_v25  ;;  %4552 = vlog2.f32 %v675_v16  ;;  %v836_v2 = vmul.f32 %v739_v17, %v5379_v0  ;;  %v6037_v35 = vld [vmem:[%s5365_s28 + $0xd10] sm:$0xff]  ;;  %v915_v52 = vmul.f32 1.442695, %v828_v33  ;;  %v6044_v17 = vld [vmem:[%s5365_s28 + $0xd88] sm:$0xff]  ;;  %v6053_v5 = vld [vmem:[%s5365_s28 + $0xd98] sm:$0xff] }
 0x1cd   : > { %v4535_v22 = vpop.eup %4534  ;;  %v747_v13 = vmul.f32 0.6931472, %v4533_v3  ;;  %4554 = vpow2.f32 %v875_v57  ;;  %v6040_v58 = vld [vmem:[%s5365_s28 + $0xd50] sm:$0xff]  ;;  %v6047_v24 = vld [vmem:[%s5365_s28 + $0xdc8] sm:$0xff] }
 0x1ce   : > { %v4537_v53 = vpop.eup %4536  ;;  %v1976_v25 = vsel %vm1975_vm4, %v4535_v22, %v1974_v7  ;;  %4556 = vpow2.f32 %v883_v54  ;;  %v923_v7 = vmul.f32 1.442695, %v832_v10  ;;  %v6056_v54 = vld [vmem:[%s5365_s28 + $0xdd8] sm:$0xff]  ;;  %v550_v10 = vld [vmem:[%s5363_s3 + $0x10] sm:$0xff] }
 0x1cf   : > { %v4539_v51 = vpop.eup %4538  ;;  %v1978_v3 = vsel %vm1977_vm5, %v4537_v53, %v1976_v25  ;;  %v840_v57 = vmul.f32 %v747_v13, %v5379_v0  ;;  %4558 = vpow2.f32 %v891_v1  ;;  %v931_v53 = vmul.f32 1.442695, %v836_v2 }
 0x1d0   : > { %v4541_v22 = vpop.eup %4540  ;;  %v755_v33 = vmul.f32 0.6931472, %v4539_v51  ;;  %4560 = vpow2.f32 %v899_v23  ;;  %v614_v14 = vmax.f32 %v550_v10, 1e-06 }
 0x1d1   : > { %v4543_v25 = vpop.eup %4542  ;;  %v763_v13 = vmul.f32 0.6931472, %v4541_v22  ;;  %4562 = vpow2.f32 %v907_v4  ;;  %v939_v1 = vmul.f32 1.442695, %v840_v57  ;;  %v6072_v4 = vld [vmem:[%s5365_s28 + $0xd80] sm:$0xff] }
 0x1d2   : > { %v4545_v34 = vpop.eup %4544  ;;  %v6062_v16 = vsel %vm1979_vm6, %v4543_v25, %v1978_v3  ;;  %v844_v51 = vmul.f32 %v755_v33, %v5379_v0  ;;  %4564 = vpow2.f32 %v915_v52  ;;  %v6075_v3 = vld [vmem:[%s5365_s28 + $0xdc0] sm:$0xff]  ;;  %v7162_v52 = vpack.c.bf16 %v5668_v30, %v5665_v29  ;;  %v6091_v29 = vld [vmem:[%s5365_s28 + $0xd90] sm:$0xff] }
 0x1d3   : > { %7161 = vst [vmem:[#allocation65_spill] sm:$0xff] %v6062_v16  ;;  %v4547_v23 = vpop.eup %4546  ;;  %2071 = vmatmul.mubr.f32.vlgmr.msra.gmra.mrb[0].mxu0 %v6062_v16  ;;  %2213 = vmatmul.mubr.f32.vlgmr.msra.gmra.mrb[0].mxu1 %v6062_v16  ;;  %v771_v57 = vmul.f32 0.6931472, %v4545_v34  ;;  %v848_v22 = vmul.f32 %v763_v13, %v5379_v0  ;;  %4566 = vpow2.f32 %v923_v7  ;;  %v7163_v25 = vpack.c.bf16 %v5674_v36, %v5671_v31  ;;  %v6094_v30 = vld [vmem:[%s5365_s28 + $0xdd0] sm:$0xff] }
 0x1d4   : > { %v4549_v33 = vpop.eup %4548  ;;  %3588 = vmatpush1.bf16.msra.mxu0 %v7162_v52  ;;  %v779_v2 = vmul.f32 0.6931472, %v4547_v23  ;;  %4568 = vpow2.f32 %v931_v53  ;;  %v947_v32 = vmul.f32 1.442695, %v844_v51  ;;  %v7164_v34 = vpack.c.bf16 %v5680_v38, %v5677_v37  ;;  %v6104_v51 = vld [vmem:[%s5365_s28 + $0xe08] sm:$0xff]  ;;  %v6119_v52 = vld [vmem:[%s5365_s28 + $0xe18] sm:$0xff] }
 0x1d5   : > { %3716 = vmatpush1.bf16.msra.mxu1 %v7163_v25  ;;  %v4551_v16 = vpop.eup %4550  ;;  %v7165_v7 = vpack.c.bf16 %v5686_v41, %v5683_v40  ;;  %v787_v31 = vmul.f32 0.6931472, %v4549_v33  ;;  %v852_v36 = vmul.f32 %v771_v57, %v5379_v0  ;;  %4570 = vpow2.f32 %v939_v1  ;;  %v6101_v40 = vld [vmem:[%s5363_s3 + $0x30] sm:$0xff]  ;;  %v6107_v23 = vld [vmem:[%s5365_s28 + $0xe48] sm:$0xff] }
 0x1d6   : > { %3590 = vmatprep.subr.bf16.mxu0 %v7164_v34  ;;  %v955_v53 = vmul.f32 1.442695, %v848_v22  ;;  %v4553_v13 = vpop.eup %4552  ;;  %v795_v38 = vmul.f32 0.6931472, %v4551_v16  ;;  %v856_v10 = vmul.f32 %v779_v2, %v5379_v0  ;;  %4572 = vpow2.f32 %v947_v32  ;;  %v6282_v33 = vld [vmem:[%s5365_s28 + $0xf50] sm:$0xff] }
 0x1d7   : > { %3718 = vmatprep.subr.bf16.mxu1 %v7165_v7  ;;  %v4555_v41 = vpop.eup %4554  ;;  %v803_v57 = vmul.f32 0.6931472, %v4553_v13  ;;  %v860_v1 = vmul.f32 %v787_v31, %v5379_v0  ;;  %v963_v22 = vmul.f32 1.442695, %v852_v36  ;;  %v7166_v32 = vpack.c.bf16 %v5692_v48, %v5689_v42  ;;  %v6123_v7 = vld [vmem:[%s5363_s3 + $0x50] sm:$0xff]  ;;  %v6138_v36 = vld [vmem:[%s5365_s28 + $0xe40] sm:$0xff] }
 0x1d8   : > { %4574 = vpow2.f32 %v955_v53  ;;  %v4557_v16 = vpop.eup %4556  ;;  %v7167_v2 = vpack.c.bf16 %v5698_v50, %v5695_v49  ;;  %v864_v25 = vmul.f32 %v795_v38, %v5379_v0  ;;  %v971_v34 = vmul.f32 1.442695, %v856_v10  ;;  %v6132_v49 = vld [vmem:[%s5365_s28 + $0xe58] sm:$0xff]  ;;  %v6135_v50 = vld [vmem:[%s5365_s28 + $0xe00] sm:$0xff]  ;;  %v562_v38 = vld [vmem:[%s5363_s3 + $0x70] sm:$0xff] }
 0x1d9   : > { %3592 = vmatpush1.bf16.msra.mxu0 %v7166_v32  ;;  %4576 = vlog2.f32 %v614_v14  ;;  %v4559_v31 = vpop.eup %4558  ;;  %v7168_v42 = vpack.c.bf16 %v5710_v61, %v5707_v55  ;;  %v7169_v48 = vpack.c.bf16 %v5716_v63, %v5713_v62  ;;  %v868_v14 = vmul.f32 %v803_v57, %v5379_v0  ;;  %v6144_v62 = vld [vmem:[%s5365_s28 + $0xe10] sm:$0xff]  ;;  %v6152_v57 = vld [vmem:[%s5365_s28 + $0xe88] sm:$0xff] }
 0x1da   : > { %3720 = vmatpush1.bf16.msra.mxu1 %v7167_v2  ;;  %4578 = vpow2.f32 %v963_v22  ;;  %v979_v53 = vmul.f32 1.442695, %v860_v1  ;;  %v1018_v13 = vadd.f32 %v4557_v16, %v4555_v41  ;;  %v4561_v55 = vpop.eup %4560  ;;  %v987_v63 = vmul.f32 1.442695, %v864_v25  ;;  %v6149_v2 = vld [vmem:[%s5365_s28 + $0xe50] sm:$0xff]  ;;  %v6155_v1 = vld [vmem:[%s5365_s28 + $0xec8] sm:$0xff] }
 0x1db   : > { %3594 = vmatprep.subr.bf16.mxu0 %v7168_v42  ;;  %3722 = vmatprep.subr.bf16.mxu1 %v7169_v48  ;;  %4580 = vpow2.f32 %v971_v34  ;;  %v618_v10 = vmax.f32 %v6101_v40, 1e-06  ;;  %v4563_v32 = vpop.eup %4562  ;;  %v995_v41 = vmul.f32 1.442695, %v868_v14  ;;  %v1046_v16 = vadd.f32 %v4561_v55, %v4559_v31  ;;  %v6168_v14 = vld [vmem:[%s5365_s28 + $0xe98] sm:$0xff] }
 0x1dc   : > { %4582 = vpow2.f32 %v979_v53  ;;  %v1019_v22 = vrot.slane %v1018_v13, 4  ;;  %v4565_v25 = vpop.eup %4564  ;;  %v7170_v34 = vpack.c.bf16 %v5728_v12, %v5725_v11  ;;  %v7171_v40 = vpack.c.bf16 %v5740_v44, %v5737_v43  ;;  %v566_v53 = vld [vmem:[%s5363_s3 + $0x90] sm:$0xff]  ;;  %v6179_v43 = vld [vmem:[%s5365_s28 + $0xed8] sm:$0xff]  ;;  %v6182_v44 = vld [vmem:[%s5365_s28 + $0xe80] sm:$0xff] }
 0x1dd   : > { %4584 = vpow2.f32 %v987_v63  ;;  %v622_v31 = vmax.f32 %v6123_v7, 1e-06  ;;  %v4567_v55 = vpop.eup %4566  ;;  %v7172_v11 = vpack.c.bf16 %v5746_v60, %v5743_v59  ;;  %v7173_v12 = vpack.c.bf16 %v5754_v9, %v5751_v8 }
 0x1de   : > { %3596 = vmatpush1.bf16.msra.mxu0 %v7170_v34  ;;  %3724 = vmatpush1.bf16.msra.mxu1 %v7171_v40  ;;  %v6185_v34 = vld [vmem:[%s5365_s28 + $0xec0] sm:$0xff]  ;;  %4586 = vpow2.f32 %v995_v41  ;;  %v1020_v7 = vadd.f32 %v1019_v22, %v1018_v13  ;;  %v1047_v63 = vrot.slane %v1046_v16, 4  ;;  %v1074_v40 = vadd.f32 %v4565_v25, %v4563_v32  ;;  %v4569_v48 = vpop.eup %4568  ;;  %v570_v25 = vld [vmem:[%s5363_s3 + $0xb0] sm:$0xff] }
 0x1df   : > { %3598 = vmatprep.subr.bf16.mxu0 %v7172_v11  ;;  %3726 = vmatprep.subr.bf16.mxu1 %v7173_v12  ;;  %v626_v8 = vmax.f32 %v562_v38, 1e-06  ;;  %4588 = vlog2.f32 %v618_v10  ;;  %v4571_v9 = vpop.eup %4570  ;;  %v6192_v11 = vld [vmem:[%s5365_s28 + $0xe90] sm:$0xff]  ;;  %v1102_v32 = vadd.f32 %v4569_v48, %v4567_v55  ;;  %v7176_v59 = vpack.c.bf16 %v5760_v18, %v5757_v15  ;;  %v6215_v18 = vld [vmem:[%s5365_s28 + $0xf08] sm:$0xff] }
 0x1e0   : > { %7174 = vst [vmem:[#allocation66_spill] sm:$0xff] %v6192_v11  ;;  %v6195_v12 = vld [vmem:[%s5365_s28 + $0xed0] sm:$0xff]  ;;  %v1021_v41 = vrot.slane %v1020_v7, 2  ;;  %v1048_v13 = vadd.f32 %v1047_v63, %v1046_v16  ;;  %v1075_v22 = vrot.slane %v1074_v40, 4  ;;  %v4573_v42 = vpop.eup %4572  ;;  %v7177_v38 = vpack.c.bf16 %v5768_v26, %v5763_v19  ;;  %7180 = vst [vmem:[#allocation68_spill] sm:$0xff] %v6215_v18  ;;  %v6218_v19 = vld [vmem:[%s5365_s28 + $0xf48] sm:$0xff] }
 0x1e1   : > { %7175 = vst [vmem:[#allocation67_spill] sm:$0xff] %v6195_v12  ;;  %v630_v61 = vmax.f32 %v566_v53, 1e-06  ;;  %4590 = vlog2.f32 %v622_v31  ;;  %v7178_v48 = vpack.c.bf16 %v5774_v28, %v5771_v27  ;;  %v7179_v15 = vpack.c.bf16 %v5783_v46, %v5780_v45  ;;  %7181 = vst [vmem:[#allocation69_spill] sm:$0xff] %v6218_v19  ;;  %v582_v19 = vld [vmem:[%s5363_s3 + $0x110] sm:$0xff] }
 0x1e2   : > { %3600 = vmatpush1.bf16.msra.mxu0 %v7176_v59  ;;  %3728 = vmatpush1.bf16.msra.mxu1 %v7177_v38  ;;  %v4575_v16 = vpop.eup %4574  ;;  %v1022_v26 = vadd.f32 %v1021_v41, %v1020_v7  ;;  %v1049_v55 = vrot.slane %v1048_v13, 2  ;;  %v1076_v63 = vadd.f32 %v1075_v22, %v1074_v40  ;;  %v1103_v59 = vrot.slane %v1102_v32, 4  ;;  %v7183_v40 = vld [vmem:[#allocation21_spill] sm:$0xff]  ;;  %v7184_v41 = vld [vmem:[#allocation20_spill] sm:$0xff] }
 0x1e3   : > { %3602 = vmatprep.subr.bf16.mxu0 %v7178_v48  ;;  %3730 = vmatprep.subr.bf16.mxu1 %v7179_v15  ;;  %v6220_v38 = vpop.eup %4576  ;;  %v1130_v31 = vadd.f32 %v4573_v42, %v4571_v9  ;;  %v634_v27 = vmax.f32 %v570_v25, 1e-06  ;;  %4592 = vlog2.f32 %v626_v8  ;;  %v7182_v7 = vpack.c.bf16 %v5794_v6, %v5786_v47  ;;  %v6330_v12 = vld [vmem:[%s5365_s28 + $0xfd0] sm:$0xff] }
 0x1e4   : > { %v4579_v28 = vpop.eup %4578  ;;  %v1023_v48 = vrot.slane %v1022_v26, 1  ;;  %v1050_v45 = vadd.f32 %v1049_v55, %v1048_v13  ;;  %v1077_v46 = vrot.slane %v1076_v63, 2  ;;  %v1104_v15 = vadd.f32 %v1103_v59, %v1102_v32  ;;  %v7186_v13 = vld [vmem:[#allocation22_spill] sm:$0xff]  ;;  %v7188_v32 = vld [vmem:[#allocation24_spill] sm:$0xff]  ;;  %v7189_v55 = vld [vmem:[#allocation23_spill] sm:$0xff] }
 0x1e5   : > { %v4581_v60 = vpop.eup %4580  ;;  %v7185_v22 = vpack.c.bf16 %v7183_v40, %v7184_v41  ;;  %v1131_v42 = vrot.slane %v1130_v31, 4  ;;  %v1158_v9 = vadd.f32 %v4579_v28, %v4575_v16  ;;  %4594 = vlog2.f32 %v630_v61 }
 0x1e6   : > { %3604 = vmatpush1.bf16.msra.mxu0 %v7182_v7  ;;  %v4583_v8 = vpop.eup %4582  ;;  %v7187_v25 = vpack.c.bf16 %v5810_v39, %v7186_v13  ;;  %v7190_v59 = vpack.c.bf16 %v7188_v32, %v7189_v55  ;;  %v1024_v47 = vadd.f32 %v1023_v48, %v1022_v26  ;;  %v1051_v6 = vrot.slane %v1050_v45, 1  ;;  %v7191_v32 = vld [vmem:[#allocation26_spill] sm:$0xff]  ;;  %v7192_v55 = vld [vmem:[#allocation25_spill] sm:$0xff]  ;;  %v7195_v48 = vld [vmem:[#allocation27_spill] sm:$0xff] }
 0x1e7   : > { %3732 = vmatpush1.bf16.msra.mxu1 %v7185_v22  ;;  %v1078_v7 = vadd.f32 %v1077_v46, %v1076_v63  ;;  %v1105_v40 = vrot.slane %v1104_v15, 2  ;;  %v4585_v41 = vpop.eup %4584  ;;  %v1132_v22 = vadd.f32 %v1131_v42, %v1130_v31  ;;  %v1159_v53 = vrot.slane %v1158_v9, 4  ;;  %v7194_v63 = vld [vmem:[#allocation28_spill] sm:$0xff]  ;;  %v6247_v31 = vld [vmem:[%s5365_s28 + $0xf18] sm:$0xff] }
 0x1e8   : > { %3606 = vmatprep.subr.bf16.mxu0 %v7187_v25  ;;  %3734 = vmatprep.subr.bf16.mxu1 %v7190_v59  ;;  %v1186_v16 = vadd.f32 %v4583_v8, %v4581_v60  ;;  %4596 = vlog2.f32 %v634_v27  ;;  %v4587_v61 = vpop.eup %4586  ;;  %v1052_v28 = vadd.f32 %v1051_v6, %v1050_v45  ;;  %v1225_v13 = vmul.f32 0.0625, %v1024_v47  ;;  %7197 = vst [vmem:[#allocation21_spill] sm:$0xff] %v6247_v31  ;;  %v6250_v60 = vld [vmem:[%s5365_s28 + $0xf58] sm:$0xff]  ;;  %v7202_v6 = vld [vmem:[#allocation32_spill] sm:$0xff] }
 0x1e9   : > { %v1079_v10 = vrot.slane %v1078_v7, 1  ;;  %v1106_v39 = vadd.f32 %v1105_v40, %v1104_v15  ;;  %v6238_v25 = vpop.eup %4588  ;;  %v7193_v26 = vpack.c.bf16 %v7191_v32, %v7192_v55  ;;  %v7196_v46 = vpack.c.bf16 %v7194_v63, %v7195_v48  ;;  %7198 = vst [vmem:[#allocation20_spill] sm:$0xff] %v6250_v60  ;;  %v7199_v8 = vld [vmem:[#allocation30_spill] sm:$0xff]  ;;  %v7200_v59 = vld [vmem:[#allocation29_spill] sm:$0xff]  ;;  %v7203_v40 = vld [vmem:[#allocation31_spill] sm:$0xff] }
 0x1ea   : > { %v1133_v27 = vrot.slane %v1132_v22, 2  ;;  %v1160_v45 = vadd.f32 %v1159_v53, %v1158_v9  ;;  %v1187_v15 = vrot.slane %v1186_v16, 4  ;;  %v1214_v42 = vadd.f32 %v4587_v61, %v4585_v41  ;;  %v6261_v53 = vld [vmem:[%s5365_s28 + $0xf00] sm:$0xff]  ;;  %v7219_v31 = vld [vmem:[#allocation40_spill] sm:$0xff]  ;;  %v6299_v60 = vld [vmem:[%s5365_s28 + $0xf98] sm:$0xff] }
 0x1eb   : > { %3608 = vmatpush1.bf16.msra.mxu0 %v7193_v26  ;;  %3736 = vmatpush1.bf16.msra.mxu1 %v7196_v46  ;;  %v7201_v47 = vpack.c.bf16 %v7199_v8, %v7200_v59  ;;  %v7204_v32 = vpack.c.bf16 %v7202_v6, %v7203_v40  ;;  %v1080_v55 = vadd.f32 %v1079_v10, %v1078_v7  ;;  %v1107_v26 = vrot.slane %v1106_v39, 1  ;;  %v6258_v48 = vpop.eup %4590  ;;  %v6264_v9 = vld [vmem:[%s5365_s28 + $0xf40] sm:$0xff]  ;;  %v574_v59 = vld [vmem:[%s5363_s3 + $0xd0] sm:$0xff]  ;;  %v6285_v10 = vld [vmem:[%s5365_s28 + $0xf88] sm:$0xff] }
 0x1ec   : > { %v1229_v63 = vmul.f32 0.0625, %v1052_v28  ;;  %4598 = vlog2.f32 %v1225_v13  ;;  %7205 = vst [vmem:[#allocation22_spill] sm:$0xff] %v6261_v53  ;;  %7206 = vst [vmem:[#allocation24_spill] sm:$0xff] %v6264_v9  ;;  %v1134_v41 = vadd.f32 %v1133_v27, %v1132_v22  ;;  %v1161_v61 = vrot.slane %v1160_v45, 2  ;;  %v6270_v7 = vld [vmem:[%s5365_s28 + $0xf10] sm:$0xff]  ;;  %v7208_v40 = vld [vmem:[#allocation34_spill] sm:$0xff] }
 0x1ed   : > { %3610 = vmatprep.subr.bf16.mxu0 %v7201_v47  ;;  %3738 = vmatprep.subr.bf16.mxu1 %v7204_v32  ;;  %v1188_v46 = vadd.f32 %v1187_v15, %v1186_v16  ;;  %v1215_v8 = vrot.slane %v1214_v42, 4  ;;  %7207 = vst [vmem:[#allocation23_spill] sm:$0xff] %v6270_v7  ;;  %v1108_v28 = vadd.f32 %v1107_v26, %v1106_v39  ;;  %v1233_v13 = vmul.f32 0.0625, %v1080_v55  ;;  %v578_v47 = vld [vmem:[%s5363_s3 + $0xf0] sm:$0xff]  ;;  %v6273_v6 = vpop.eup %4592  ;;  %v7212_v27 = vld [vmem:[#allocation35_spill] sm:$0xff]  ;;  %v7226_v53 = vld [vmem:[#allocation42_spill] sm:$0xff] }
 0x1ee   : > { %4600 = vlog2.f32 %v1229_v63  ;;  %v7209_v32 = vld [vmem:[#allocation33_spill] sm:$0xff]  ;;  %v7211_v16 = vld [vmem:[#allocation36_spill] sm:$0xff]  ;;  %7214 = vst [vmem:[#allocation26_spill] sm:$0xff] %v6285_v10  ;;  %v1135_v55 = vrot.slane %v1134_v41, 1  ;;  %v1162_v26 = vadd.f32 %v1161_v61, %v1160_v45  ;;  %7222 = vst [vmem:[#allocation28_spill] sm:$0xff] %v6299_v60 }
 0x1ef   : > { %v7210_v22 = vpack.c.bf16 %v7208_v40, %v7209_v32  ;;  %v7213_v15 = vpack.c.bf16 %v7211_v16, %v7212_v27  ;;  %v6288_v39 = vld [vmem:[%s5365_s28 + $0xfc8] sm:$0xff]  ;;  %v1189_v63 = vrot.slane %v1188_v46, 2  ;;  %v1216_v37 = vadd.f32 %v1215_v8, %v1214_v42  ;;  %v7216_v40 = vld [vmem:[#allocation38_spill] sm:$0xff]  ;;  %v7217_v32 = vld [vmem:[#allocation37_spill] sm:$0xff]  ;;  %v6302_v61 = vpop.eup %4594 }
 0x1f0   : > { %7215 = vst [vmem:[#allocation25_spill] sm:$0xff] %v6288_v39  ;;  %v7220_v16 = vld [vmem:[#allocation39_spill] sm:$0xff]  ;;  %v1237_v18 = vmul.f32 0.0625, %v1108_v28  ;;  %4602 = vlog2.f32 %v1233_v13  ;;  %v638_v45 = vmax.f32 %v574_v59, 1e-06  ;;  %v6305_v42 = vld [vmem:[%s5365_s28 + $0xfd8] sm:$0xff] }
 0x1f1   : > { %3612 = vmatpush1.bf16.msra.mxu0 %v7210_v22  ;;  %3740 = vmatpush1.bf16.msra.mxu1 %v7213_v15  ;;  %v7218_v22 = vpack.c.bf16 %v7216_v40, %v7217_v32  ;;  %v7221_v27 = vpack.c.bf16 %v7219_v31, %v7220_v16  ;;  %7223 = vst [vmem:[#allocation27_spill] sm:$0xff] %v6305_v42  ;;  %v6308_v8 = vld [vmem:[%s5365_s28 + $0xf80] sm:$0xff]  ;;  %v1163_v32 = vrot.slane %v1162_v26, 1  ;;  %v1217_v16 = vrot.slane %v1216_v37, 2  ;;  %v586_v13 = vld [vmem:[%s5363_s3 + $0x130] sm:$0xff] }
 0x1f2   : > { %7224 = vst [vmem:[#allocation30_spill] sm:$0xff] %v6308_v8  ;;  %v6311_v31 = vld [vmem:[%s5365_s28 + $0xfc0] sm:$0xff]  ;;  %v1136_v40 = vadd.f32 %v1135_v55, %v1134_v41  ;;  %4604 = vlog2.f32 %v1237_v18  ;;  %v6318_v15 = vpop.eup %4596  ;;  %v7227_v9 = vld [vmem:[#allocation41_spill] sm:$0xff]  ;;  %v7229_v41 = vld [vmem:[#allocation44_spill] sm:$0xff] }
 0x1f3   : > { %3614 = vmatprep.subr.bf16.mxu0 %v7218_v22  ;;  %3742 = vmatprep.subr.bf16.mxu1 %v7221_v27  ;;  %7225 = vst [vmem:[#allocation29_spill] sm:$0xff] %v6311_v31  ;;  %v1190_v22 = vadd.f32 %v1189_v63, %v1188_v46  ;;  %v642_v27 = vmax.f32 %v578_v47, 1e-06  ;;  %v7228_v11 = vpack.c.bf16 %v7226_v53, %v7227_v9  ;;  %v7230_v55 = vld [vmem:[#allocation43_spill] sm:$0xff]  ;;  %v6327_v63 = vld [vmem:[%s5365_s28 + $0xf90] sm:$0xff]  ;;  %v7233_v39 = vld [vmem:[#allocation46_spill] sm:$0xff]  ;;  %4606 = vlog2.f32 %v638_v45 }
 0x1f4   : > { %v7231_v46 = vpack.c.bf16 %v7229_v41, %v7230_v55  ;;  %7232 = vst [vmem:[#allocation32_spill] sm:$0xff] %v6327_v63  ;;  %v1164_v28 = vadd.f32 %v1163_v32, %v1162_v26  ;;  %v1218_v47 = vadd.f32 %v1217_v16, %v1216_v37  ;;  %v1241_v59 = vmul.f32 0.0625, %v1136_v40  ;;  %v590_v10 = vld [vmem:[%s5363_s3 + $0x150] sm:$0xff]  ;;  %v7237_v9 = vld [vmem:[#allocation47_spill] sm:$0xff]  ;;  %v7239_v26 = vld [vmem:[#allocation50_spill] sm:$0xff] }
 0x1f5   : > { %3616 = vmatpush1.bf16.msra.mxu0 %v7228_v11  ;;  %v1191_v18 = vrot.slane %v1190_v22, 1  ;;  %v7234_v7 = vld [vmem:[#allocation45_spill] sm:$0xff]  ;;  %v7236_v11 = vld [vmem:[#allocation48_spill] sm:$0xff]  ;;  %v646_v32 = vmax.f32 %v582_v19, 1e-06  ;;  %v7245_v42 = vld [vmem:[#allocation54_spill] sm:$0xff] }
 0x1f6   : > { %3744 = vmatpush1.bf16.msra.mxu1 %v7231_v46  ;;  %v7235_v53 = vpack.c.bf16 %v7233_v39, %v7234_v7  ;;  %v7238_v41 = vpack.c.bf16 %v7236_v11, %v7237_v9  ;;  %v1219_v37 = vrot.slane %v1218_v47, 1  ;;  %v1245_v40 = vmul.f32 0.0625, %v1164_v28  ;;  %v594_v16 = vld [vmem:[%s5363_s3 + $0x170] sm:$0xff]  ;;  %v7243_v28 = vld [vmem:[#allocation51_spill] sm:$0xff] }
 0x1f7   : > { %v1192_v46 = vadd.f32 %v1191_v18, %v1190_v22  ;;  %4608 = vlog2.f32 %v1241_v59  ;;  %v6345_v7 = vld [vmem:[%s5363_s3 + $0x190] sm:$0xff]  ;;  %v650_v9 = vmax.f32 %v586_v13, 1e-06 }
 0x1f8   : > { %3618 = vmatprep.subr.bf16.mxu0 %v7235_v53  ;;  %3746 = vmatprep.subr.bf16.mxu1 %v7238_v41  ;;  %v6348_v39 = vld [vmem:[%s5363_s3 + $0x1b0] sm:$0xff]  ;;  %v4599_v53 = vpop.eup %4598  ;;  %v654_v41 = vmax.f32 %v590_v10, 1e-06  ;;  %4610 = vlog2.f32 %v642_v27  ;;  %v1220_v59 = vadd.f32 %v1219_v37, %v1218_v47  ;;  %v7249_v27 = vld [vmem:[#allocation55_spill] sm:$0xff] }
 0x1f9   : > { %v7240_v19 = vld [vmem:[#allocation49_spill] sm:$0xff]  ;;  %v7242_v22 = vld [vmem:[#allocation52_spill] sm:$0xff]  ;;  %v1249_v55 = vmul.f32 0.0625, %v1192_v46  ;;  %v1261_v8 = vmul.f32 0.6931472, %v4599_v53  ;;  %4612 = vlog2.f32 %v1245_v40  ;;  %v4601_v60 = vpop.eup %4600 }
 0x1fa   : > { %v7241_v45 = vpack.c.bf16 %v7239_v26, %v7240_v19  ;;  %v7244_v18 = vpack.c.bf16 %v7242_v22, %v7243_v28  ;;  %v6359_v31 = vld [vmem:[%s5363_s3 + $0x1d0] sm:$0xff]  ;;  %v658_v26 = vmax.f32 %v594_v16, 1e-06  ;;  %v662_v19 = vmax.f32 %v6345_v7, 1e-06  ;;  %v4603_v40 = vpop.eup %4602 }
 0x1fb   : > { %v7246_v11 = vld [vmem:[#allocation53_spill] sm:$0xff]  ;;  %v7248_v10 = vld [vmem:[#allocation56_spill] sm:$0xff]  ;;  %4614 = vlog2.f32 %v646_v32  ;;  %v1253_v47 = vmul.f32 0.0625, %v1220_v59  ;;  %v1269_v46 = vmul.f32 0.6931472, %v4601_v60  ;;  %v1322_v37 = vmul.f32 %v5622_v21, %v1261_v8  ;;  %v7254_v32 = vld [vmem:[#allocation59_spill] sm:$0xff] }
 0x1fc   : > { %3620 = vmatpush1.bf16.msra.mxu0 %v7241_v45  ;;  %3748 = vmatpush1.bf16.msra.mxu1 %v7244_v18  ;;  %v7247_v13 = vpack.c.bf16 %v7245_v42, %v7246_v11  ;;  %v7250_v63 = vpack.c.bf16 %v7248_v10, %v7249_v27  ;;  %v666_v45 = vmax.f32 %v6348_v39, 1e-06  ;;  %4616 = vlog2.f32 %v1249_v55  ;;  %v7252_v16 = vld [vmem:[#allocation57_spill] sm:$0xff]  ;;  %v7259_v18 = vld [vmem:[#allocation63_spill] sm:$0xff]  ;;  %v7260_v59 = vld [vmem:[#allocation62_spill] sm:$0xff] }
 0x1fd   : > { %v670_v42 = vmax.f32 %v6359_v31, 1e-06  ;;  %v681_v53 = vmul.f32 0.6931472, %v6220_v38  ;;  %v689_v11 = vmul.f32 0.6931472, %v6238_v25  ;;  %4618 = vlog2.f32 %v650_v9  ;;  %v4605_v38 = vpop.eup %4604 }
 0x1fe   : > { %3622 = vmatprep.subr.bf16.mxu0 %v7247_v13  ;;  %3750 = vmatprep.subr.bf16.mxu1 %v7250_v63  ;;  %v7251_v63 = vld [vmem:[#allocation58_spill] sm:$0xff]  ;;  %v7255_v39 = vpack.c.bf16 %v5992_v56, %v7254_v32  ;;  %v1277_v60 = vmul.f32 0.6931472, %v4603_v40  ;;  %4620 = vlog2.f32 %v1253_v47  ;;  %v1326_v8 = vmul.f32 %v5622_v21, %v1269_v46  ;;  %v610_v22 = vld [vmem:[%s5363_s3 + $0x1f0] sm:$0xff]  ;;  %v6392_v40 = vld [vmem:[%s5365_s28 + $0x28] sm:$0xff] }
 0x1ff   : > { %v7253_v7 = vpack.c.bf16 %v7251_v63, %v7252_v16  ;;  %v1357_v55 = vmul.f32 1.442695, %v1322_v37  ;;  %v7256_v28 = vld [vmem:[#allocation61_spill] sm:$0xff]  ;;  %v7257_v25 = vld [vmem:[#allocation60_spill] sm:$0xff]  ;;  %v7261_v13 = vpack.c.bf16 %v7259_v18, %v7260_v59  ;;  %v697_v56 = vmul.f32 0.6931472, %v6258_v48  ;;  %v4607_v16 = vpop.eup %4606 }
 0x200   : > { %3752 = vmatpush1.bf16.msra.mxu1 %v7255_v39  ;;  %v7258_v9 = vpack.c.bf16 %v7256_v28, %v7257_v25  ;;  %v705_v10 = vmul.f32 0.6931472, %v6273_v6  ;;  %v713_v27 = vmul.f32 0.6931472, %v6302_v61  ;;  %4622 = vlog2.f32 %v654_v41  ;;  %v6395_v63 = vld [vmem:[%s5365_s28 + $0x68] sm:$0xff] }
 0x201   : > { %3624 = vmatpush1.bf16.msra.mxu0 %v7253_v7  ;;  %3754 = vmatprep.subr.bf16.mxu1 %v7261_v13  ;;  %v1285_v47 = vmul.f32 0.6931472, %v4605_v38  ;;  %v1330_v46 = vmul.f32 %v5622_v21, %v1277_v60  ;;  %4624 = vpow2.f32 %v1357_v55  ;;  %v1365_v37 = vmul.f32 1.442695, %v1326_v8  ;;  %v4609_v6 = vpop.eup %4608  ;;  %v7262_v61 = vld [vmem:[#allocation64_spill] sm:$0xff] }
 0x202   : > { %3626 = vmatprep.subr.bf16.mxu0 %v7258_v9  ;;  %v674_v7 = vmax.f32 %v610_v22, 1e-06  ;;  %v721_v32 = vmul.f32 0.6931472, %v6318_v15  ;;  %4626 = vlog2.f32 %v658_v26  ;;  %v807_v48 = vmul.f32 %v681_v53, %v5379_v0  ;;  %v4611_v22 = vpop.eup %4610 }
 0x203   : > { %v7263_v41 = vpack.c.bf16 %v6030_v20, %v7262_v61  ;;  %v7264_v39 = vpack.c.bf16 %v6040_v58, %v6037_v35  ;;  %v1334_v60 = vmul.f32 %v5622_v21, %v1285_v47  ;;  %4628 = vpow2.f32 %v1365_v37  ;;  %v4613_v53 = vpop.eup %4612 }
 0x204   : > { %v1373_v8 = vmul.f32 1.442695, %v1330_v46  ;;  %v811_v55 = vmul.f32 %v689_v11, %v5379_v0  ;;  %v7265_v15 = vpack.c.bf16 %v6047_v24, %v6044_v17  ;;  %v7266_v26 = vpack.c.bf16 %v6056_v54, %v6053_v5 }
 0x205   : > { %3628 = vmatpush1.bf16.msra.mxu0 %v7263_v41  ;;  %3756 = vmatpush1.bf16.msra.mxu1 %v7264_v39  ;;  %v1293_v20 = vmul.f32 0.6931472, %v4609_v6  ;;  %4630 = vlog2.f32 %v662_v19  ;;  %v815_v35 = vmul.f32 %v697_v56, %v5379_v0  ;;  %v3777_v58 = vpack.c.bf16 %v6395_v63, %v6392_v40  ;;  %v4615_v17 = vpop.eup %4614 }
 0x206   : > { %3630 = vmatprep.subr.bf16.mxu0 %v7265_v15  ;;  %3758 = vmatprep.subr.bf16.mxu1 %v7266_v26  ;;  %4632 = vpow2.f32 %v1373_v8  ;;  %v1381_v38 = vmul.f32 1.442695, %v1334_v60  ;;  %v819_v11 = vmul.f32 %v705_v10, %v5379_v0  ;;  %v823_v28 = vmul.f32 %v713_v27, %v5379_v0  ;;  %v4617_v54 = vpop.eup %4616  ;;  %v7277_v15 = vld [vmem:[#allocation66_spill] sm:$0xff] }
 0x207   : > { %v1301_v24 = vmul.f32 0.6931472, %v4613_v53  ;;  %v1338_v25 = vmul.f32 %v5622_v21, %v1293_v20  ;;  %4634 = vlog2.f32 %v666_v45  ;;  %v827_v5 = vmul.f32 %v721_v32, %v5379_v0  ;;  %v4619_v56 = vpop.eup %4618 }
 0x208   : > { %v7267_v19 = vpack.c.bf16 %v6075_v3, %v6072_v4  ;;  %v7268_v9 = vpack.c.bf16 %v6094_v30, %v6091_v29  ;;  %4636 = vpow2.f32 %v1381_v38  ;;  %v729_v18 = vmul.f32 0.6931472, %v4607_v16  ;;  %v4621_v29 = vpop.eup %4620 }
 0x209   : > { %v873_v59 = vmul.f32 1.442695, %v807_v48  ;;  %v881_v13 = vmul.f32 1.442695, %v811_v55  ;;  %v7269_v10 = vpack.c.bf16 %v6107_v23, %v6104_v51  ;;  %v7270_v45 = vpack.c.bf16 %v6132_v49, %v6119_v52 }
 0x20a   : > { %3632 = vmatpush1.bf16.msra.mxu0 %v7267_v19  ;;  %3760 = vmatpush1.bf16.msra.mxu1 %v7268_v9  ;;  %v1309_v27 = vmul.f32 0.6931472, %v4617_v54  ;;  %v1342_v4 = vmul.f32 %v5622_v21, %v1301_v24  ;;  %v1389_v3 = vmul.f32 1.442695, %v1338_v25  ;;  %4638 = vlog2.f32 %v670_v42  ;;  %v4623_v37 = vpop.eup %4622  ;;  %v7282_v24 = vld [vmem:[#allocation20_spill] sm:$0xff]  ;;  %v7283_v25 = vld [vmem:[#allocation21_spill] sm:$0xff] }
 0x20b   : > { %3634 = vmatprep.subr.bf16.mxu0 %v7269_v10  ;;  %3762 = vmatprep.subr.bf16.mxu1 %v7270_v45  ;;  %v737_v30 = vmul.f32 0.6931472, %v4611_v22  ;;  %v745_v47 = vmul.f32 0.6931472, %v4615_v17  ;;  %4640 = vlog2.f32 %v674_v7  ;;  %v889_v46 = vmul.f32 1.442695, %v815_v35  ;;  %v4625_v52 = vpop.eup %4624 }
 0x20c   : > { %v1317_v16 = vmul.f32 0.6931472, %v4621_v29  ;;  %v1346_v51 = vmul.f32 %v5622_v21, %v1309_v27  ;;  %4642 = vpow2.f32 %v1389_v3  ;;  %v1397_v23 = vmul.f32 1.442695, %v1342_v4  ;;  %v4627_v48 = vpop.eup %4626  ;;  %v7276_v22 = vld [vmem:[#allocation67_spill] sm:$0xff]  ;;  %v7285_v29 = vld [vmem:[#allocation24_spill] sm:$0xff] }
 0x20d   : > { %v7271_v49 = vpack.c.bf16 %v6138_v36, %v6135_v50  ;;  %v7272_v31 = vpack.c.bf16 %v6149_v2, %v6144_v62  ;;  %v753_v42 = vmul.f32 0.6931472, %v4619_v56  ;;  %v831_v32 = vmul.f32 %v729_v18, %v5379_v0  ;;  %v4629_v2 = vpop.eup %4628  ;;  %v1438_v56 = vld [vmem:[%s5365_s28 + $0x78] sm:$0xff] }
 0x20e   : > { %4644 = vpow2.f32 %v873_v59  ;;  %v897_v7 = vmul.f32 1.442695, %v819_v11  ;;  %v7273_v6 = vpack.c.bf16 %v6155_v1, %v6152_v57  ;;  %v7274_v61 = vpack.c.bf16 %v6179_v43, %v6168_v14  ;;  %v7279_v11 = vld [vmem:[#allocation69_spill] sm:$0xff] }
 0x20f   : > { %3636 = vmatpush1.bf16.msra.mxu0 %v7271_v49  ;;  %3764 = vmatpush1.bf16.msra.mxu1 %v7272_v31  ;;  %v1350_v50 = vmul.f32 %v5622_v21, %v1317_v16  ;;  %4646 = vpow2.f32 %v1397_v23  ;;  %v1405_v36 = vmul.f32 1.442695, %v1346_v51  ;;  %v761_v62 = vmul.f32 0.6931472, %v4623_v37  ;;  %v4631_v8 = vpop.eup %4630  ;;  %v7290_v49 = vld [vmem:[#allocation25_spill] sm:$0xff]  ;;  %v7291_v31 = vld [vmem:[#allocation26_spill] sm:$0xff] }
 0x210   : > { %3638 = vmatprep.subr.bf16.mxu0 %v7273_v6  ;;  %3766 = vmatprep.subr.bf16.mxu1 %v7274_v61  ;;  %v769_v41 = vmul.f32 0.6931472, %v4627_v48  ;;  %v835_v39 = vmul.f32 %v737_v30, %v5379_v0  ;;  %4648 = vpow2.f32 %v881_v13  ;;  %v905_v60 = vmul.f32 1.442695, %v823_v28  ;;  %v4633_v14 = vpop.eup %4632  ;;  %v7280_v28 = vld [vmem:[#allocation68_spill] sm:$0xff]  ;;  %v1430_v13 = vld [vmem:[%s5365_s28 + $0x38] sm:$0xff] }
 0x211   : > { %4650 = vpow2.f32 %v1405_v36  ;;  %v1413_v55 = vmul.f32 1.442695, %v1350_v50  ;;  %v1995_v57 = vsel %vm1967_vm0, %v4629_v2, %v4625_v52  ;;  %v839_v1 = vmul.f32 %v745_v47, %v5379_v0  ;;  %v4635_v38 = vpop.eup %4634  ;;  %v7286_v30 = vld [vmem:[#allocation22_spill] sm:$0xff] }
 0x212   : > { %v7275_v43 = vpack.c.bf16 %v6185_v34, %v6182_v44  ;;  %v7278_v26 = vpack.c.bf16 %v7276_v22, %v7277_v15  ;;  %v777_v20 = vmul.f32 0.6931472, %v4631_v8  ;;  %v843_v35 = vmul.f32 %v753_v42, %v5379_v0  ;;  %v4637_v9 = vpop.eup %4636 }
 0x213   : > { %4652 = vpow2.f32 %v889_v46  ;;  %v913_v53 = vmul.f32 1.442695, %v827_v5  ;;  %v7281_v17 = vpack.c.bf16 %v7279_v11, %v7280_v28  ;;  %v7284_v44 = vpack.c.bf16 %v7282_v24, %v7283_v25  ;;  %v7288_v46 = vld [vmem:[#allocation23_spill] sm:$0xff] }
 0x214   : > { %3640 = vmatpush1.bf16.msra.mxu0 %v7275_v43  ;;  %3768 = vmatpush1.bf16.msra.mxu1 %v7278_v26  ;;  %4654 = vpow2.f32 %v1413_v55  ;;  %v1996_v34 = vsel %vm1969_vm1, %v4633_v14, %v1995_v57  ;;  %v847_v54 = vmul.f32 %v761_v62, %v5379_v0  ;;  %v921_v19 = vmul.f32 1.442695, %v831_v32  ;;  %v4639_v10 = vpop.eup %4638  ;;  %v7293_v32 = vld [vmem:[#allocation27_spill] sm:$0xff]  ;;  %v7296_v55 = vld [vmem:[#allocation29_spill] sm:$0xff]  ;;  %v7297_v57 = vld [vmem:[#allocation30_spill] sm:$0xff] }
 0x215   : > { %3642 = vmatprep.subr.bf16.mxu0 %v7281_v17  ;;  %3770 = vmatprep.subr.bf16.mxu1 %v7284_v44  ;;  %v785_v18 = vmul.f32 0.6931472, %v4635_v38  ;;  %v851_v59 = vmul.f32 %v769_v41, %v5379_v0  ;;  %4656 = vpow2.f32 %v897_v7  ;;  %v929_v5 = vmul.f32 1.442695, %v835_v39  ;;  %v4641_v3 = vpop.eup %4640  ;;  %v7294_v7 = vld [vmem:[#allocation28_spill] sm:$0xff] }
 0x216   : > { %v1997_v45 = vsel %vm1971_vm2, %v4637_v9, %v1996_v34  ;;  %v855_v27 = vmul.f32 %v777_v20, %v5379_v0  ;;  %4658 = vpow2.f32 %v905_v60  ;;  %v937_v4 = vmul.f32 1.442695, %v839_v1  ;;  %v4643_v52 = vpop.eup %4642  ;;  %v7299_v14 = vld [vmem:[#allocation32_spill] sm:$0xff] }
 0x217   : > { %v7287_v47 = vpack.c.bf16 %v7285_v29, %v7286_v30  ;;  %v7289_v37 = vpack.c.bf16 %v6282_v33, %v7288_v46  ;;  %v793_v16 = vmul.f32 0.6931472, %v4639_v10  ;;  %v859_v51 = vmul.f32 %v785_v18, %v5379_v0 }
 0x218   : > { %4660 = vpow2.f32 %v913_v53  ;;  %v945_v23 = vmul.f32 1.442695, %v843_v35  ;;  %v7292_v42 = vpack.c.bf16 %v7290_v49, %v7291_v31  ;;  %v7295_v48 = vpack.c.bf16 %v7293_v32, %v7294_v7  ;;  %v4645_v33 = vpop.eup %4644 }
 0x219   : > { %3644 = vmatpush1.bf16.msra.mxu0 %v7287_v47  ;;  %3772 = vmatpush1.bf16.msra.mxu1 %v7289_v37  ;;  %v801_v6 = vmul.f32 0.6931472, %v4641_v3  ;;  %4662 = vpow2.f32 %v921_v19  ;;  %v953_v61 = vmul.f32 1.442695, %v847_v54  ;;  %v3905_v50 = vpack.c.bf16 %v1438_v56, %v1430_v13  ;;  %v4647_v41 = vpop.eup %4646 }
 0x21a   : > { %3646 = vmatprep.subr.bf16.mxu0 %v7292_v42  ;;  %3774 = vmatprep.subr.bf16.mxu1 %v7295_v48  ;;  %v1998_v36 = vsel %vm1973_vm3, %v4643_v52, %v1997_v45  ;;  %v863_v62 = vmul.f32 %v793_v16, %v5379_v0  ;;  %4664 = vpow2.f32 %v929_v5  ;;  %v961_v2 = vmul.f32 1.442695, %v851_v59  ;;  %v4649_v8 = vpop.eup %4648 }
 0x21b   : > { %v867_v39 = vmul.f32 %v801_v6, %v5379_v0  ;;  %4666 = vpow2.f32 %v937_v4  ;;  %v969_v60 = vmul.f32 1.442695, %v855_v27  ;;  %v7298_v1 = vpack.c.bf16 %v7296_v55, %v7297_v57  ;;  %v4651_v26 = vpop.eup %4650 }
 0x21c   : > { %v7300_v43 = vpack.c.bf16 %v6330_v12, %v7299_v14  ;;  %v1999_v22 = vsel %vm1975_vm4, %v4647_v41, %v1998_v36  ;;  %4668 = vpow2.f32 %v945_v23  ;;  %v977_v15 = vmul.f32 1.442695, %v859_v51 }
 0x21d   : > { %3648 = vmatpush1.bf16.msra.mxu0 %v7298_v1  ;;  %4670 = vpow2.f32 %v953_v61  ;;  %v985_v20 = vmul.f32 1.442695, %v863_v62  ;;  %v1011_v35 = vadd.f32 %v4649_v8, %v4645_v33  ;;  %v4653_v0 = vpop.eup %4652  ;;  %v2000_v53 = vsel %vm1977_vm5, %v4651_v26, %v1999_v22 }
 0x21e   : > { %3776 = vmatpush1.bf16.msra.mxu1 %v7300_v43  ;;  %3778 = vmatprep.subr.bf16.mxu0 %v3777_v58  ;;  %4672 = vpow2.f32 %v961_v2  ;;  %v993_v38 = vmul.f32 1.442695, %v867_v39  ;;  %v4655_v12 = vpop.eup %4654 }
 0x21f   : > { %3906 = vmatprep.subr.bf16.mxu1 %v3905_v50  ;;  %4674 = vpow2.f32 %v969_v60  ;;  %v1012_v11 = vrot.slane %v1011_v35, 4  ;;  %v4657_v28 = vpop.eup %4656  ;;  %v6501_v17 = vsel %vm1979_vm6, %v4655_v12, %v2000_v53 }
 0x220   : > { %4676 = vpow2.f32 %v977_v15  ;;  %v4659_v24 = vpop.eup %4658  ;;  %2141 = vmatprep.mubr.f32.mxu0 %v6501_v17  ;;  %2283 = vmatprep.mubr.f32.mxu1 %v6501_v17  ;;  %v1039_v63 = vadd.f32 %v4657_v28, %v4653_v0 }
 0x221   : > { %4678 = vpow2.f32 %v985_v20  ;;  %v1013_v40 = vadd.f32 %v1012_v11, %v1011_v35 }
 0x222   : > { %v4661_v58 = vpop.eup %4660  ;;  %4680 = vpow2.f32 %v993_v38  ;;  %v1040_v34 = vrot.slane %v1039_v63, 4 }
 0x223   : > { %v4663_v25 = vpop.eup %4662  ;;  %v1014_v44 = vrot.slane %v1013_v40, 2  ;;  %v1067_v54 = vadd.f32 %v4661_v58, %v4659_v24 }
 0x224   : > { %v4665_v19 = vpop.eup %4664  ;;  %v1041_v59 = vadd.f32 %v1040_v34, %v1039_v63 }
 0x225   : > { %v4667_v9 = vpop.eup %4666  ;;  %v1015_v18 = vadd.f32 %v1014_v44, %v1013_v40  ;;  %v1068_v5 = vrot.slane %v1067_v54, 4  ;;  %v1095_v13 = vadd.f32 %v4665_v19, %v4663_v25 }
 0x226   : > { %v4669_v56 = vpop.eup %4668  ;;  %v1042_v27 = vrot.slane %v1041_v59, 2 }
 0x227   : > { %v4671_v10 = vpop.eup %4670  ;;  %v1016_v45 = vrot.slane %v1015_v18, 1  ;;  %v1069_v4 = vadd.f32 %v1068_v5, %v1067_v54  ;;  %v1096_v3 = vrot.slane %v1095_v13, 4  ;;  %v1123_v30 = vadd.f32 %v4669_v56, %v4667_v9 }
 0x228   : > { %v4673_v29 = vpop.eup %4672  ;;  %v1043_v37 = vadd.f32 %v1042_v27, %v1041_v59 }
 0x229   : > { %v4675_v47 = vpop.eup %4674  ;;  %v1017_v46 = vadd.f32 %v1016_v45, %v1015_v18  ;;  %v1070_v16 = vrot.slane %v1069_v4, 2  ;;  %v1097_v51 = vadd.f32 %v1096_v3, %v1095_v13  ;;  %v1124_v52 = vrot.slane %v1123_v30, 4 }
 0x22a   : > { %v4677_v23 = vpop.eup %4676  ;;  %v1151_v49 = vadd.f32 %v4673_v29, %v4671_v10  ;;  %v1044_v42 = vrot.slane %v1043_v37, 1 }
 0x22b   : > { %v4679_v31 = vpop.eup %4678  ;;  %v1071_v32 = vadd.f32 %v1070_v16, %v1069_v4  ;;  %v1098_v7 = vrot.slane %v1097_v51, 2  ;;  %v1179_v48 = vadd.f32 %v4677_v23, %v4675_v47  ;;  %v1125_v61 = vadd.f32 %v1124_v52, %v1123_v30 }
 0x22c   : > { %v4681_v6 = vpop.eup %4680  ;;  %v1152_v50 = vrot.slane %v1151_v49, 4  ;;  %v1224_v33 = vmul.f32 0.0625, %v1017_v46  ;;  %v1045_v36 = vadd.f32 %v1044_v42, %v1043_v37 }
 0x22d   : > { %v1072_v62 = vrot.slane %v1071_v32, 1  ;;  %v1099_v2 = vadd.f32 %v1098_v7, %v1097_v51  ;;  %v1180_v41 = vrot.slane %v1179_v48, 4  ;;  %v1126_v39 = vrot.slane %v1125_v61, 2 }
 0x22e   : > { %v1153_v60 = vadd.f32 %v1152_v50, %v1151_v49  ;;  %v1207_v8 = vadd.f32 %v4681_v6, %v4679_v31  ;;  %4682 = vlog2.f32 %v1224_v33  ;;  %v1228_v14 = vmul.f32 0.0625, %v1045_v36 }
 0x22f   : > { %v1073_v55 = vadd.f32 %v1072_v62, %v1071_v32  ;;  %v1100_v57 = vrot.slane %v1099_v2, 1  ;;  %v1181_v1 = vadd.f32 %v1180_v41, %v1179_v48  ;;  %v1127_v43 = vadd.f32 %v1126_v39, %v1125_v61 }
 0x230   : > { %v1154_v22 = vrot.slane %v1153_v60, 2  ;;  %v1208_v15 = vrot.slane %v1207_v8, 4  ;;  %4684 = vlog2.f32 %v1228_v14 }
 0x231   : > { %v1101_v26 = vadd.f32 %v1100_v57, %v1099_v2  ;;  %v1182_v20 = vrot.slane %v1181_v1, 2  ;;  %v1232_v35 = vmul.f32 0.0625, %v1073_v55  ;;  %v1128_v0 = vrot.slane %v1127_v43, 1 }
 0x232   : > { %v1155_v53 = vadd.f32 %v1154_v22, %v1153_v60  ;;  %v1209_v38 = vadd.f32 %v1208_v15, %v1207_v8  ;;  %v1427_v15 = vld [vmem:[%s5365_s28 + $0x20] sm:$0xff] }
 0x233   : > { %v1183_v12 = vadd.f32 %v1182_v20, %v1181_v1  ;;  %v1236_v11 = vmul.f32 0.0625, %v1101_v26  ;;  %4686 = vlog2.f32 %v1232_v35  ;;  %v1129_v28 = vadd.f32 %v1128_v0, %v1127_v43  ;;  %v1435_v26 = vld [vmem:[%s5365_s28 + $0x60] sm:$0xff]  ;;  %v1429_v35 = vld [vmem:[%s5365_s28 + $0x30] sm:$0xff] }
 0x234   : > { %v1156_v24 = vrot.slane %v1155_v53, 1  ;;  %v1210_v40 = vrot.slane %v1209_v38, 2  ;;  %v1437_v0 = vld [vmem:[%s5365_s28 + $0x70] sm:$0xff] }
 0x235   : > { %v1184_v63 = vrot.slane %v1183_v12, 1  ;;  %4688 = vlog2.f32 %v1236_v11  ;;  %v1240_v44 = vmul.f32 0.0625, %v1129_v28  ;;  %v1452_v11 = vld [vmem:[%s5365_s28 + $0xe8] sm:$0xff]  ;;  %v1446_v28 = vld [vmem:[%s5365_s28 + $0xb8] sm:$0xff] }
 0x236   : > { %v1157_v58 = vadd.f32 %v1156_v24, %v1155_v53  ;;  %v1211_v25 = vadd.f32 %v1210_v40, %v1209_v38  ;;  %v1444_v53 = vld [vmem:[%s5365_s28 + $0xa8] sm:$0xff]  ;;  %v1454_v24 = vld [vmem:[%s5365_s28 + $0xf8] sm:$0xff] }
 0x237   : > { %v1185_v34 = vadd.f32 %v1184_v63, %v1183_v12  ;;  %4690 = vlog2.f32 %v1240_v44  ;;  %v3779_v63 = vpack.c.bf16 %v1435_v26, %v1427_v15  ;;  %v1451_v44 = vld [vmem:[%s5365_s28 + $0xe0] sm:$0xff] }
 0x238   : > { %v4683_v54 = vpop.eup %4682  ;;  %v1212_v19 = vrot.slane %v1211_v25, 1  ;;  %v1244_v9 = vmul.f32 0.0625, %v1157_v58  ;;  %v3907_v58 = vpack.c.bf16 %v1437_v0, %v1429_v35  ;;  %v1515_v35 = vld [vmem:[%s5365_s28 + $0x2e0] sm:$0xff] }
 0x239   : > { %v1248_v18 = vmul.f32 0.0625, %v1185_v34  ;;  %v1259_v59 = vmul.f32 0.6931472, %v4683_v54  ;;  %v3781_v54 = vpack.c.bf16 %v1452_v11, %v1444_v53  ;;  %v1524_v11 = vld [vmem:[%s5365_s28 + $0x328] sm:$0xff] }
 0x23a   : > { %v1213_v5 = vadd.f32 %v1212_v19, %v1211_v25  ;;  %4692 = vlog2.f32 %v1244_v9  ;;  %v4685_v13 = vpop.eup %4684  ;;  %v1443_v25 = vld [vmem:[%s5365_s28 + $0xa0] sm:$0xff]  ;;  %v3909_v19 = vpack.c.bf16 %v1454_v24, %v1446_v28  ;;  %v1445_v9 = vld [vmem:[%s5365_s28 + $0xb0] sm:$0xff]  ;;  %v1532_v28 = vld [vmem:[%s5365_s28 + $0x368] sm:$0xff] }
 0x23b   : > { %4694 = vlog2.f32 %v1248_v18  ;;  %v1321_v56 = vmul.f32 %v5622_v21, %v1259_v59  ;;  %v1267_v45 = vmul.f32 0.6931472, %v4685_v13  ;;  %v1453_v18 = vld [vmem:[%s5365_s28 + $0xf0] sm:$0xff]  ;;  %v1460_v59 = vld [vmem:[%s5365_s28 + $0x128] sm:$0xff]  ;;  %v1526_v24 = vld [vmem:[%s5365_s28 + $0x338] sm:$0xff] }
 0x23c   : > { %v1252_v10 = vmul.f32 0.0625, %v1213_v5  ;;  %v1468_v13 = vld [vmem:[%s5365_s28 + $0x168] sm:$0xff] }
 0x23d   : > { %v4687_v27 = vpop.eup %4686  ;;  %v1355_v4 = vmul.f32 1.442695, %v1321_v56  ;;  %v1325_v29 = vmul.f32 %v5622_v21, %v1267_v45  ;;  %v1462_v56 = vld [vmem:[%s5365_s28 + $0x138] sm:$0xff]  ;;  %v3783_v45 = vpack.c.bf16 %v1451_v44, %v1443_v25  ;;  %v1523_v25 = vld [vmem:[%s5365_s28 + $0x320] sm:$0xff] }
 0x23e   : > { %v1275_v3 = vmul.f32 0.6931472, %v4687_v27  ;;  %4696 = vlog2.f32 %v1252_v10  ;;  %v1470_v10 = vld [vmem:[%s5365_s28 + $0x178] sm:$0xff]  ;;  %v3911_v27 = vpack.c.bf16 %v1453_v18, %v1445_v9  ;;  %v1531_v44 = vld [vmem:[%s5365_s28 + $0x360] sm:$0xff]  ;;  %v1533_v9 = vld [vmem:[%s5365_s28 + $0x370] sm:$0xff] }
 0x23f   : > { %v4689_v30 = vpop.eup %4688  ;;  %4698 = vpow2.f32 %v1355_v4  ;;  %v1363_v37 = vmul.f32 1.442695, %v1325_v29  ;;  %v1459_v4 = vld [vmem:[%s5365_s28 + $0x120] sm:$0xff]  ;;  %v3785_v29 = vpack.c.bf16 %v1468_v13, %v1460_v59  ;;  %v1540_v18 = vld [vmem:[%s5365_s28 + $0x3a8] sm:$0xff]  ;;  %v1542_v13 = vld [vmem:[%s5365_s28 + $0x3b8] sm:$0xff] }
 0x240   : > { %v1283_v47 = vmul.f32 0.6931472, %v4689_v30  ;;  %v1329_v46 = vmul.f32 %v5622_v21, %v1275_v3  ;;  %v1467_v3 = vld [vmem:[%s5365_s28 + $0x160] sm:$0xff]  ;;  %v3913_v30 = vpack.c.bf16 %v1470_v10, %v1462_v56  ;;  %v1548_v59 = vld [vmem:[%s5365_s28 + $0x3e8] sm:$0xff]  ;;  %v1550_v56 = vld [vmem:[%s5365_s28 + $0x3f8] sm:$0xff]  ;;  %v3803_v10 = vpack.c.bf16 %v1531_v44, %v1523_v25 }
 0x241   : > { %v4691_v16 = vpop.eup %4690  ;;  %4700 = vpow2.f32 %v1363_v37  ;;  %v1476_v37 = vld [vmem:[%s5365_s28 + $0x1a8] sm:$0xff] }
 0x242   : > { %v1333_v51 = vmul.f32 %v5622_v21, %v1283_v47  ;;  %v1371_v23 = vmul.f32 1.442695, %v1329_v46  ;;  %v1291_v52 = vmul.f32 0.6931472, %v4691_v16  ;;  %v1461_v47 = vld [vmem:[%s5365_s28 + $0x130] sm:$0xff]  ;;  %v1484_v16 = vld [vmem:[%s5365_s28 + $0x1e8] sm:$0xff] }
 0x243   : > { %v1469_v46 = vld [vmem:[%s5365_s28 + $0x170] sm:$0xff] }
 0x244   : > { %v4693_v49 = vpop.eup %4692  ;;  %4702 = vpow2.f32 %v1371_v23  ;;  %v1379_v31 = vmul.f32 1.442695, %v1333_v51  ;;  %v1337_v7 = vmul.f32 %v5622_v21, %v1291_v52  ;;  %v1478_v51 = vld [vmem:[%s5365_s28 + $0x1b8] sm:$0xff]  ;;  %v7301_v52 = vld [vmem:[#allocation19_spill] sm:$0xff] }
 0x245   : > { %v4695_v42 = vpop.eup %4694  ;;  %v1299_v32 = vmul.f32 0.6931472, %v4693_v49  ;;  %v1486_v23 = vld [vmem:[%s5365_s28 + $0x1f8] sm:$0xff]  ;;  %v3787_v49 = vpack.c.bf16 %v1467_v3, %v1459_v4  ;;  %v1547_v4 = vld [vmem:[%s5365_s28 + $0x3e0] sm:$0xff]  ;;  %v3805_v3 = vpack.c.bf16 %v1548_v59, %v1540_v18 }
 0x246   : > { %v1307_v48 = vmul.f32 0.6931472, %v4695_v42  ;;  %4704 = vpow2.f32 %v1379_v31  ;;  %v1387_v61 = vmul.f32 1.442695, %v1337_v7  ;;  %v3915_v31 = vpack.c.bf16 %v1469_v46, %v1461_v47  ;;  %v1475_v42 = vld [vmem:[%s5365_s28 + $0x1a0] sm:$0xff]  ;;  %v1549_v47 = vld [vmem:[%s5365_s28 + $0x3f0] sm:$0xff] }
 0x247   : > { %v1341_v6 = vmul.f32 %v5622_v21, %v1299_v32  ;;  %v1483_v32 = vld [vmem:[%s5365_s28 + $0x1e0] sm:$0xff]  ;;  %v3789_v7 = vpack.c.bf16 %v1484_v16, %v1476_v37  ;;  %v1556_v46 = vld [vmem:[%s5365_s28 + $0x428] sm:$0xff]  ;;  %v1558_v16 = vld [vmem:[%s5365_s28 + $0x438] sm:$0xff] }
 0x248   : > { %v4697_v50 = vpop.eup %4696  ;;  %v1345_v33 = vmul.f32 %v5622_v21, %v1307_v48  ;;  %4706 = vpow2.f32 %v1387_v61  ;;  %v3917_v48 = vpack.c.bf16 %v1486_v23, %v1478_v51  ;;  %v1485_v61 = vld [vmem:[%s5365_s28 + $0x1f0] sm:$0xff]  ;;  %v1564_v37 = vld [vmem:[%s5365_s28 + $0x468] sm:$0xff]  ;;  %v1566_v51 = vld [vmem:[%s5365_s28 + $0x478] sm:$0xff] }
 0x249   : > { %v1315_v36 = vmul.f32 0.6931472, %v4697_v50  ;;  %v1395_v62 = vmul.f32 1.442695, %v1341_v6  ;;  %v4699_v2 = vpop.eup %4698  ;;  %v1477_v6 = vld [vmem:[%s5365_s28 + $0x1b0] sm:$0xff]  ;;  %v1492_v50 = vld [vmem:[%s5365_s28 + $0x228] sm:$0xff] }
 0x24a   : > { %v1403_v41 = vmul.f32 1.442695, %v1345_v33  ;;  %v1500_v33 = vld [vmem:[%s5365_s28 + $0x268] sm:$0xff]  ;;  %v1622_v18 = vld [vmem:[%s5365_s28 + $0x638] sm:$0xff] }
 0x24b   : > { %v1349_v39 = vmul.f32 %v5622_v21, %v1315_v36  ;;  %4708 = vpow2.f32 %v1395_v62  ;;  %v4701_v60 = vpop.eup %4700  ;;  %v1494_v36 = vld [vmem:[%s5365_s28 + $0x238] sm:$0xff] }
 0x24c   : > { %4710 = vpow2.f32 %v1403_v41  ;;  %v1988_v55 = vsel %vm1967_vm0, %v4701_v60, %v4699_v2  ;;  %v1502_v62 = vld [vmem:[%s5365_s28 + $0x278] sm:$0xff]  ;;  %v3791_v2 = vpack.c.bf16 %v1483_v32, %v1475_v42  ;;  %v3919_v41 = vpack.c.bf16 %v1485_v61, %v1477_v6  ;;  %v1499_v60 = vld [vmem:[%s5365_s28 + $0x260] sm:$0xff]  ;;  %v1572_v6 = vld [vmem:[%s5365_s28 + $0x4a8] sm:$0xff] }
 0x24d   : > { %v1411_v8 = vmul.f32 1.442695, %v1349_v39  ;;  %v1491_v39 = vld [vmem:[%s5365_s28 + $0x220] sm:$0xff]  ;;  %v3809_v42 = vpack.c.bf16 %v1564_v37, %v1556_v46  ;;  %v3937_v32 = vpack.c.bf16 %v1566_v51, %v1558_v16  ;;  %v1580_v61 = vld [vmem:[%s5365_s28 + $0x4e8] sm:$0xff]  ;;  %v1630_v59 = vld [vmem:[%s5365_s28 + $0x678] sm:$0xff] }
 0x24e   : > { %v4703_v57 = vpop.eup %4702  ;;  %v3795_v15 = vpack.c.bf16 %v1499_v60, %v1491_v39  ;;  %v3813_v39 = vpack.c.bf16 %v1580_v61, %v1572_v6  ;;  %v1638_v46 = vld [vmem:[%s5365_s28 + $0x6b8] sm:$0xff] }
 0x24f   : > { %4712 = vpow2.f32 %v1411_v8  ;;  %v1989_v1 = vsel %vm1969_vm1, %v4703_v57, %v1988_v55  ;;  %v3793_v8 = vpack.c.bf16 %v1500_v33, %v1492_v50  ;;  %v3921_v55 = vpack.c.bf16 %v1502_v62, %v1494_v36  ;;  %v1493_v57 = vld [vmem:[%s5365_s28 + $0x230] sm:$0xff]  ;;  %v1574_v50 = vld [vmem:[%s5365_s28 + $0x4b8] sm:$0xff] }
 0x250   : > { %v4705_v14 = vpop.eup %4704  ;;  %v1582_v33 = vld [vmem:[%s5365_s28 + $0x4f8] sm:$0xff] }
 0x251   : > { %v1990_v43 = vsel %vm1971_vm2, %v4705_v14, %v1989_v1  ;;  %v1501_v1 = vld [vmem:[%s5365_s28 + $0x270] sm:$0xff]  ;;  %v1508_v14 = vld [vmem:[%s5365_s28 + $0x2a8] sm:$0xff]  ;;  %v3941_v60 = vpack.c.bf16 %v1582_v33, %v1574_v50  ;;  %v1646_v37 = vld [vmem:[%s5365_s28 + $0x6f8] sm:$0xff] }
 0x252   : > { %v4707_v21 = vpop.eup %4706  ;;  %v3923_v26 = vpack.c.bf16 %v1501_v1, %v1493_v57  ;;  %v1588_v57 = vld [vmem:[%s5365_s28 + $0x528] sm:$0xff]  ;;  %v1654_v6 = vld [vmem:[%s5365_s28 + $0x738] sm:$0xff] }
 0x253   : > { %v1991_v22 = vsel %vm1973_vm3, %v4707_v21, %v1990_v43  ;;  %v1516_v43 = vld [vmem:[%s5365_s28 + $0x2e8] sm:$0xff]  ;;  %v1510_v21 = vld [vmem:[%s5365_s28 + $0x2b8] sm:$0xff] }
 0x254   : > { %v3797_v0 = vpack.c.bf16 %v1516_v43, %v1508_v14  ;;  %v1596_v1 = vld [vmem:[%s5365_s28 + $0x568] sm:$0xff]  ;;  %v1590_v14 = vld [vmem:[%s5365_s28 + $0x538] sm:$0xff] }
 0x255   : > { %v4709_v20 = vpop.eup %4708  ;;  %v1598_v43 = vld [vmem:[%s5365_s28 + $0x578] sm:$0xff] }
 0x256   : > { %v4711_v38 = vpop.eup %4710  ;;  %v1992_v12 = vsel %vm1975_vm4, %v4709_v20, %v1991_v22  ;;  %v1518_v22 = vld [vmem:[%s5365_s28 + $0x2f8] sm:$0xff]  ;;  %v1507_v20 = vld [vmem:[%s5365_s28 + $0x2a0] sm:$0xff] }
 0x257   : > { %v1993_v40 = vsel %vm1977_vm5, %v4711_v38, %v1992_v12  ;;  %v3925_v53 = vpack.c.bf16 %v1518_v22, %v1510_v21  ;;  %v1509_v38 = vld [vmem:[%s5365_s28 + $0x2b0] sm:$0xff]  ;;  %v1662_v61 = vld [vmem:[%s5365_s28 + $0x778] sm:$0xff] }
 0x258   : > { %v1517_v12 = vld [vmem:[%s5365_s28 + $0x2f0] sm:$0xff] }
 0x259   : > { %v4713_v34 = vpop.eup %4712 }
 0x25a   : > { %v6533_v5 = vsel %vm1979_vm6, %v4713_v34, %v1993_v40  ;;  %v1534_v40 = vld [vmem:[%s5365_s28 + $0x378] sm:$0xff]  ;;  %v3801_v34 = vpack.c.bf16 %v1532_v28, %v1524_v11 }
 0x25b   : > { %2142 = vmatmul.mubr.f32.vlgmr.msra.gmra.mrb[0].mxu0 %v6533_v5  ;;  %2284 = vmatmul.mubr.f32.vlgmr.msra.gmra.mrb[0].mxu1 %v6533_v5  ;;  %v1606_v11 = vld [vmem:[%s5365_s28 + $0x5b8] sm:$0xff] }
 0x25c   : > { %3780 = vmatpush1.bf16.msra.mxu0 %v3779_v63  ;;  %3908 = vmatpush1.bf16.msra.mxu1 %v3907_v58  ;;  %v3799_v63 = vpack.c.bf16 %v1515_v35, %v1507_v20  ;;  %v3927_v58 = vpack.c.bf16 %v1517_v12, %v1509_v38  ;;  %v3817_v20 = vpack.c.bf16 %v1596_v1, %v1588_v57  ;;  %v1604_v38 = vld [vmem:[%s5365_s28 + $0x5a8] sm:$0xff]  ;;  %v1614_v28 = vld [vmem:[%s5365_s28 + $0x5f8] sm:$0xff] }
 0x25d   : > { %3782 = vmatprep.subr.bf16.mxu0 %v3781_v54  ;;  %3910 = vmatprep.subr.bf16.mxu1 %v3909_v19  ;;  %v3929_v54 = vpack.c.bf16 %v1534_v40, %v1526_v24  ;;  %v1525_v19 = vld [vmem:[%s5365_s28 + $0x330] sm:$0xff]  ;;  %v3945_v35 = vpack.c.bf16 %v1598_v43, %v1590_v14  ;;  %v1612_v12 = vld [vmem:[%s5365_s28 + $0x5e8] sm:$0xff]  ;;  %v3949_v44 = vpack.c.bf16 %v1614_v28, %v1606_v11  ;;  %v1670_v57 = vld [vmem:[%s5365_s28 + $0x7b8] sm:$0xff] }
 0x25e   : > { %2354 = vmatprep.mubr.f32.mxu0 %v7301_v52  ;;  %2496 = vmatprep.mubr.f32.mxu1 %v7301_v52  ;;  %v3821_v25 = vpack.c.bf16 %v1612_v12, %v1604_v38  ;;  %v1678_v1 = vld [vmem:[%s5365_s28 + $0x7f8] sm:$0xff] }
 0x25f   : > { %v1686_v38 = vld [vmem:[%s5365_s28 + $0x838] sm:$0xff] }
 0x260   : > { %3784 = vmatpush1.bf16.msra.mxu0 %v3783_v45  ;;  %3912 = vmatpush1.bf16.msra.mxu1 %v3911_v27  ;;  %v3931_v45 = vpack.c.bf16 %v1533_v9, %v1525_v19  ;;  %v1539_v27 = vld [vmem:[%s5365_s28 + $0x3a0] sm:$0xff]  ;;  %v1620_v19 = vld [vmem:[%s5365_s28 + $0x628] sm:$0xff]  ;;  %v1694_v12 = vld [vmem:[%s5365_s28 + $0x878] sm:$0xff] }
 0x261   : > { %3786 = vmatprep.subr.bf16.mxu0 %v3785_v29  ;;  %3914 = vmatprep.subr.bf16.mxu1 %v3913_v30  ;;  %v3933_v29 = vpack.c.bf16 %v1550_v56, %v1542_v13  ;;  %v1541_v30 = vld [vmem:[%s5365_s28 + $0x3b0] sm:$0xff]  ;;  %v3807_v23 = vpack.c.bf16 %v1547_v4, %v1539_v27  ;;  %v1628_v9 = vld [vmem:[%s5365_s28 + $0x668] sm:$0xff]  ;;  %v3953_v4 = vpack.c.bf16 %v1630_v59, %v1622_v18 }
 0x262   : > { %v3935_v52 = vpack.c.bf16 %v1549_v47, %v1541_v30  ;;  %v3825_v27 = vpack.c.bf16 %v1628_v9, %v1620_v19  ;;  %v1636_v30 = vld [vmem:[%s5365_s28 + $0x6a8] sm:$0xff]  ;;  %v1702_v19 = vld [vmem:[%s5365_s28 + $0x8b8] sm:$0xff] }
 0x263   : > { %v1644_v47 = vld [vmem:[%s5365_s28 + $0x6e8] sm:$0xff]  ;;  %v1710_v9 = vld [vmem:[%s5365_s28 + $0x8f8] sm:$0xff] }
 0x264   : > { %3788 = vmatpush1.bf16.msra.mxu0 %v3787_v49  ;;  %3916 = vmatpush1.bf16.msra.mxu1 %v3915_v31  ;;  %v1555_v49 = vld [vmem:[%s5365_s28 + $0x420] sm:$0xff] }
 0x265   : > { %3790 = vmatprep.subr.bf16.mxu0 %v3789_v7  ;;  %3918 = vmatprep.subr.bf16.mxu1 %v3917_v48  ;;  %v1563_v31 = vld [vmem:[%s5365_s28 + $0x460] sm:$0xff]  ;;  %v1557_v7 = vld [vmem:[%s5365_s28 + $0x430] sm:$0xff] }
 0x266   : > { %v1565_v48 = vld [vmem:[%s5365_s28 + $0x470] sm:$0xff]  ;;  %v3811_v36 = vpack.c.bf16 %v1563_v31, %v1555_v49  ;;  %v3829_v49 = vpack.c.bf16 %v1644_v47, %v1636_v30  ;;  %v3957_v31 = vpack.c.bf16 %v1646_v37, %v1638_v46  ;;  %v1718_v30 = vld [vmem:[%s5365_s28 + $0x938] sm:$0xff] }
 0x267   : > { %v3939_v62 = vpack.c.bf16 %v1565_v48, %v1557_v7  ;;  %v1652_v7 = vld [vmem:[%s5365_s28 + $0x728] sm:$0xff]  ;;  %v1726_v47 = vld [vmem:[%s5365_s28 + $0x978] sm:$0xff] }
 0x268   : > { %3792 = vmatpush1.bf16.msra.mxu0 %v3791_v2  ;;  %3920 = vmatpush1.bf16.msra.mxu1 %v3919_v41  ;;  %v1571_v2 = vld [vmem:[%s5365_s28 + $0x4a0] sm:$0xff]  ;;  %v1660_v48 = vld [vmem:[%s5365_s28 + $0x768] sm:$0xff]  ;;  %v7302_v46 = vld [vmem:[#allocation65_spill] sm:$0xff] }
 0x269   : > { %3794 = vmatprep.subr.bf16.mxu0 %v3793_v8  ;;  %3922 = vmatprep.subr.bf16.mxu1 %v3921_v55  ;;  %v1579_v41 = vld [vmem:[%s5365_s28 + $0x4e0] sm:$0xff]  ;;  %v1573_v8 = vld [vmem:[%s5365_s28 + $0x4b0] sm:$0xff] }
 0x26a   : > { %v1581_v55 = vld [vmem:[%s5365_s28 + $0x4f0] sm:$0xff]  ;;  %v3815_v21 = vpack.c.bf16 %v1579_v41, %v1571_v2  ;;  %v3833_v2 = vpack.c.bf16 %v1660_v48, %v1652_v7  ;;  %v3961_v41 = vpack.c.bf16 %v1662_v61, %v1654_v6  ;;  %v1740_v7 = vld [vmem:[%s5365_s28 + $0x9e8] sm:$0xff]  ;;  %v1734_v48 = vld [vmem:[%s5365_s28 + $0x9b8] sm:$0xff] }
 0x26b   : > { %v3943_v22 = vpack.c.bf16 %v1581_v55, %v1573_v8  ;;  %v1668_v8 = vld [vmem:[%s5365_s28 + $0x7a8] sm:$0xff]  ;;  %v1742_v6 = vld [vmem:[%s5365_s28 + $0x9f8] sm:$0xff] }
 0x26c   : > { %3796 = vmatpush1.bf16.msra.mxu0 %v3795_v15  ;;  %3924 = vmatpush1.bf16.msra.mxu1 %v3923_v26  ;;  %v1587_v15 = vld [vmem:[%s5365_s28 + $0x520] sm:$0xff]  ;;  %v1676_v55 = vld [vmem:[%s5365_s28 + $0x7e8] sm:$0xff] }
 0x26d   : > { %3798 = vmatprep.subr.bf16.mxu0 %v3797_v0  ;;  %3926 = vmatprep.subr.bf16.mxu1 %v3925_v53  ;;  %v1595_v26 = vld [vmem:[%s5365_s28 + $0x560] sm:$0xff]  ;;  %v1589_v0 = vld [vmem:[%s5365_s28 + $0x530] sm:$0xff] }
 0x26e   : > { %v1597_v53 = vld [vmem:[%s5365_s28 + $0x570] sm:$0xff]  ;;  %v3819_v24 = vpack.c.bf16 %v1595_v26, %v1587_v15  ;;  %v3837_v15 = vpack.c.bf16 %v1676_v55, %v1668_v8  ;;  %v3965_v26 = vpack.c.bf16 %v1678_v1, %v1670_v57  ;;  %v1750_v8 = vld [vmem:[%s5365_s28 + $0xa38] sm:$0xff] }
 0x26f   : > { %v3947_v40 = vpack.c.bf16 %v1597_v53, %v1589_v0  ;;  %v1684_v0 = vld [vmem:[%s5365_s28 + $0x828] sm:$0xff]  ;;  %v1758_v55 = vld [vmem:[%s5365_s28 + $0xa78] sm:$0xff] }
 0x270   : > { %3800 = vmatpush1.bf16.msra.mxu0 %v3799_v63  ;;  %3928 = vmatpush1.bf16.msra.mxu1 %v3927_v58  ;;  %v1603_v63 = vld [vmem:[%s5365_s28 + $0x5a0] sm:$0xff]  ;;  %v1692_v53 = vld [vmem:[%s5365_s28 + $0x868] sm:$0xff] }
 0x271   : > { %3802 = vmatprep.subr.bf16.mxu0 %v3801_v34  ;;  %3930 = vmatprep.subr.bf16.mxu1 %v3929_v54  ;;  %v1611_v58 = vld [vmem:[%s5365_s28 + $0x5e0] sm:$0xff]  ;;  %v1605_v34 = vld [vmem:[%s5365_s28 + $0x5b0] sm:$0xff] }
 0x272   : > { %v1613_v54 = vld [vmem:[%s5365_s28 + $0x5f0] sm:$0xff]  ;;  %v3823_v13 = vpack.c.bf16 %v1611_v58, %v1603_v63  ;;  %v3841_v63 = vpack.c.bf16 %v1692_v53, %v1684_v0  ;;  %v3969_v58 = vpack.c.bf16 %v1694_v12, %v1686_v38  ;;  %v1766_v0 = vld [vmem:[%s5365_s28 + $0xab8] sm:$0xff] }
 0x273   : > { %v3951_v56 = vpack.c.bf16 %v1613_v54, %v1605_v34  ;;  %v1700_v34 = vld [vmem:[%s5365_s28 + $0x8a8] sm:$0xff]  ;;  %v1774_v53 = vld [vmem:[%s5365_s28 + $0xaf8] sm:$0xff] }
 0x274   : > { %3804 = vmatpush1.bf16.msra.mxu0 %v3803_v10  ;;  %3932 = vmatpush1.bf16.msra.mxu1 %v3931_v45  ;;  %v1619_v10 = vld [vmem:[%s5365_s28 + $0x620] sm:$0xff]  ;;  %v1708_v54 = vld [vmem:[%s5365_s28 + $0x8e8] sm:$0xff] }
 0x275   : > { %3806 = vmatprep.subr.bf16.mxu0 %v3805_v3  ;;  %3934 = vmatprep.subr.bf16.mxu1 %v3933_v29  ;;  %v1627_v45 = vld [vmem:[%s5365_s28 + $0x660] sm:$0xff]  ;;  %v1621_v3 = vld [vmem:[%s5365_s28 + $0x630] sm:$0xff] }
 0x276   : > { %v1629_v29 = vld [vmem:[%s5365_s28 + $0x670] sm:$0xff]  ;;  %v3827_v16 = vpack.c.bf16 %v1627_v45, %v1619_v10  ;;  %v3845_v10 = vpack.c.bf16 %v1708_v54, %v1700_v34  ;;  %v3973_v45 = vpack.c.bf16 %v1710_v9, %v1702_v19  ;;  %v1782_v34 = vld [vmem:[%s5365_s28 + $0xb38] sm:$0xff] }
 0x277   : > { %v3955_v51 = vpack.c.bf16 %v1629_v29, %v1621_v3  ;;  %v1716_v3 = vld [vmem:[%s5365_s28 + $0x928] sm:$0xff]  ;;  %v1790_v54 = vld [vmem:[%s5365_s28 + $0xb78] sm:$0xff] }
 0x278   : > { %3808 = vmatpush1.bf16.msra.mxu0 %v3807_v23  ;;  %3936 = vmatpush1.bf16.msra.mxu1 %v3935_v52  ;;  %v1635_v23 = vld [vmem:[%s5365_s28 + $0x6a0] sm:$0xff]  ;;  %v1724_v29 = vld [vmem:[%s5365_s28 + $0x968] sm:$0xff] }
 0x279   : > { %3810 = vmatprep.subr.bf16.mxu0 %v3809_v42  ;;  %3938 = vmatprep.subr.bf16.mxu1 %v3937_v32  ;;  %v1643_v52 = vld [vmem:[%s5365_s28 + $0x6e0] sm:$0xff]  ;;  %v1637_v42 = vld [vmem:[%s5365_s28 + $0x6b0] sm:$0xff] }
 0x27a   : > { %v1645_v32 = vld [vmem:[%s5365_s28 + $0x6f0] sm:$0xff]  ;;  %v3831_v50 = vpack.c.bf16 %v1643_v52, %v1635_v23  ;;  %v1723_v23 = vld [vmem:[%s5365_s28 + $0x960] sm:$0xff]  ;;  %v3849_v52 = vpack.c.bf16 %v1724_v29, %v1716_v3  ;;  %v1798_v3 = vld [vmem:[%s5365_s28 + $0xbb8] sm:$0xff] }
 0x27b   : > { %v3959_v33 = vpack.c.bf16 %v1645_v32, %v1637_v42  ;;  %v1725_v42 = vld [vmem:[%s5365_s28 + $0x970] sm:$0xff]  ;;  %v1732_v32 = vld [vmem:[%s5365_s28 + $0x9a8] sm:$0xff]  ;;  %v1806_v29 = vld [vmem:[%s5365_s28 + $0xbf8] sm:$0xff] }
 0x27c   : > { %3812 = vmatpush1.bf16.msra.mxu0 %v3811_v36  ;;  %3940 = vmatpush1.bf16.msra.mxu1 %v3939_v62  ;;  %v1651_v36 = vld [vmem:[%s5365_s28 + $0x720] sm:$0xff] }
 0x27d   : > { %3814 = vmatprep.subr.bf16.mxu0 %v3813_v39  ;;  %3942 = vmatprep.subr.bf16.mxu1 %v3941_v60  ;;  %v1659_v62 = vld [vmem:[%s5365_s28 + $0x760] sm:$0xff]  ;;  %v1653_v39 = vld [vmem:[%s5365_s28 + $0x730] sm:$0xff] }
 0x27e   : > { %v1661_v60 = vld [vmem:[%s5365_s28 + $0x770] sm:$0xff]  ;;  %v3835_v14 = vpack.c.bf16 %v1659_v62, %v1651_v36  ;;  %v1739_v36 = vld [vmem:[%s5365_s28 + $0x9e0] sm:$0xff]  ;;  %v3853_v62 = vpack.c.bf16 %v1740_v7, %v1732_v32  ;;  %v1822_v32 = vld [vmem:[%s5365_s28 + $0xc78] sm:$0xff] }
 0x27f   : > { %v3963_v43 = vpack.c.bf16 %v1661_v60, %v1653_v39  ;;  %v1741_v39 = vld [vmem:[%s5365_s28 + $0x9f0] sm:$0xff]  ;;  %v1748_v60 = vld [vmem:[%s5365_s28 + $0xa28] sm:$0xff] }
 0x280   : > { %3816 = vmatpush1.bf16.msra.mxu0 %v3815_v21  ;;  %3944 = vmatpush1.bf16.msra.mxu1 %v3943_v22  ;;  %v1667_v21 = vld [vmem:[%s5365_s28 + $0x7a0] sm:$0xff] }
 0x281   : > { %3818 = vmatprep.subr.bf16.mxu0 %v3817_v20  ;;  %3946 = vmatprep.subr.bf16.mxu1 %v3945_v35  ;;  %v1675_v22 = vld [vmem:[%s5365_s28 + $0x7e0] sm:$0xff]  ;;  %v1669_v20 = vld [vmem:[%s5365_s28 + $0x7b0] sm:$0xff] }
 0x282   : > { %v1677_v35 = vld [vmem:[%s5365_s28 + $0x7f0] sm:$0xff]  ;;  %v3839_v11 = vpack.c.bf16 %v1675_v22, %v1667_v21  ;;  %v3985_v22 = vpack.c.bf16 %v1758_v55, %v1750_v8  ;;  %v1827_v55 = vld [vmem:[%s5365_s28 + $0xca0] sm:$0xff] }
 0x283   : > { %v3967_v28 = vpack.c.bf16 %v1677_v35, %v1669_v20  ;;  %v1764_v20 = vld [vmem:[%s5365_s28 + $0xaa8] sm:$0xff] }
 0x284   : > { %3820 = vmatpush1.bf16.msra.mxu0 %v3819_v24  ;;  %3948 = vmatpush1.bf16.msra.mxu1 %v3947_v40  ;;  %v1683_v24 = vld [vmem:[%s5365_s28 + $0x820] sm:$0xff]  ;;  %v1772_v35 = vld [vmem:[%s5365_s28 + $0xae8] sm:$0xff] }
 0x285   : > { %3822 = vmatprep.subr.bf16.mxu0 %v3821_v25  ;;  %3950 = vmatprep.subr.bf16.mxu1 %v3949_v44  ;;  %v1691_v40 = vld [vmem:[%s5365_s28 + $0x860] sm:$0xff]  ;;  %v1685_v25 = vld [vmem:[%s5365_s28 + $0x830] sm:$0xff] }
 0x286   : > { %v1693_v44 = vld [vmem:[%s5365_s28 + $0x870] sm:$0xff]  ;;  %v3843_v18 = vpack.c.bf16 %v1691_v40, %v1683_v24  ;;  %v3861_v24 = vpack.c.bf16 %v1772_v35, %v1764_v20  ;;  %v3989_v40 = vpack.c.bf16 %v1774_v53, %v1766_v0  ;;  %v1854_v20 = vld [vmem:[%s5365_s28 + $0xd78] sm:$0xff]  ;;  %v1843_v53 = vld [vmem:[%s5365_s28 + $0xd20] sm:$0xff] }
 0x287   : > { %v3971_v59 = vpack.c.bf16 %v1693_v44, %v1685_v25  ;;  %v1780_v25 = vld [vmem:[%s5365_s28 + $0xb28] sm:$0xff] }
 0x288   : > { %3824 = vmatpush1.bf16.msra.mxu0 %v3823_v13  ;;  %3952 = vmatpush1.bf16.msra.mxu1 %v3951_v56  ;;  %v1699_v13 = vld [vmem:[%s5365_s28 + $0x8a0] sm:$0xff]  ;;  %v1788_v44 = vld [vmem:[%s5365_s28 + $0xb68] sm:$0xff] }
 0x289   : > { %3826 = vmatprep.subr.bf16.mxu0 %v3825_v27  ;;  %3954 = vmatprep.subr.bf16.mxu1 %v3953_v4  ;;  %v1707_v56 = vld [vmem:[%s5365_s28 + $0x8e0] sm:$0xff]  ;;  %v1701_v27 = vld [vmem:[%s5365_s28 + $0x8b0] sm:$0xff] }
 0x28a   : > { %v1709_v4 = vld [vmem:[%s5365_s28 + $0x8f0] sm:$0xff]  ;;  %v3847_v37 = vpack.c.bf16 %v1707_v56, %v1699_v13  ;;  %v3865_v13 = vpack.c.bf16 %v1788_v44, %v1780_v25  ;;  %v3993_v56 = vpack.c.bf16 %v1790_v54, %v1782_v34  ;;  %v1870_v25 = vld [vmem:[%s5365_s28 + $0xdf8] sm:$0xff]  ;;  %v1859_v54 = vld [vmem:[%s5365_s28 + $0xda0] sm:$0xff] }
 0x28c   : > { %3828 = vmatpush1.bf16.msra.mxu0 %v3827_v16  ;;  %3956 = vmatpush1.bf16.msra.mxu1 %v3955_v51  ;;  %v3975_v16 = vpack.c.bf16 %v1709_v4, %v1701_v27  ;;  %v1715_v51 = vld [vmem:[%s5365_s28 + $0x920] sm:$0xff]  ;;  %v1796_v27 = vld [vmem:[%s5365_s28 + $0xba8] sm:$0xff] }
 0x28d   : > { %3830 = vmatprep.subr.bf16.mxu0 %v3829_v49  ;;  %3958 = vmatprep.subr.bf16.mxu1 %v3957_v31  ;;  %v3977_v49 = vpack.c.bf16 %v1726_v47, %v1718_v30  ;;  %v1717_v31 = vld [vmem:[%s5365_s28 + $0x930] sm:$0xff]  ;;  %v3851_v61 = vpack.c.bf16 %v1723_v23, %v1715_v51  ;;  %v1804_v4 = vld [vmem:[%s5365_s28 + $0xbe8] sm:$0xff]  ;;  %v3997_v51 = vpack.c.bf16 %v1806_v29, %v1798_v3  ;;  %v1875_v29 = vld [vmem:[%s5365_s28 + $0xe20] sm:$0xff] }
 0x28e   : > { %v1797_v23 = vld [vmem:[%s5365_s28 + $0xbb0] sm:$0xff] }
 0x290   : > { %3832 = vmatpush1.bf16.msra.mxu0 %v3831_v50  ;;  %3960 = vmatpush1.bf16.msra.mxu1 %v3959_v33  ;;  %v3979_v50 = vpack.c.bf16 %v1725_v42, %v1717_v31  ;;  %v1731_v33 = vld [vmem:[%s5365_s28 + $0x9a0] sm:$0xff]  ;;  %v1820_v31 = vld [vmem:[%s5365_s28 + $0xc68] sm:$0xff]  ;;  %v1814_v42 = vld [vmem:[%s5365_s28 + $0xc38] sm:$0xff] }
 0x291   : > { %3834 = vmatprep.subr.bf16.mxu0 %v3833_v2  ;;  %3962 = vmatprep.subr.bf16.mxu1 %v3961_v41  ;;  %v3981_v2 = vpack.c.bf16 %v1742_v6, %v1734_v48  ;;  %v1733_v41 = vld [vmem:[%s5365_s28 + $0x9b0] sm:$0xff]  ;;  %v3855_v57 = vpack.c.bf16 %v1739_v36, %v1731_v33  ;;  %v1811_v6 = vld [vmem:[%s5365_s28 + $0xc20] sm:$0xff]  ;;  %v4001_v33 = vpack.c.bf16 %v1822_v32, %v1814_v42 }
 0x292   : > { %v3983_v1 = vpack.c.bf16 %v1741_v39, %v1733_v41  ;;  %v1813_v36 = vld [vmem:[%s5365_s28 + $0xc30] sm:$0xff]  ;;  %v1836_v41 = vld [vmem:[%s5365_s28 + $0xce8] sm:$0xff]  ;;  %v1830_v39 = vld [vmem:[%s5365_s28 + $0xcb8] sm:$0xff] }
 0x293   : > { %v1891_v32 = vld [vmem:[%s5365_s28 + $0xea0] sm:$0xff] }
 0x294   : > { %3836 = vmatpush1.bf16.msra.mxu0 %v3835_v14  ;;  %3964 = vmatpush1.bf16.msra.mxu1 %v3963_v43  ;;  %v1747_v14 = vld [vmem:[%s5365_s28 + $0xa20] sm:$0xff] }
 0x295   : > { %3838 = vmatprep.subr.bf16.mxu0 %v3837_v15  ;;  %3966 = vmatprep.subr.bf16.mxu1 %v3965_v26  ;;  %v1755_v43 = vld [vmem:[%s5365_s28 + $0xa60] sm:$0xff]  ;;  %v1749_v15 = vld [vmem:[%s5365_s28 + $0xa30] sm:$0xff] }
 0x296   : > { %v1757_v26 = vld [vmem:[%s5365_s28 + $0xa70] sm:$0xff]  ;;  %v3859_v38 = vpack.c.bf16 %v1755_v43, %v1747_v14 }
 0x297   : > { %v3987_v12 = vpack.c.bf16 %v1757_v26, %v1749_v15  ;;  %v1829_v43 = vld [vmem:[%s5365_s28 + $0xcb0] sm:$0xff]  ;;  %v1852_v15 = vld [vmem:[%s5365_s28 + $0xd68] sm:$0xff]  ;;  %v1846_v26 = vld [vmem:[%s5365_s28 + $0xd38] sm:$0xff] }
 0x298   : > { %3840 = vmatpush1.bf16.msra.mxu0 %v3839_v11  ;;  %3968 = vmatpush1.bf16.msra.mxu1 %v3967_v28  ;;  %v1763_v11 = vld [vmem:[%s5365_s28 + $0xaa0] sm:$0xff] }
 0x299   : > { %3842 = vmatprep.subr.bf16.mxu0 %v3841_v63  ;;  %3970 = vmatprep.subr.bf16.mxu1 %v3969_v58  ;;  %v1771_v28 = vld [vmem:[%s5365_s28 + $0xae0] sm:$0xff]  ;;  %v1765_v63 = vld [vmem:[%s5365_s28 + $0xab0] sm:$0xff] }
 0x29a   : > { %v1773_v58 = vld [vmem:[%s5365_s28 + $0xaf0] sm:$0xff]  ;;  %v3863_v19 = vpack.c.bf16 %v1771_v28, %v1763_v11  ;;  %v4009_v11 = vpack.c.bf16 %v1854_v20, %v1846_v26  ;;  %v1923_v20 = vld [vmem:[%s5365_s28 + $0xfa0] sm:$0xff] }
 0x29b   : > { %2355 = vmatmul.mubr.f32.vlgmr.msra.gmra.mrb[2].mxu0 %v7302_v46  ;;  %2497 = vmatmul.mubr.f32.vlgmr.msra.gmra.mrb[2].mxu1 %v7302_v46  ;;  %v3991_v9 = vpack.c.bf16 %v1773_v58, %v1765_v63  ;;  %v1795_v46 = vld [vmem:[%s5365_s28 + $0xba0] sm:$0xff]  ;;  %v1845_v28 = vld [vmem:[%s5365_s28 + $0xd30] sm:$0xff]  ;;  %v1868_v63 = vld [vmem:[%s5365_s28 + $0xde8] sm:$0xff] }
 0x29c   : > { %3844 = vmatpush1.bf16.msra.mxu0 %v3843_v18  ;;  %3972 = vmatpush1.bf16.msra.mxu1 %v3971_v59  ;;  %v1779_v18 = vld [vmem:[%s5365_s28 + $0xb20] sm:$0xff]  ;;  %v1862_v58 = vld [vmem:[%s5365_s28 + $0xdb8] sm:$0xff] }
 0x29d   : > { %3846 = vmatprep.subr.bf16.mxu0 %v3845_v10  ;;  %3974 = vmatprep.subr.bf16.mxu1 %v3973_v45  ;;  %v1787_v59 = vld [vmem:[%s5365_s28 + $0xb60] sm:$0xff]  ;;  %v1781_v10 = vld [vmem:[%s5365_s28 + $0xb30] sm:$0xff] }
 0x29e   : > { %2425 = vmatprep.mubr.f32.mxu0 %v6501_v17  ;;  %2567 = vmatprep.mubr.f32.mxu1 %v6501_v17  ;;  %v1756_v17 = vld [vmem:[%s5365_s28 + $0xa68] sm:$0xff]  ;;  %v1789_v45 = vld [vmem:[%s5365_s28 + $0xb70] sm:$0xff]  ;;  %v3867_v30 = vpack.c.bf16 %v1787_v59, %v1779_v18  ;;  %v4013_v18 = vpack.c.bf16 %v1870_v25, %v1862_v58  ;;  %v1418_v58 = vld [vmem:[#allocation2 + $0x18] sm:$0xff] }
 0x29f   : > { %v3857_v21 = vpack.c.bf16 %v1756_v17, %v1748_v60  ;;  %v3995_v47 = vpack.c.bf16 %v1789_v45, %v1781_v10  ;;  %v1838_v60 = vld [vmem:[%s5365_s28 + $0xcf8] sm:$0xff]  ;;  %v1861_v59 = vld [vmem:[%s5365_s28 + $0xdb0] sm:$0xff]  ;;  %v1884_v10 = vld [vmem:[%s5365_s28 + $0xe68] sm:$0xff] }
 0x2a0   : > { %3848 = vmatpush1.bf16.msra.mxu0 %v3847_v37  ;;  %3976 = vmatpush1.bf16.msra.mxu1 %v3975_v16  ;;  %v1803_v37 = vld [vmem:[%s5365_s28 + $0xbe0] sm:$0xff]  ;;  %v3869_v16 = vpack.c.bf16 %v1804_v4, %v1796_v27  ;;  %v4005_v14 = vpack.c.bf16 %v1838_v60, %v1830_v39  ;;  %v1878_v45 = vld [vmem:[%s5365_s28 + $0xe38] sm:$0xff] }
 0x2a1   : > { %3850 = vmatprep.subr.bf16.mxu0 %v3849_v52  ;;  %3978 = vmatprep.subr.bf16.mxu1 %v3977_v49  ;;  %v1805_v52 = vld [vmem:[%s5365_s28 + $0xbf0] sm:$0xff]  ;;  %v1812_v49 = vld [vmem:[%s5365_s28 + $0xc28] sm:$0xff]  ;;  %v3871_v7 = vpack.c.bf16 %v1803_v37, %v1795_v46  ;;  %v1886_v27 = vld [vmem:[%s5365_s28 + $0xe78] sm:$0xff] }
 0x2a2   : > { %v3999_v48 = vpack.c.bf16 %v1805_v52, %v1797_v23  ;;  %v4017_v46 = vpack.c.bf16 %v1886_v27, %v1878_v45  ;;  %v1877_v37 = vld [vmem:[%s5365_s28 + $0xe30] sm:$0xff]  ;;  %v1900_v23 = vld [vmem:[%s5365_s28 + $0xee8] sm:$0xff]  ;;  %v1894_v52 = vld [vmem:[%s5365_s28 + $0xeb8] sm:$0xff] }
 0x2a3   : > { %v1907_v60 = vld [vmem:[%s5365_s28 + $0xf20] sm:$0xff] }
 0x2a4   : > { %3852 = vmatpush1.bf16.msra.mxu0 %v3851_v61  ;;  %3980 = vmatpush1.bf16.msra.mxu1 %v3979_v50  ;;  %v1819_v61 = vld [vmem:[%s5365_s28 + $0xc60] sm:$0xff]  ;;  %v3873_v50 = vpack.c.bf16 %v1820_v31, %v1812_v49  ;;  %v1902_v49 = vld [vmem:[%s5365_s28 + $0xef8] sm:$0xff] }
 0x2a5   : > { %3854 = vmatprep.subr.bf16.mxu0 %v3853_v62  ;;  %3982 = vmatprep.subr.bf16.mxu1 %v3981_v2  ;;  %v1821_v62 = vld [vmem:[%s5365_s28 + $0xc70] sm:$0xff]  ;;  %v1828_v2 = vld [vmem:[%s5365_s28 + $0xca8] sm:$0xff]  ;;  %v3875_v17 = vpack.c.bf16 %v1819_v61, %v1811_v6  ;;  %v4021_v6 = vpack.c.bf16 %v1902_v49, %v1894_v52  ;;  %v3017_v52 = vld [vmem:[#allocation11 + $0x210] sm:$0xff] (!%p3513_p7) }
 0x2a6   : > { %v4003_v8 = vpack.c.bf16 %v1821_v62, %v1813_v36  ;;  %v1893_v61 = vld [vmem:[%s5365_s28 + $0xeb0] sm:$0xff]  ;;  %v1916_v36 = vld [vmem:[%s5365_s28 + $0xf68] sm:$0xff]  ;;  %v1910_v62 = vld [vmem:[%s5365_s28 + $0xf38] sm:$0xff] }
 0x2a7   : > { %v3020_v49 = vld [vmem:[#allocation11 + $0x228] sm:$0xff] (!%p3513_p7) }
 0x2a8   : > { %3856 = vmatpush1.bf16.msra.mxu0 %v3855_v57  ;;  %3984 = vmatpush1.bf16.msra.mxu1 %v3983_v1  ;;  %v1835_v57 = vld [vmem:[%s5365_s28 + $0xce0] sm:$0xff]  ;;  %v3877_v1 = vpack.c.bf16 %v1836_v41, %v1828_v2  ;;  %v1918_v2 = vld [vmem:[%s5365_s28 + $0xf78] sm:$0xff] }
 0x2a9   : > { %3858 = vmatprep.subr.bf16.mxu0 %v3857_v21  ;;  %3986 = vmatprep.subr.bf16.mxu1 %v3985_v22  ;;  %v1837_v21 = vld [vmem:[%s5365_s28 + $0xcf0] sm:$0xff]  ;;  %v1844_v22 = vld [vmem:[%s5365_s28 + $0xd28] sm:$0xff]  ;;  %v3879_v35 = vpack.c.bf16 %v1835_v57, %v1827_v55  ;;  %v4025_v55 = vpack.c.bf16 %v1918_v2, %v1910_v62  ;;  %v3025_v62 = vld [vmem:[#allocation11 + $0x250] sm:$0xff] (!%p3513_p7) }
 0x2aa   : > { %v4007_v0 = vpack.c.bf16 %v1837_v21, %v1829_v43  ;;  %v1909_v57 = vld [vmem:[%s5365_s28 + $0xf30] sm:$0xff]  ;;  %v1932_v43 = vld [vmem:[%s5365_s28 + $0xfe8] sm:$0xff]  ;;  %v1926_v21 = vld [vmem:[%s5365_s28 + $0xfb8] sm:$0xff] }
 0x2ab   : > { %v3028_v2 = vld [vmem:[#allocation11 + $0x268] sm:$0xff] (!%p3513_p7) }
 0x2ac   : > { %3860 = vmatpush1.bf16.msra.mxu0 %v3859_v38  ;;  %3988 = vmatpush1.bf16.msra.mxu1 %v3987_v12  ;;  %v1851_v38 = vld [vmem:[%s5365_s28 + $0xd60] sm:$0xff]  ;;  %v3881_v12 = vpack.c.bf16 %v1852_v15, %v1844_v22  ;;  %v1934_v22 = vld [vmem:[%s5365_s28 + $0xff8] sm:$0xff] }
 0x2ad   : > { %3862 = vmatprep.subr.bf16.mxu0 %v3861_v24  ;;  %3990 = vmatprep.subr.bf16.mxu1 %v3989_v40  ;;  %v1853_v24 = vld [vmem:[%s5365_s28 + $0xd70] sm:$0xff]  ;;  %v1860_v40 = vld [vmem:[%s5365_s28 + $0xda8] sm:$0xff]  ;;  %v3883_v44 = vpack.c.bf16 %v1851_v38, %v1843_v53  ;;  %v1931_v53 = vld [vmem:[%s5365_s28 + $0xfe0] sm:$0xff] }
 0x2ae   : > { %v4011_v34 = vpack.c.bf16 %v1853_v24, %v1845_v28  ;;  %v1925_v38 = vld [vmem:[%s5365_s28 + $0xfb0] sm:$0xff]  ;;  %v1415_v24 = vld [vmem:[#allocation2] sm:$0xff] }
 0x2b0   : > { %3864 = vmatpush1.bf16.msra.mxu0 %v3863_v19  ;;  %3992 = vmatpush1.bf16.msra.mxu1 %v3991_v9  ;;  %v1867_v19 = vld [vmem:[%s5365_s28 + $0xde0] sm:$0xff]  ;;  %v3885_v9 = vpack.c.bf16 %v1868_v63, %v1860_v40  ;;  %v1417_v40 = vld [vmem:[#allocation2 + $0x10] sm:$0xff]  ;;  %v1416_v63 = vld [vmem:[#allocation2 + $0x8] sm:$0xff] }
 0x2b1   : > { %3866 = vmatprep.subr.bf16.mxu0 %v3865_v13  ;;  %3994 = vmatprep.subr.bf16.mxu1 %v3993_v56  ;;  %v1869_v13 = vld [vmem:[%s5365_s28 + $0xdf0] sm:$0xff]  ;;  %v1876_v56 = vld [vmem:[%s5365_s28 + $0xe28] sm:$0xff]  ;;  %v3887_v4 = vpack.c.bf16 %v1867_v19, %v1859_v54 }
 0x2b2   : > { %v4015_v3 = vpack.c.bf16 %v1869_v13, %v1861_v59  ;;  %v1419_v13 = vld [vmem:[#allocation2 + $0x20] sm:$0xff] }
 0x2b4   : > { %3868 = vmatpush1.bf16.msra.mxu0 %v3867_v30  ;;  %3996 = vmatpush1.bf16.msra.mxu1 %v3995_v47  ;;  %v1883_v30 = vld [vmem:[%s5365_s28 + $0xe60] sm:$0xff]  ;;  %v3889_v47 = vpack.c.bf16 %v1884_v10, %v1876_v56  ;;  %v1421_v56 = vld [vmem:[#allocation2 + $0x30] sm:$0xff]  ;;  %v1420_v10 = vld [vmem:[#allocation2 + $0x28] sm:$0xff] }
 0x2b5   : > { %3870 = vmatprep.subr.bf16.mxu0 %v3869_v16  ;;  %3998 = vmatprep.subr.bf16.mxu1 %v3997_v51  ;;  %v1885_v16 = vld [vmem:[%s5365_s28 + $0xe70] sm:$0xff]  ;;  %v1892_v51 = vld [vmem:[%s5365_s28 + $0xea8] sm:$0xff]  ;;  %v3891_v31 = vpack.c.bf16 %v1883_v30, %v1875_v29 }
 0x2b6   : > { %v4019_v42 = vpack.c.bf16 %v1885_v16, %v1877_v37  ;;  %v3016_v37 = vld [vmem:[#allocation11 + $0x208] sm:$0xff] (!%p3513_p7)  ;;  %v3018_v16 = vld [vmem:[#allocation11 + $0x218] sm:$0xff] (!%p3513_p7) }
 0x2b8   : > { %3872 = vmatpush1.bf16.msra.mxu0 %v3871_v7  ;;  %4000 = vmatpush1.bf16.msra.mxu1 %v3999_v48  ;;  %v1899_v7 = vld [vmem:[%s5365_s28 + $0xee0] sm:$0xff]  ;;  %v3893_v48 = vpack.c.bf16 %v1900_v23, %v1892_v51  ;;  %v3015_v51 = vld [vmem:[#allocation11 + $0x200] sm:$0xff] (!%p3513_p7)  ;;  %v4097_v23 = vpack.c.bf16 (!%p3513_p7), %v3018_v16, %v3016_v37  ;;  %v3050_v37 = vld [vmem:[#allocation11 + $0x318] sm:$0xff] (!%p3513_p7) }
 0x2b9   : > { %3874 = vmatprep.subr.bf16.mxu0 %v3873_v50  ;;  %4002 = vmatprep.subr.bf16.mxu1 %v4001_v33  ;;  %v1901_v50 = vld [vmem:[%s5365_s28 + $0xef0] sm:$0xff]  ;;  %v1908_v33 = vld [vmem:[%s5365_s28 + $0xf28] sm:$0xff]  ;;  %v3895_v41 = vpack.c.bf16 %v1899_v7, %v1891_v32 }
 0x2ba   : > { %v4023_v39 = vpack.c.bf16 %v1901_v50, %v1893_v61  ;;  %v3019_v7 = vld [vmem:[#allocation11 + $0x220] sm:$0xff] (!%p3513_p7)  ;;  %v3026_v61 = vld [vmem:[#allocation11 + $0x258] sm:$0xff] (!%p3513_p7) }
 0x2bb   : > { %v3047_v16 = vld [vmem:[#allocation11 + $0x300] sm:$0xff] (!%p3513_p7) }
 0x2bc   : > { %3876 = vmatpush1.bf16.msra.mxu0 %v3875_v17  ;;  %4004 = vmatpush1.bf16.msra.mxu1 %v4003_v8  ;;  %v1915_v17 = vld [vmem:[%s5365_s28 + $0xf60] sm:$0xff]  ;;  %v3897_v8 = vpack.c.bf16 %v1916_v36, %v1908_v33  ;;  %v3023_v36 = vld [vmem:[#allocation11 + $0x240] sm:$0xff] (!%p3513_p7) }
 0x2bd   : > { %3878 = vmatprep.subr.bf16.mxu0 %v3877_v1  ;;  %4006 = vmatprep.subr.bf16.mxu1 %v4005_v14  ;;  %v1917_v1 = vld [vmem:[%s5365_s28 + $0xf70] sm:$0xff]  ;;  %v1924_v14 = vld [vmem:[%s5365_s28 + $0xfa8] sm:$0xff]  ;;  %v3899_v15 = vpack.c.bf16 %v1915_v17, %v1907_v60 }
 0x2be   : > { %v4027_v26 = vpack.c.bf16 %v1917_v1, %v1909_v57  ;;  %v3027_v17 = vld [vmem:[#allocation11 + $0x260] sm:$0xff] (!%p3513_p7)  ;;  %v3034_v57 = vld [vmem:[#allocation11 + $0x298] sm:$0xff] (!%p3513_p7) }
 0x2c0   : > { %3880 = vmatpush1.bf16.msra.mxu0 %v3879_v35  ;;  %4008 = vmatpush1.bf16.msra.mxu1 %v4007_v0  ;;  %v3901_v35 = vpack.c.bf16 %v1932_v43, %v1924_v14  ;;  %v4029_v0 = vpack.c.bf16 %v1934_v22, %v1926_v21  ;;  %v3031_v43 = vld [vmem:[#allocation11 + $0x280] sm:$0xff] (!%p3513_p7)  ;;  %v3033_v21 = vld [vmem:[#allocation11 + $0x290] sm:$0xff] (!%p3513_p7)  ;;  %v3036_v22 = vld [vmem:[#allocation11 + $0x2a8] sm:$0xff] (!%p3513_p7) }
 0x2c1   : > { %3882 = vmatprep.subr.bf16.mxu0 %v3881_v12  ;;  %4010 = vmatprep.subr.bf16.mxu1 %v4009_v11  ;;  %v1933_v12 = vld [vmem:[%s5365_s28 + $0xff0] sm:$0xff]  ;;  %v3903_v11 = vpack.c.bf16 %v1931_v53, %v1923_v20  ;;  %v3040_v53 = vld [vmem:[#allocation11 + $0x2c8] sm:$0xff] (!%p3513_p7) }
 0x2c2   : > { %v4031_v28 = vpack.c.bf16 %v1933_v12, %v1925_v38  ;;  %v3042_v38 = vld [vmem:[#allocation11 + $0x2d8] sm:$0xff] (!%p3513_p7) }
 0x2c4   : > { %3884 = vmatpush1.bf16.msra.mxu0 %v3883_v44  ;;  %4012 = vmatpush1.bf16.msra.mxu1 %v4011_v34 }
 0x2c5   : > { %3886 = vmatprep.subr.bf16.mxu0 %v3885_v9  ;;  %4014 = vmatprep.subr.bf16.mxu1 %v4013_v18 }
 0x2c8   : > { %3888 = vmatpush1.bf16.msra.mxu0 %v3887_v4  ;;  %4016 = vmatpush1.bf16.msra.mxu1 %v4015_v3 }
 0x2c9   : > { %3890 = vmatprep.subr.bf16.mxu0 %v3889_v47  ;;  %4018 = vmatprep.subr.bf16.mxu1 %v4017_v46 }
 0x2cc   : > { %3892 = vmatpush1.bf16.msra.mxu0 %v3891_v31  ;;  %4020 = vmatpush1.bf16.msra.mxu1 %v4019_v42  ;;  %v3022_v31 = vld [vmem:[#allocation11 + $0x238] sm:$0xff] (!%p3513_p7)  ;;  %v4099_v42 = vpack.c.bf16 (!%p3513_p7), %v3017_v52, %v3015_v51  ;;  %v3049_v52 = vld [vmem:[#allocation11 + $0x310] sm:$0xff] (!%p3513_p7) }
 0x2cd   : > { %3894 = vmatprep.subr.bf16.mxu0 %v3893_v48  ;;  %4022 = vmatprep.subr.bf16.mxu1 %v4021_v6  ;;  %v4101_v32 = vpack.c.bf16 (!%p3513_p7), %v3022_v31, %v3020_v49  ;;  %v3021_v48 = vld [vmem:[#allocation11 + $0x230] sm:$0xff] (!%p3513_p7)  ;;  %v3024_v6 = vld [vmem:[#allocation11 + $0x248] sm:$0xff] (!%p3513_p7) }
 0x2ce   : > { %v4103_v50 = vpack.c.bf16 (!%p3513_p7), %v3021_v48, %v3019_v7  ;;  %v4105_v33 = vpack.c.bf16 (!%p3513_p7), %v3026_v61, %v3024_v6  ;;  %v2957_v7 = vld [vmem:[#allocation11 + $0x30] sm:$0xff] (!%p3513_p7)  ;;  %v3052_v6 = vld [vmem:[#allocation11 + $0x328] sm:$0xff] (!%p3513_p7) }
 0x2d0   : > { %3896 = vmatpush1.bf16.msra.mxu0 %v3895_v41  ;;  %4024 = vmatpush1.bf16.msra.mxu1 %v4023_v39  ;;  %v3030_v41 = vld [vmem:[#allocation11 + $0x278] sm:$0xff] (!%p3513_p7)  ;;  %v4107_v39 = vpack.c.bf16 (!%p3513_p7), %v3025_v62, %v3023_v36 }
 0x2d1   : > { %3898 = vmatprep.subr.bf16.mxu0 %v3897_v8  ;;  %4026 = vmatprep.subr.bf16.mxu1 %v4025_v55  ;;  %v4109_v60 = vpack.c.bf16 (!%p3513_p7), %v3030_v41, %v3028_v2  ;;  %v3029_v8 = vld [vmem:[#allocation11 + $0x270] sm:$0xff] (!%p3513_p7)  ;;  %v3032_v55 = vld [vmem:[#allocation11 + $0x288] sm:$0xff] (!%p3513_p7)  ;;  %v2962_v36 = vld [vmem:[#allocation11 + $0x58] sm:$0xff] (!%p3513_p7) }
 0x2d2   : > { %v4111_v1 = vpack.c.bf16 (!%p3513_p7), %v3029_v8, %v3027_v17  ;;  %v4113_v14 = vpack.c.bf16 (!%p3513_p7), %v3034_v57, %v3032_v55  ;;  %v3054_v2 = vld [vmem:[#allocation11 + $0x338] sm:$0xff] (!%p3513_p7)  ;;  %v2961_v17 = vld [vmem:[#allocation11 + $0x50] sm:$0xff] (!%p3513_p7) }
 0x2d4   : > { %3900 = vmatpush1.bf16.msra.mxu0 %v3899_v15  ;;  %4028 = vmatpush1.bf16.msra.mxu1 %v4027_v26  ;;  %v3038_v15 = vld [vmem:[#allocation11 + $0x2b8] sm:$0xff] (!%p3513_p7)  ;;  %v4115_v26 = vpack.c.bf16 (!%p3513_p7), %v3033_v21, %v3031_v43 }
 0x2d5   : > { %3902 = vmatprep.subr.bf16.mxu0 %v3901_v35  ;;  %4030 = vmatprep.subr.bf16.mxu1 %v4029_v0  ;;  %v4117_v20 = vpack.c.bf16 (!%p3513_p7), %v3038_v15, %v3036_v22  ;;  %v3035_v35 = vld [vmem:[#allocation11 + $0x2a0] sm:$0xff] (!%p3513_p7)  ;;  %v3037_v0 = vld [vmem:[#allocation11 + $0x2b0] sm:$0xff] (!%p3513_p7)  ;;  %v2966_v15 = vld [vmem:[#allocation11 + $0x78] sm:$0xff] (!%p3513_p7) }
 0x2d6   : > { %v4119_v12 = vpack.c.bf16 (!%p3513_p7), %v3037_v0, %v3035_v35  ;;  %v3053_v35 = vld [vmem:[#allocation11 + $0x330] sm:$0xff] (!%p3513_p7)  ;;  %v3056_v0 = vld [vmem:[#allocation11 + $0x348] sm:$0xff] (!%p3513_p7) }
 0x2d8   : > { %3904 = vmatpush1.bf16.msra.mxu0 %v3903_v11  ;;  %4032 = vmatpush1.bf16.msra.mxu1 %v4031_v28  ;;  %v3039_v11 = vld [vmem:[#allocation11 + $0x2c0] sm:$0xff] (!%p3513_p7)  ;;  %v3041_v28 = vld [vmem:[#allocation11 + $0x2d0] sm:$0xff] (!%p3513_p7) }
 0x2d9   : > { %4098 = vmatprep.subr.bf16.mxu0 (!%p3513_p7), %v4097_v23 }
 0x2db   : > { %2426 = vmatmul.mubr.f32.vlgmr.msra.gmra.mrb[2].mxu0 %v6533_v5  ;;  %2568 = vmatmul.mubr.f32.vlgmr.msra.gmra.mrb[2].mxu1 %v6533_v5  ;;  %v1422_v5 = vld [vmem:[#allocation2 + $0x38] sm:$0xff] }
 0x2dc   : > { %4100 = vmatpush1.bf16.msra.mxu0 (!%p3513_p7), %v4099_v42 }
 0x2dd   : > { %4102 = vmatprep.subr.bf16.mxu0 (!%p3513_p7), %v4101_v32  ;;  %v2955_v32 = vld [vmem:[#allocation11 + $0x20] sm:$0xff] (!%p3513_p7) }
 0x2de   : > { %v4039_v57 = vpack.c.bf16 (!%p3513_p7), %v2957_v7, %v2955_v32 }
 0x2e0   : > { %4104 = vmatpush1.bf16.msra.mxu0 (!%p3513_p7), %v4103_v50 }
 0x2e1   : > { %4106 = vmatprep.subr.bf16.mxu0 (!%p3513_p7), %v4105_v33  ;;  %v2960_v33 = vld [vmem:[#allocation11 + $0x48] sm:$0xff] (!%p3513_p7) }
 0x2e2   : > { %v4041_v22 = vpack.c.bf16 (!%p3513_p7), %v2962_v36, %v2960_v33  ;;  %v3064_v33 = vld [vmem:[#allocation11 + $0x388] sm:$0xff] (!%p3513_p7) }
 0x2e4   : > { %4108 = vmatpush1.bf16.msra.mxu0 (!%p3513_p7), %v4107_v39 }
 0x2e5   : > { %4110 = vmatprep.subr.bf16.mxu0 (!%p3513_p7), %v4109_v60  ;;  %v2959_v60 = vld [vmem:[#allocation11 + $0x40] sm:$0xff] (!%p3513_p7) }
 0x2e8   : > { %4112 = vmatpush1.bf16.msra.mxu0 (!%p3513_p7), %v4111_v1  ;;  %v2964_v1 = vld [vmem:[#allocation11 + $0x68] sm:$0xff] (!%p3513_p7) }
 0x2e9   : > { %4114 = vmatprep.subr.bf16.mxu0 (!%p3513_p7), %v4113_v14  ;;  %v4131_v14 = vpack.c.bf16 (!%p3513_p7), %v3049_v52, %v3047_v16  ;;  %v2967_v16 = vld [vmem:[#allocation11 + $0x80] sm:$0xff] (!%p3513_p7) }
 0x2ec   : > { %4116 = vmatpush1.bf16.msra.mxu0 (!%p3513_p7), %v4115_v26  ;;  %v4133_v26 = vpack.c.bf16 (!%p3513_p7), %v3054_v2, %v3052_v6  ;;  %v3061_v6 = vld [vmem:[#allocation11 + $0x370] sm:$0xff] (!%p3513_p7) }
 0x2ed   : > { %4118 = vmatprep.subr.bf16.mxu0 (!%p3513_p7), %v4117_v20  ;;  %v3051_v20 = vld [vmem:[#allocation11 + $0x320] sm:$0xff] (!%p3513_p7) }
 0x2f0   : > { %4120 = vmatpush1.bf16.msra.mxu0 (!%p3513_p7), %v4119_v12  ;;  %v4043_v12 = vpack.c.bf16 (!%p3513_p7), %v2961_v17, %v2959_v60  ;;  %v3066_v60 = vld [vmem:[#allocation11 + $0x398] sm:$0xff] (!%p3513_p7) }
 0x32e   : > { %v2143_v25 = vpop.f32.mrb[0].mxu0  ;;  %v2285_v44 = vpop.f32.mrb[0].mxu1 }
 0x32f   : > { %v2574_v34 = vadd.f32 %v2143_v25, %v1415_v24  ;;  %v2576_v54 = vadd.f32 %v2285_v44, %v1417_v40  ;;  %v2145_v19 = vpop.f32.mrb[1].mxu0  ;;  %v2287_v9 = vpop.f32.mrb[1].mxu1  ;;  %v2952_v24 = vld [vmem:[#allocation11 + $0x8] sm:$0xff] (!%p3513_p7)  ;;  %v4121_v40 = vpack.c.bf16 (!%p3513_p7), %v3042_v38, %v3040_v53  ;;  %v2954_v25 = vld [vmem:[#allocation11 + $0x18] sm:$0xff] (!%p3513_p7) }
 0x330   : > { %v2575_v18 = vadd.f32 %v2145_v19, %v1416_v63  ;;  %v2577_v59 = vadd.f32 %v2287_v9, %v1418_v58  ;;  %v3044_v63 = vld [vmem:[#allocation11 + $0x2e8] sm:$0xff] (!%p3513_p7)  ;;  %v3046_v58 = vld [vmem:[#allocation11 + $0x2f8] sm:$0xff] (!%p3513_p7)  ;;  %v4033_v44 = vpack.c.bf16 (!%p3513_p7), %v2954_v25, %v2952_v24 }
 0x331   : > { %2582 = vst [vmem:[#allocation2] sm:$0xff] %v2574_v34  ;;  %2584 = vst [vmem:[#allocation2 + $0x10] sm:$0xff] %v2576_v54  ;;  %v2951_v34 = vld [vmem:[#allocation11] sm:$0xff] (!%p3513_p7)  ;;  %v2953_v54 = vld [vmem:[#allocation11 + $0x10] sm:$0xff] (!%p3513_p7)  ;;  %4122 = vmatprep.subr.bf16.mxu0 (!%p3513_p7), %v4121_v40  ;;  %v4045_v40 = vpack.c.bf16 (!%p3513_p7), %v2966_v15, %v2964_v1 }
 0x332   : > { %2583 = vst [vmem:[#allocation2 + $0x8] sm:$0xff] %v2575_v18  ;;  %2585 = vst [vmem:[#allocation2 + $0x18] sm:$0xff] %v2577_v59  ;;  %v4035_v9 = vpack.c.bf16 (!%p3513_p7), %v2953_v54, %v2951_v34  ;;  %4034 = vmatprep.subr.bf16.mxu1 (!%p3513_p7), %v4033_v44  ;;  %v2968_v34 = vld [vmem:[#allocation11 + $0x88] sm:$0xff] (!%p3513_p7)  ;;  %v2970_v54 = vld [vmem:[#allocation11 + $0x98] sm:$0xff] (!%p3513_p7) }
 0x334   : > { %4036 = vmatpush1.bf16.msra.mxu1 (!%p3513_p7), %v4035_v9  ;;  %v4135_v9 = vpack.c.bf16 (!%p3513_p7), %v3053_v35, %v3051_v20  ;;  %v4145_v20 = vpack.c.bf16 (!%p3513_p7), %v3066_v60, %v3064_v33  ;;  %v3068_v35 = vld [vmem:[#allocation11 + $0x3a8] sm:$0xff] (!%p3513_p7)  ;;  %v2983_v60 = vld [vmem:[#allocation11 + $0x100] sm:$0xff] (!%p3513_p7) }
 0x339   : > { %v6785_v19 = vld [vmem:[#allocation2 + $0x18] sm:$0xff] (!%p3513_p7) }
 0x3ac   : > { %2593 = sbr.rel (%p3513_p7) target bundleno = 1331 (0x533), region = 99 }
 0x3ae   : > { %v2427_v45 = vpop.f32.mrb[2].mxu0  ;;  %v2569_v27 = vpop.f32.mrb[2].mxu1 }
 0x3af   : > { %v2578_v4 = vadd.f32 %v2427_v45, %v1419_v13  ;;  %v2580_v3 = vadd.f32 %v2569_v27, %v1421_v56  ;;  %v2429_v29 = vpop.f32.mrb[3].mxu0  ;;  %v2571_v30 = vpop.f32.mrb[3].mxu1  ;;  %v2620_v13 = vrot.slane (!%p3513_p7), %v6785_v19, 4  ;;  %v4123_v56 = vpack.c.bf16 (!%p3513_p7), %v3041_v28, %v3039_v11  ;;  %v3058_v11 = vld [vmem:[#allocation11 + $0x358] sm:$0xff] (!%p3513_p7) }
 0x3b0   : > { %v2579_v47 = vadd.f32 %v2429_v29, %v1420_v10  ;;  %v2581_v46 = vadd.f32 %v2571_v30, %v1422_v5  ;;  %v3043_v10 = vld [vmem:[#allocation11 + $0x2e0] sm:$0xff] (!%p3513_p7)  ;;  %v3045_v5 = vld [vmem:[#allocation11 + $0x2f0] sm:$0xff] (!%p3513_p7)  ;;  %v2956_v29 = vld [vmem:[#allocation11 + $0x28] sm:$0xff] (!%p3513_p7) }
 0x3b1   : > { %2586 = vst [vmem:[#allocation2 + $0x20] sm:$0xff] %v2578_v4  ;;  %2588 = vst [vmem:[#allocation2 + $0x30] sm:$0xff] %v2580_v3  ;;  %v4125_v4 = vpack.c.bf16 (!%p3513_p7), %v3046_v58, %v3044_v63  ;;  %v2621_v3 = vadd.f32 (!%p3513_p7), %v2620_v13, %v6785_v19  ;;  %v2958_v30 = vld [vmem:[#allocation11 + $0x38] sm:$0xff] (!%p3513_p7)  ;;  %4124 = vmatpush1.bf16.msra.mxu0 (!%p3513_p7), %v4123_v56  ;;  %v4127_v48 = vpack.c.bf16 (!%p3513_p7), %v3045_v5, %v3043_v10  ;;  %v2963_v63 = vld [vmem:[#allocation11 + $0x60] sm:$0xff] (!%p3513_p7) }
 0x3b2   : > { %2587 = vst [vmem:[#allocation2 + $0x28] sm:$0xff] %v2579_v47  ;;  %2589 = vst [vmem:[#allocation2 + $0x38] sm:$0xff] %v2581_v46  ;;  %v6795_v47 = vld [vmem:[#allocation2 + $0x10] sm:$0xff] (!%p3513_p7)  ;;  %v3048_v46 = vld [vmem:[#allocation11 + $0x308] sm:$0xff] (!%p3513_p7)  ;;  %v4037_v31 = vpack.c.bf16 (!%p3513_p7), %v2958_v30, %v2956_v29  ;;  %v4137_v10 = vpack.c.bf16 (!%p3513_p7), %v3058_v11, %v3056_v0 }
 0x3b3   : > { %v2622_v49 = vrot.slane %v2621_v3, 2  ;;  %v2614_v42 = vrot.slane %v6795_v47, 4  ;;  %4126 = vmatprep.subr.bf16.mxu0 %v4125_v4  ;;  %v4129_v62 = vpack.c.bf16 %v3050_v37, %v3048_v46  ;;  %v2965_v58 = vld [vmem:[#allocation11 + $0x70] sm:$0xff]  ;;  %v3055_v5 = vld [vmem:[#allocation11 + $0x340] sm:$0xff]  ;;  %v3060_v29 = vld [vmem:[#allocation11 + $0x368] sm:$0xff]  ;;  %v4049_v37 = vpack.c.bf16 %v2970_v54, %v2968_v34 }
 0x3b4   : > { %4038 = vmatprep.subr.bf16.mxu1 %v4037_v31  ;;  %v2972_v31 = vld [vmem:[#allocation11 + $0xa8] sm:$0xff]  ;;  %v2977_v11 = vld [vmem:[#allocation11 + $0xd0] sm:$0xff]  ;;  %v3067_v54 = vld [vmem:[#allocation11 + $0x3a0] sm:$0xff] }
 0x3b5   : > { %v2623_v41 = vadd.f32 %v2622_v49, %v2621_v3  ;;  %v2615_v39 = vadd.f32 %v2614_v42, %v6795_v47  ;;  %4128 = vmatpush1.bf16.msra.mxu0 %v4127_v48  ;;  %4040 = vmatpush1.bf16.msra.mxu1 %v4039_v57  ;;  %v4047_v3 = vpack.c.bf16 %v2965_v58, %v2963_v63  ;;  %v2974_v42 = vld [vmem:[#allocation11 + $0xb8] sm:$0xff]  ;;  %v3059_v48 = vld [vmem:[#allocation11 + $0x360] sm:$0xff]  ;;  %v2980_v63 = vld [vmem:[#allocation11 + $0xe8] sm:$0xff] }
 0x3b6   : > { %4130 = vmatprep.subr.bf16.mxu0 %v4129_v62  ;;  %4042 = vmatprep.subr.bf16.mxu1 %v4041_v22  ;;  %v4053_v2 = vpack.c.bf16 %v2974_v42, %v2972_v31  ;;  %v2978_v57 = vld [vmem:[#allocation11 + $0xd8] sm:$0xff]  ;;  %v4143_v1 = vpack.c.bf16 %v3061_v6, %v3059_v48  ;;  %v3065_v22 = vld [vmem:[#allocation11 + $0x390] sm:$0xff]  ;;  %v2984_v31 = vld [vmem:[#allocation11 + $0x108] sm:$0xff] }
 0x3b7   : > { %v2624_v43 = vrot.slane %v2623_v41, 1  ;;  %v2616_v21 = vrot.slane %v2615_v39, 2  ;;  %v2982_v58 = vld [vmem:[#allocation11 + $0xf8] sm:$0xff]  ;;  %v3071_v48 = vld [vmem:[#allocation11 + $0x3c0] sm:$0xff]  ;;  %v3073_v6 = vld [vmem:[#allocation11 + $0x3d0] sm:$0xff] }
 0x3b8   : > { %v6787_v18 = vld [vmem:[#allocation2 + $0x30] sm:$0xff]  ;;  %v2986_v42 = vld [vmem:[#allocation11 + $0x118] sm:$0xff] }
 0x3b9   : > { %v6789_v59 = vld [vmem:[#allocation2 + $0x38] sm:$0xff]  ;;  %v2638_v45 = vrot.slane %v6787_v18, 4  ;;  %v2625_v28 = vadd.f32 %v2624_v43, %v2623_v41  ;;  %v2617_v24 = vadd.f32 %v2616_v21, %v2615_v39  ;;  %4132 = vmatpush1.bf16.msra.mxu0 %v4131_v14  ;;  %4044 = vmatpush1.bf16.msra.mxu1 %v4043_v12  ;;  %v2971_v41 = vld [vmem:[#allocation11 + $0xa0] sm:$0xff]  ;;  %v2973_v39 = vld [vmem:[#allocation11 + $0xb0] sm:$0xff] }
 0x3ba   : > { %v2644_v27 = vrot.slane %v6789_v59, 4  ;;  %4134 = vmatprep.subr.bf16.mxu0 %v4133_v26  ;;  %4046 = vmatprep.subr.bf16.mxu1 %v4045_v40  ;;  %v3063_v21 = vld [vmem:[#allocation11 + $0x380] sm:$0xff]  ;;  %v4055_v26 = vpack.c.bf16 %v2973_v39, %v2971_v41  ;;  %v4065_v39 = vpack.c.bf16 %v2986_v42, %v2984_v31  ;;  %v2997_v42 = vld [vmem:[#allocation11 + $0x170] sm:$0xff] }
 0x3bb   : > { %v2639_v51 = vadd.f32 %v2638_v45, %v6787_v18  ;;  %v2654_v13 = vmul.f32 0.125, %v2625_v28  ;;  %v2618_v56 = vrot.slane %v2617_v24, 1  ;;  %v3057_v45 = vld [vmem:[#allocation11 + $0x350] sm:$0xff]  ;;  %v2975_v12 = vld [vmem:[#allocation11 + $0xc0] sm:$0xff]  ;;  %v3070_v28 = vld [vmem:[#allocation11 + $0x3b8] sm:$0xff] }
 0x3bc   : > { %v2645_v23 = vadd.f32 %v2644_v27, %v6789_v59  ;;  %v4139_v32 = vpack.c.bf16 %v3057_v45, %v3055_v5  ;;  %v4059_v5 = vpack.c.bf16 %v2977_v11, %v2975_v12  ;;  %v4149_v45 = vpack.c.bf16 %v3070_v28, %v3068_v35  ;;  %v3080_v12 = vld [vmem:[#allocation11 + $0x408] sm:$0xff]  ;;  %v2995_v31 = vld [vmem:[#allocation11 + $0x160] sm:$0xff] }
 0x3bd   : > { %v2640_v61 = vrot.slane %v2639_v51, 2  ;;  %v6802_v30 = vsub.f32 %v6785_v19, %v2654_v13  ;;  %v2619_v46 = vadd.f32 %v2618_v56, %v2617_v24  ;;  %4136 = vmatpush1.bf16.msra.mxu0 %v4135_v9  ;;  %4048 = vmatpush1.bf16.msra.mxu1 %v4047_v3  ;;  %v3069_v9 = vld [vmem:[#allocation11 + $0x3b0] sm:$0xff] }
 0x3be   : > { %v2646_v50 = vrot.slane %v2645_v23, 2  ;;  %4138 = vmatprep.subr.bf16.mxu0 %v4137_v10  ;;  %4050 = vmatprep.subr.bf16.mxu1 %v4049_v37  ;;  %v2757_v10 = vlaneseq  ;;  %v2981_v37 = vld [vmem:[#allocation11 + $0xf0] sm:$0xff] }
 0x3bf   : > { %v2641_v8 = vadd.f32 %v2640_v61, %v2639_v51  ;;  %v2969_v51 = vld [vmem:[#allocation11 + $0x90] sm:$0xff]  ;;  %v2670_v7 = vmul.f32 %v6802_v30, %v6802_v30  ;;  %v2653_v19 = vmul.f32 0.125, %v2619_v46  ;;  %v2979_v46 = vld [vmem:[#allocation11 + $0xe0] sm:$0xff] }
 0x3c0   : > { %v2647_v55 = vadd.f32 %v2646_v50, %v2645_v23  ;;  %v3062_v23 = vld [vmem:[#allocation11 + $0x378] sm:$0xff]  ;;  %v4051_v50 = vpack.c.bf16 %v2969_v51, %v2967_v16 }
 0x3c1   : > { %v2642_v53 = vrot.slane %v2641_v8, 1  ;;  %v2693_v36 = vrot.slane %v2670_v7, 4  ;;  %v6817_v62 = vsub.f32 %v6795_v47, %v2653_v19  ;;  %4140 = vmatpush1.bf16.msra.mxu0 %v4139_v32  ;;  %v3074_v16 = vld [vmem:[#allocation11 + $0x3d8] sm:$0xff]  ;;  %v4151_v32 = vpack.c.bf16 %v3069_v9, %v3067_v54 }
 0x3c2   : > { %v2648_v38 = vrot.slane %v2647_v55, 1  ;;  %4052 = vmatpush1.bf16.msra.mxu1 %v4051_v50  ;;  %v6821_v50 = vshrl.u32 %v2757_v10, 7  ;;  %v6830_v54 = vld [vmem:[#allocation10] sm:$0xff] }
 0x3c3   : > { %v2643_v25 = vadd.f32 %v2642_v53, %v2641_v8  ;;  %v2694_v14 = vadd.f32 %v2693_v36, %v2670_v7  ;;  %v2669_v43 = vmul.f32 %v6817_v62, %v6817_v62  ;;  %4054 = vmatprep.subr.bf16.mxu1 %v4053_v2  ;;  %v3076_v36 = vld [vmem:[#allocation11 + $0x3e8] sm:$0xff] }
 0x3c4   : > { %v2649_v44 = vadd.f32 %v2648_v38, %v2647_v55  ;;  %v2976_v55 = vld [vmem:[#allocation11 + $0xc8] sm:$0xff] }
 0x3c5   : > { %v2657_v27 = vmul.f32 0.125, %v2643_v25  ;;  %v2695_v0 = vrot.slane %v2694_v14, 2  ;;  %v2687_v53 = vrot.slane %v2669_v43, 4  ;;  %v4057_v38 = vpack.c.bf16 %v2978_v57, %v2976_v55 }
 0x3c6   : > { %v2658_v4 = vmul.f32 0.125, %v2649_v44  ;;  %v4147_v25 = vpack.c.bf16 %v3065_v22, %v3063_v21  ;;  %4056 = vmatpush1.bf16.msra.mxu1 %v4055_v26  ;;  %v3075_v21 = vld [vmem:[#allocation11 + $0x3e0] sm:$0xff]  ;;  %v3077_v26 = vld [vmem:[#allocation11 + $0x3f0] sm:$0xff] }
 0x3c7   : > { %v6805_v52 = vsub.f32 %v6787_v18, %v2657_v27  ;;  %v2696_v44 = vadd.f32 %v2695_v0, %v2694_v14  ;;  %v2688_v34 = vadd.f32 %v2687_v53, %v2669_v43  ;;  %v3072_v27 = vld [vmem:[#allocation11 + $0x3c8] sm:$0xff]  ;;  %4058 = vmatprep.subr.bf16.mxu1 %v4057_v38  ;;  %v2990_v14 = vld [vmem:[#allocation11 + $0x138] sm:$0xff]  ;;  %v2775_v43 = vsub.s32 4, %v6821_v50 }
 0x3c8   : > { %v6808_v49 = vsub.f32 %v6789_v59, %v2658_v4  ;;  %v4141_v59 = vpack.c.bf16 %v3062_v23, %v3060_v29  ;;  %v4061_v29 = vpack.c.bf16 %v2982_v58, %v2980_v63  ;;  %v4153_v33 = vpack.c.bf16 %v3074_v16, %v3072_v27  ;;  %v3082_v63 = vld [vmem:[#allocation11 + $0x418] sm:$0xff]  ;;  %v2992_v58 = vld [vmem:[#allocation11 + $0x148] sm:$0xff] }
 0x3c9   : > { %v2673_v61 = vmul.f32 %v6805_v52, %v6805_v52  ;;  %v2697_v4 = vrot.slane %v2696_v44, 1  ;;  %v2689_v3 = vrot.slane %v2688_v34, 2  ;;  %v4161_v27 = vpack.c.bf16 %v3082_v63, %v3080_v12 }
 0x3ca   : > { %v2674_v18 = vmul.f32 %v6808_v49, %v6808_v49  ;;  %4142 = vmatprep.subr.bf16.mxu0 %v4141_v59  ;;  %4060 = vmatpush1.bf16.msra.mxu1 %v4059_v5  ;;  %v4063_v59 = vpack.c.bf16 %v2981_v37, %v2979_v46  ;;  %v6834_v5 = vrot.slane %v6830_v54, %v2775_v43  ;;  %v2996_v46 = vld [vmem:[#allocation11 + $0x168] sm:$0xff]  ;;  %v2998_v37 = vld [vmem:[#allocation11 + $0x178] sm:$0xff]  ;;  %v2767_v16 = vsub.s32 2, %v6821_v50 }
 0x3cb   : > { %v2711_v17 = vrot.slane %v2673_v61, 4  ;;  %4144 = vmatpush1.bf16.msra.mxu0 %v4143_v1  ;;  %v2698_v7 = vadd.f32 %v2697_v4, %v2696_v44  ;;  %v2690_v19 = vadd.f32 %v2689_v3, %v2688_v34  ;;  %4062 = vmatprep.subr.bf16.mxu1 %v4061_v29  ;;  %v2988_v1 = vld [vmem:[#allocation11 + $0x128] sm:$0xff]  ;;  %v2771_v34 = vsub.s32 3, %v6821_v50  ;;  %v2991_v3 = vld [vmem:[#allocation11 + $0x140] sm:$0xff]  ;;  %v2993_v29 = vld [vmem:[#allocation11 + $0x150] sm:$0xff] }
 0x3cc   : > { %v2717_v8 = vrot.slane %v2674_v18, 4  ;;  %4146 = vmatprep.subr.bf16.mxu0 %v4145_v20  ;;  %v6824_v20 = vld [vmem:[#allocation8] sm:$0xff]  ;;  %v4069_v28 = vpack.c.bf16 %v2990_v14, %v2988_v1  ;;  %v6852_v1 = vld [vmem:[#allocation2 + $0x28] sm:$0xff] }
 0x3cd   : > { %v2712_v15 = vadd.f32 %v2711_v17, %v2673_v61  ;;  %v2726_v2 = vmul.f32 0.125, %v2698_v7  ;;  %v2691_v41 = vrot.slane %v2690_v19, 1  ;;  %v2985_v17 = vld [vmem:[#allocation11 + $0x110] sm:$0xff]  ;;  %v6827_v44 = vrot.slane %v6824_v20, %v2775_v43 }
 0x3ce   : > { %v2718_v47 = vadd.f32 %v2717_v8, %v2674_v18  ;;  %v3078_v8 = vld [vmem:[#allocation11 + $0x3f8] sm:$0xff]  ;;  %4064 = vmatpush1.bf16.msra.mxu1 %v4063_v59  ;;  %v4067_v53 = vpack.c.bf16 %v2985_v17, %v2983_v60  ;;  %v2768_v17 = vrot.slane %v6824_v20, %v2767_v16  ;;  %v6854_v14 = vld [vmem:[#allocation2 + $0x20] sm:$0xff] }
 0x3cf   : > { %v2713_v24 = vrot.slane %v2712_v15, 2  ;;  %4148 = vmatpush1.bf16.msra.mxu0 %v4147_v25  ;;  %v2735_v22 = vadd.f32 1e-05, %v2726_v2  ;;  %v4157_v38 = vpack.c.bf16 %v3078_v8, %v3076_v36  ;;  %4066 = vmatprep.subr.bf16.mxu1 %v4065_v39  ;;  %v2994_v25 = vld [vmem:[#allocation11 + $0x158] sm:$0xff]  ;;  %v2999_v36 = vld [vmem:[#allocation11 + $0x180] sm:$0xff]  ;;  %v3001_v2 = vld [vmem:[#allocation11 + $0x190] sm:$0xff]  ;;  %v2818_v8 = vrot.slane %v6830_v54, %v2767_v16 }
 0x3d0   : > { %v2719_v40 = vrot.slane %v2718_v47, 2  ;;  %4150 = vmatprep.subr.bf16.mxu0 %v4149_v45  ;;  %v2787_v45 = vsub.s32 7, %v6821_v50  ;;  %v4073_v4 = vpack.c.bf16 %v2994_v25, %v2992_v58  ;;  %v6847_v39 = vld [vmem:[#allocation2] sm:$0xff]  ;;  %v4083_v12 = vpack.c.bf16 %v3001_v2, %v2999_v36  ;;  %v3012_v36 = vld [vmem:[#allocation11 + $0x1e8] sm:$0xff] }
 0x3d1   : > { %v2714_v13 = vadd.f32 %v2713_v24, %v2712_v15  ;;  %v2692_v15 = vadd.f32 %v2691_v41, %v2690_v19  ;;  %4714 = vrsqrt.f32 %v2735_v22  ;;  %v2987_v24 = vld [vmem:[#allocation11 + $0x120] sm:$0xff]  ;;  %v4077_v19 = vpack.c.bf16 %v2998_v37, %v2996_v46  ;;  %v3004_v22 = vld [vmem:[#allocation11 + $0x1a8] sm:$0xff] }
 0x3d2   : > { %v2720_v56 = vadd.f32 %v2719_v40, %v2718_v47  ;;  %v4155_v47 = vpack.c.bf16 %v3073_v6, %v3071_v48  ;;  %v2989_v40 = vld [vmem:[#allocation11 + $0x130] sm:$0xff]  ;;  %4068 = vmatpush1.bf16.msra.mxu1 %v4067_v53  ;;  %v2788_v7 = vrot.slane %v6824_v20, %v2787_v45  ;;  %v3000_v48 = vld [vmem:[#allocation11 + $0x188] sm:$0xff]  ;;  %v3002_v6 = vld [vmem:[#allocation11 + $0x198] sm:$0xff] }
 0x3d3   : > { %v2715_v51 = vrot.slane %v2714_v13, 1  ;;  %4152 = vmatpush1.bf16.msra.mxu0 %v4151_v32  ;;  %v2725_v11 = vmul.f32 0.125, %v2692_v15  ;;  %v4071_v10 = vpack.c.bf16 %v2989_v40, %v2987_v24  ;;  %4070 = vmatprep.subr.bf16.mxu1 %v4069_v28  ;;  %v3006_v15 = vld [vmem:[#allocation11 + $0x1b8] sm:$0xff] }
 0x3d4   : > { %v2721_v23 = vrot.slane %v2720_v56, 1  ;;  %4154 = vmatprep.subr.bf16.mxu0 %v4153_v33  ;;  %v2838_v33 = vrot.slane %v6830_v54, %v2787_v45  ;;  %v4085_v25 = vpack.c.bf16 %v3006_v15, %v3004_v22 }
 0x3d5   : > { %v2716_v61 = vadd.f32 %v2715_v51, %v2714_v13  ;;  %v2734_v9 = vadd.f32 1e-05, %v2725_v11  ;;  %v4159_v13 = vpack.c.bf16 %v3077_v26, %v3075_v21  ;;  %v2772_v51 = vrot.slane %v6824_v20, %v2771_v34 }
 0x3d6   : > { %v2722_v18 = vadd.f32 %v2721_v23, %v2720_v56  ;;  %v2783_v56 = vsub.s32 6, %v6821_v50  ;;  %4072 = vmatpush1.bf16.msra.mxu1 %v4071_v10  ;;  %v4075_v23 = vpack.c.bf16 %v2993_v29, %v2991_v3  ;;  %v2632_v26 = vrot.slane %v6852_v1, 4  ;;  %v3003_v10 = vld [vmem:[#allocation11 + $0x1a0] sm:$0xff]  ;;  %v3010_v3 = vld [vmem:[#allocation11 + $0x1d8] sm:$0xff] }
 0x3d7   : > { %v2729_v55 = vmul.f32 0.125, %v2716_v61  ;;  %4156 = vmatpush1.bf16.msra.mxu0 %v4155_v47  ;;  %4074 = vmatprep.subr.bf16.mxu1 %v4073_v4  ;;  %v6841_v61 = vld [vmem:[#allocation2 + $0x8] sm:$0xff]  ;;  %v3008_v4 = vld [vmem:[#allocation11 + $0x1c8] sm:$0xff] }
 0x3d8   : > { %v2730_v57 = vmul.f32 0.125, %v2722_v18  ;;  %4158 = vmatprep.subr.bf16.mxu0 %v4157_v38  ;;  %v2784_v32 = vrot.slane %v6824_v20, %v2783_v56  ;;  %v2822_v18 = vrot.slane %v6830_v54, %v2771_v34  ;;  %v2834_v59 = vrot.slane %v6830_v54, %v2783_v56 }
 0x3d9   : > { %v2738_v35 = vadd.f32 1e-05, %v2729_v55  ;;  %v2608_v41 = vrot.slane %v6841_v61, 4  ;;  %v4079_v55 = vpack.c.bf16 %v2997_v42, %v2995_v31  ;;  %v4081_v38 = vpack.c.bf16 %v3002_v6, %v3000_v48 }
 0x3da   : > { %v2739_v0 = vadd.f32 1e-05, %v2730_v57  ;;  %v2602_v57 = vrot.slane %v6847_v39, 4  ;;  %4076 = vmatpush1.bf16.msra.mxu1 %v4075_v23  ;;  %v2633_v40 = vadd.f32 %v2632_v26, %v6852_v1  ;;  %v4089_v6 = vpack.c.bf16 %v3010_v3, %v3008_v4  ;;  %v3011_v26 = vld [vmem:[#allocation11 + $0x1e0] sm:$0xff] }
 0x3db   : > { %4716 = vrsqrt.f32 %v2738_v35  ;;  %4160 = vmatpush1.bf16.msra.mxu0 %v4159_v13  ;;  %v4715_v60 = vpop.eup %4714  ;;  %v2609_v47 = vadd.f32 %v2608_v41, %v6841_v61  ;;  %v2626_v35 = vrot.slane %v6854_v14, 4  ;;  %4078 = vmatprep.subr.bf16.mxu1 %v4077_v19 }
 0x3dc   : > { %4718 = vrsqrt.f32 %v2739_v0  ;;  %4162 = vmatprep.subr.bf16.mxu0 %v4161_v27  ;;  %v2751_v21 = vmul.f32 %v4715_v60, %v6802_v30  ;;  %v2603_v11 = vadd.f32 %v2602_v57, %v6847_v39  ;;  %v2634_v46 = vrot.slane %v2633_v40, 2 }
 0x3dd   : > { %4720 = vrsqrt.f32 %v2734_v9  ;;  %v2610_v24 = vrot.slane %v2609_v47, 2  ;;  %v2627_v9 = vadd.f32 %v2626_v35, %v6854_v14  ;;  %v3013_v35 = vld [vmem:[#allocation11 + $0x1f0] sm:$0xff] }
 0x3de   : > { %v2800_v30 = vmul.f32 %v2772_v51, %v2751_v21  ;;  %v2604_v34 = vrot.slane %v2603_v11, 2  ;;  %4080 = vmatpush1.bf16.msra.mxu1 %v4079_v55 }
 0x3df   : > { %v2611_v45 = vadd.f32 %v2610_v24, %v2609_v47  ;;  %4082 = vmatprep.subr.bf16.mxu1 %v4081_v38  ;;  %v2628_v37 = vrot.slane %v2627_v9, 2 }
 0x3e0   : > { %v6865_v56 = vadd.f32 %v2822_v18, %v2800_v30  ;;  %v2605_v29 = vadd.f32 %v2604_v34, %v2603_v11  ;;  %v3007_v18 = vld [vmem:[#allocation11 + $0x1c0] sm:$0xff] }
 0x3e1   : > { %v2612_v31 = vrot.slane %v2611_v45, 1 }
 0x3e2   : > { %v2864_v51 = vmin.f32 %v6865_v56, 20.0  ;;  %v2606_v42 = vrot.slane %v2605_v29, 1  ;;  %4084 = vmatpush1.bf16.msra.mxu1 %v4083_v12  ;;  %vm2858_vm7 = vcmp.gt.f32.partialorder %v6865_v56, 20.0 }
 0x3e3   : > { %4086 = vmatprep.subr.bf16.mxu1 %v4085_v25  ;;  %v2613_v2 = vadd.f32 %v2612_v31, %v2611_v45 }
 0x3e4   : > { %v2607_v41 = vadd.f32 %v2606_v42, %v2605_v29 }
 0x3e5   : > { %v4717_v43 = vpop.eup %4716  ;;  %v2652_v57 = vmul.f32 0.125, %v2613_v2 }
 0x3e6   : > { %v4719_v0 = vpop.eup %4718  ;;  %v2754_v53 = vmul.f32 %v4717_v43, %v6805_v52  ;;  %v2651_v43 = vmul.f32 0.125, %v2607_v41 }
 0x3e7   : > { %v2755_v28 = vmul.f32 %v4719_v0, %v6808_v49  ;;  %v4721_v63 = vpop.eup %4720  ;;  %v3005_v49 = vld [vmem:[#allocation11 + $0x1b0] sm:$0xff]  ;;  %v6873_v0 = vsub.f32 %v6841_v61, %v2652_v57  ;;  %v4095_v61 = vpack.c.bf16 %v3013_v35, %v3011_v26 }
 0x3e8   : > { %v2803_v58 = vmul.f32 %v2784_v32, %v2754_v53  ;;  %v2750_v52 = vmul.f32 %v4721_v63, %v6817_v62  ;;  %v2635_v32 = vadd.f32 %v2634_v46, %v2633_v40  ;;  %v2629_v62 = vadd.f32 %v2628_v37, %v2627_v9 }
 0x3e9   : > { %v2804_v13 = vmul.f32 %v2788_v7, %v2755_v28  ;;  %v2873_v7 = vmul.f32 1.442695, %v2864_v51  ;;  %v4087_v48 = vpack.c.bf16 %v3005_v49, %v3003_v10  ;;  %v6876_v53 = vsub.f32 %v6847_v39, %v2651_v43 }
 0x3ea   : > { %v2853_v27 = vadd.f32 %v2834_v59, %v2803_v58  ;;  %v2799_v23 = vmul.f32 %v2768_v17, %v2750_v52  ;;  %v3009_v59 = vld [vmem:[#allocation11 + $0x1d0] sm:$0xff]  ;;  %v2636_v60 = vrot.slane %v2635_v32, 1  ;;  %v2630_v17 = vrot.slane %v2629_v62, 1 }
 0x3eb   : > { %v2854_v16 = vadd.f32 %v2838_v33, %v2804_v13  ;;  %v3014_v33 = vld [vmem:[#allocation11 + $0x1f8] sm:$0xff]  ;;  %4722 = vpow2.f32 %v2873_v7  ;;  %4088 = vmatpush1.bf16.msra.mxu1 %v4087_v48  ;;  %v4091_v15 = vpack.c.bf16 %v3009_v59, %v3007_v18  ;;  %v2668_v11 = vmul.f32 %v6873_v0, %v6873_v0 }
 0x3ec   : > { %3370 = vst [vmem:[#allocation14] sm:$0xff] %v2853_v27  ;;  %v6869_v19 = vadd.f32 %v2818_v8, %v2799_v23  ;;  %v2637_v21 = vadd.f32 %v2636_v60, %v2635_v32  ;;  %v2631_v8 = vadd.f32 %v2630_v17, %v2629_v62  ;;  %v4093_v47 = vpack.c.bf16 %v3014_v33, %v3012_v36 }
 0x3ed   : > { %3371 = vst [vmem:[#allocation14 + $0x8] sm:$0xff] %v2854_v16  ;;  %4090 = vmatprep.subr.bf16.mxu1 %v4089_v6  ;;  %v2667_v28 = vmul.f32 %v6876_v53, %v6876_v53  ;;  %v2681_v39 = vrot.slane %v2668_v11, 4 }
 0x3ee   : > { %v2863_v55 = vmin.f32 %v6869_v19, 20.0  ;;  %v2656_v38 = vmul.f32 0.125, %v2637_v21  ;;  %v2655_v12 = vmul.f32 0.125, %v2631_v8  ;;  %vm2857_vm10 = vcmp.gt.f32.partialorder %v6869_v19, 20.0 }
 0x3ef   : > { %4092 = vmatpush1.bf16.msra.mxu1 %v4091_v15  ;;  %v2675_v40 = vrot.slane %v2667_v28, 4  ;;  %v2682_v25 = vadd.f32 %v2681_v39, %v2668_v11 }
 0x3f0   : > { %v2871_v22 = vmul.f32 1.442695, %v2863_v55  ;;  %v6883_v30 = vsub.f32 %v6852_v1, %v2656_v38  ;;  %v6886_v24 = vsub.f32 %v6854_v14, %v2655_v12  ;;  %4094 = vmatprep.subr.bf16.mxu1 %v4093_v47 }
 0x3f1   : > { %v2676_v34 = vadd.f32 %v2675_v40, %v2667_v28  ;;  %v2683_v14 = vrot.slane %v2682_v25, 2  ;;  %v6899_v40 = vsub.s32 0, %v6821_v50 }
 0x3f2   : > { %4724 = vpow2.f32 %v2871_v22  ;;  %v2672_v63 = vmul.f32 %v6883_v30, %v6883_v30  ;;  %v2671_v58 = vmul.f32 %v6886_v24, %v6886_v24 }
 0x3f3   : > { %4096 = vmatpush1.bf16.msra.mxu1 %v4095_v61  ;;  %v2677_v10 = vrot.slane %v2676_v34, 2  ;;  %v2684_v4 = vadd.f32 %v2683_v14, %v2682_v25  ;;  %v6896_v61 = vsub.s32 1, %v6821_v50 }
 0x3f4   : > { %v2705_v9 = vrot.slane %v2672_v63, 4  ;;  %v2699_v13 = vrot.slane %v2671_v58, 4 }
 0x3f5   : > { %v4723_v1 = vpop.eup %4722  ;;  %v2678_v29 = vadd.f32 %v2677_v10, %v2676_v34  ;;  %v2685_v51 = vrot.slane %v2684_v4, 1  ;;  %v2764_v25 = vrot.slane %v6824_v20, %v6896_v61 }
 0x3f6   : > { %v2906_v52 = vadd.f32 1.0, %v4723_v1  ;;  %v2706_v45 = vadd.f32 %v2705_v9, %v2672_v63  ;;  %v2700_v27 = vadd.f32 %v2699_v13, %v2671_v58  ;;  %v2909_v49 = vmul.f32 -0.5, %v4723_v1 }
 0x3f7   : > { %v2679_v23 = vrot.slane %v2678_v29, 1  ;;  %v2686_v7 = vadd.f32 %v2685_v51, %v2684_v4  ;;  %v2912_v59 = vand.u32 2147483647, %v4723_v1  ;;  %v2779_v58 = vsub.s32 5, %v6821_v50 }
 0x3f8   : > { %4726 = vlog2.f32 %v2906_v52  ;;  %v2707_v46 = vrot.slane %v2706_v45, 2  ;;  %v2701_v37 = vrot.slane %v2700_v27, 2  ;;  %v2910_v32 = vadd.f32 1.0, %v2909_v49 }
 0x3f9   : > { %v2680_v48 = vadd.f32 %v2679_v23, %v2678_v29  ;;  %v2724_v36 = vmul.f32 0.125, %v2686_v7  ;;  %vm2913_vm8 = vcmp.lt.f32.partialorder %v2912_v59, 0.0004427343  ;;  %v2760_v9 = vrot.slane %v6824_v20, %v6899_v40  ;;  %v3084_v23 = vld [vmem:[#allocation11 + $0x428] sm:$0xff]  ;;  %v3085_v59 = vld [vmem:[#allocation11 + $0x430] sm:$0xff] }
 0x3fa   : > { %v2708_v31 = vadd.f32 %v2707_v46, %v2706_v45  ;;  %v2702_v42 = vadd.f32 %v2701_v37, %v2700_v27  ;;  %v2911_v60 = vmul.f32 %v4723_v1, %v2910_v32  ;;  %v2814_v52 = vrot.slane %v6830_v54, %v6896_v61 }
 0x3fb   : > { %v2723_v33 = vmul.f32 0.125, %v2680_v48  ;;  %v2733_v55 = vadd.f32 1e-05, %v2724_v36  ;;  %v2780_v14 = vrot.slane %v6824_v20, %v2779_v58  ;;  %v2810_v50 = vrot.slane %v6830_v54, %v6899_v40  ;;  %v3081_v20 = vld [vmem:[#allocation11 + $0x410] sm:$0xff] }
 0x3fc   : > { %v4725_v3 = vpop.eup %4724  ;;  %v2709_v6 = vrot.slane %v2708_v31, 1  ;;  %v2703_v18 = vrot.slane %v2702_v42, 1 }
 0x3fd   : > { %v2897_v16 = vadd.f32 1.0, %v4725_v3  ;;  %v2900_v62 = vmul.f32 -0.5, %v4725_v3  ;;  %v2732_v57 = vadd.f32 1e-05, %v2723_v33  ;;  %v2903_v22 = vand.u32 2147483647, %v4725_v3 }
 0x3fe   : > { %v2710_v2 = vadd.f32 %v2709_v6, %v2708_v31  ;;  %v2704_v41 = vadd.f32 %v2703_v18, %v2702_v42  ;;  %v3086_v31 = vld [vmem:[#allocation11 + $0x438] sm:$0xff]  ;;  %v3083_v18 = vld [vmem:[#allocation11 + $0x420] sm:$0xff]  ;;  %v3088_v33 = vld [vmem:[#allocation11 + $0x448] sm:$0xff] }
 0x3ff   : > { %4728 = vlog2.f32 %v2897_v16  ;;  %v2901_v17 = vadd.f32 1.0, %v2900_v62  ;;  %vm2904_vm9 = vcmp.lt.f32.partialorder %v2903_v22, 0.0004427343  ;;  %v3079_v16 = vld [vmem:[#allocation11 + $0x400] sm:$0xff]  ;;  %v4165_v6 = vpack.c.bf16 %v3086_v31, %v3084_v23  ;;  %v3108_v23 = vld [vmem:[#allocation11 + $0x4e8] sm:$0xff]  ;;  %v3110_v31 = vld [vmem:[#allocation11 + $0x4f8] sm:$0xff] }
 0x400   : > { %v2728_v43 = vmul.f32 0.125, %v2710_v2  ;;  %v2727_v21 = vmul.f32 0.125, %v2704_v41  ;;  %4730 = vrsqrt.f32 %v2733_v55  ;;  %v3090_v2 = vld [vmem:[#allocation11 + $0x458] sm:$0xff]  ;;  %v4167_v55 = vpack.c.bf16 %v3085_v59, %v3083_v18  ;;  %v3107_v59 = vld [vmem:[#allocation11 + $0x4e0] sm:$0xff] }
 0x401   : > { %4732 = vrsqrt.f32 %v2732_v57  ;;  %v2902_v38 = vmul.f32 %v4725_v3, %v2901_v17  ;;  %v2830_v3 = vrot.slane %v6830_v54, %v2779_v58  ;;  %v3089_v57 = vld [vmem:[#allocation11 + $0x450] sm:$0xff]  ;;  %v4189_v18 = vpack.c.bf16 %v3110_v31, %v3108_v23 }
 0x402   : > { %v4727_v8 = vpop.eup %4726  ;;  %v2737_v47 = vadd.f32 1e-05, %v2728_v43  ;;  %v2736_v26 = vadd.f32 1e-05, %v2727_v21  ;;  %v3092_v43 = vld [vmem:[#allocation11 + $0x468] sm:$0xff]  ;;  %v3094_v21 = vld [vmem:[#allocation11 + $0x478] sm:$0xff] }
 0x403   : > { %v2908_v15 = vmul.f32 0.6931472, %v4727_v8 }
 0x404   : > { %4734 = vrsqrt.f32 %v2737_v47  ;;  %v3091_v47 = vld [vmem:[#allocation11 + $0x460] sm:$0xff] }
 0x405   : > { %v2914_v35 = vsel %vm2913_vm8, %v2911_v60, %v2908_v15  ;;  %4736 = vrsqrt.f32 %v2736_v26  ;;  %v4173_v15 = vpack.c.bf16 %v3094_v21, %v3092_v43  ;;  %v3093_v26 = vld [vmem:[#allocation11 + $0x470] sm:$0xff] }
 0x406   : > { %v2936_v11 = vsel %vm2858_vm7, %v6865_v56, %v2914_v35  ;;  %v3096_v35 = vld [vmem:[#allocation11 + $0x488] sm:$0xff] }
 0x407   : > { %4738 = vtanh.f32 %v2936_v11 }
 0x409   : > { %v4729_v12 = vpop.eup %4728 }
 0x40a   : > { %v2899_v28 = vmul.f32 0.6931472, %v4729_v12  ;;  %v4731_v34 = vpop.eup %4730  ;;  %v4175_v12 = vpack.c.bf16 %v3093_v26, %v3091_v47  ;;  %v3111_v47 = vld [vmem:[#allocation11 + $0x500] sm:$0xff]  ;;  %v3113_v26 = vld [vmem:[#allocation11 + $0x510] sm:$0xff] }
 0x40b   : > { %v4733_v13 = vpop.eup %4732  ;;  %v2749_v1 = vmul.f32 %v4731_v34, %v6873_v0  ;;  %v3102_v34 = vld [vmem:[#allocation11 + $0x4b8] sm:$0xff] }
 0x40c   : > { %v2905_v39 = vsel %vm2904_vm9, %v2902_v38, %v2899_v28  ;;  %v2748_v45 = vmul.f32 %v4733_v13, %v6876_v53  ;;  %v3098_v38 = vld [vmem:[#allocation11 + $0x498] sm:$0xff] }
 0x40d   : > { %v2935_v63 = vsel %vm2857_vm10, %v6869_v19, %v2905_v39  ;;  %v2798_v49 = vmul.f32 %v2764_v25, %v2749_v1  ;;  %v4177_v28 = vpack.c.bf16 %v3098_v38, %v3096_v35  ;;  %v3095_v39 = vld [vmem:[#allocation11 + $0x480] sm:$0xff]  ;;  %v3100_v25 = vld [vmem:[#allocation11 + $0x4a8] sm:$0xff] }
 0x40e   : > { %4740 = vtanh.f32 %v2935_v63  ;;  %v4735_v10 = vpop.eup %4734  ;;  %v2797_v46 = vmul.f32 %v2760_v9, %v2748_v45  ;;  %v3097_v63 = vld [vmem:[#allocation11 + $0x490] sm:$0xff]  ;;  %v3099_v45 = vld [vmem:[#allocation11 + $0x4a0] sm:$0xff] }
 0x40f   : > { %v4737_v27 = vpop.eup %4736  ;;  %v2753_v4 = vmul.f32 %v4735_v10, %v6883_v30  ;;  %v6918_v51 = vadd.f32 %v2814_v52, %v2798_v49  ;;  %v4179_v52 = vpack.c.bf16 %v3097_v63, %v3095_v39  ;;  %v4181_v10 = vpack.c.bf16 %v3102_v34, %v3100_v25  ;;  %v3104_v49 = vld [vmem:[#allocation11 + $0x4c8] sm:$0xff] }
 0x410   : > { %v2752_v0 = vmul.f32 %v4737_v27, %v6886_v24  ;;  %v6920_v42 = vadd.f32 %v2810_v50, %v2797_v46  ;;  %v4163_v24 = vpack.c.bf16 %v3081_v20, %v3079_v16  ;;  %v3101_v50 = vld [vmem:[#allocation11 + $0x4b0] sm:$0xff]  ;;  %v3103_v16 = vld [vmem:[#allocation11 + $0x4c0] sm:$0xff]  ;;  %v4195_v25 = vpack.c.bf16 %v3113_v26, %v3111_v47  ;;  %v3142_v47 = vld [vmem:[#allocation11 + $0x5f8] sm:$0xff] }
 0x411   : > { %v4739_v29 = vpop.eup %4738  ;;  %v2802_v53 = vmul.f32 %v2780_v14, %v2753_v4  ;;  %v2862_v54 = vmin.f32 %v6918_v51, 20.0  ;;  %v3106_v4 = vld [vmem:[#allocation11 + $0x4d8] sm:$0xff]  ;;  %v3105_v20 = vld [vmem:[#allocation11 + $0x4d0] sm:$0xff]  ;;  %vm2856_vm11 = vcmp.gt.f32.partialorder %v6918_v51, 20.0 }
 0x412   : > { %v2948_v37 = vmul.f32 %v4739_v29, %v6865_v56  ;;  %v2801_v32 = vmul.f32 %v6827_v44, %v2752_v0  ;;  %v2861_v56 = vmin.f32 %v6920_v42, 20.0  ;;  %v4183_v0 = vpack.c.bf16 %v3101_v50, %v3099_v45 }
 0x413   : > { %v6924_v30 = vadd.f32 %v2830_v3, %v2802_v53  ;;  %v2869_v36 = vmul.f32 1.442695, %v2862_v54  ;;  %vm2855_vm14 = vcmp.gt.f32.partialorder %v6920_v42, 20.0 }
 0x414   : > { %3290 = vmatprep.mubr.f32.mxu0 %v2948_v37  ;;  %v6928_v7 = vadd.f32 %v6834_v5, %v2801_v32  ;;  %v2867_v41 = vmul.f32 1.442695, %v2861_v56  ;;  %v4169_v5 = vpack.c.bf16 %v3090_v2, %v3088_v33  ;;  %v4185_v37 = vpack.c.bf16 %v3106_v4, %v3104_v49  ;;  %v3112_v2 = vld [vmem:[#allocation11 + $0x508] sm:$0xff]  ;;  %v3119_v4 = vld [vmem:[#allocation11 + $0x540] sm:$0xff] }
 0x415   : > { %v2866_v44 = vmin.f32 %v6924_v30, 20.0  ;;  %4742 = vpow2.f32 %v2869_v36  ;;  %v3109_v36 = vld [vmem:[#allocation11 + $0x4f0] sm:$0xff]  ;;  %vm2860_vm0 = vcmp.gt.f32.partialorder %v6924_v30, 20.0 }
 0x416   : > { %v2865_v60 = vmin.f32 %v6928_v7, 20.0  ;;  %4744 = vpow2.f32 %v2867_v41  ;;  %v3114_v41 = vld [vmem:[#allocation11 + $0x518] sm:$0xff]  ;;  %v4191_v21 = vpack.c.bf16 %v3109_v36, %v3107_v59  ;;  %vm2859_vm2 = vcmp.gt.f32.partialorder %v6928_v7, 20.0 }
 0x417   : > { %v2877_v17 = vmul.f32 1.442695, %v2866_v44 }
 0x418   : > { %v4741_v62 = vpop.eup %4740  ;;  %v2875_v8 = vmul.f32 1.442695, %v2865_v60  ;;  %v3132_v60 = vld [vmem:[#allocation11 + $0x5a8] sm:$0xff] }
 0x419   : > { %v2947_v48 = vmul.f32 %v4741_v62, %v6869_v19  ;;  %v3087_v19 = vld [vmem:[#allocation11 + $0x440] sm:$0xff]  ;;  %4746 = vpow2.f32 %v2877_v17 }
 0x41a   : > { %v4171_v22 = vpack.c.bf16 %v3089_v57, %v3087_v19  ;;  %4748 = vpow2.f32 %v2875_v8  ;;  %v3136_v19 = vld [vmem:[#allocation11 + $0x5c8] sm:$0xff] }
 0x41b   : > { %3291 = vmatmul.mubr.f32.vlgmr.msra.gmra.mrb[0].mxu0 %v2947_v48  ;;  %v4187_v48 = vpack.c.bf16 %v3105_v20, %v3103_v16 }
 0x41c   : > { %4164 = vmatpush1.bf16.msra.mxu0 %v4163_v24 }
 0x41d   : > { %4166 = vmatprep.subr.bf16.mxu0 %v4165_v6 }
 0x41f   : > { %v4743_v11 = vpop.eup %4742 }
 0x420   : > { %4168 = vmatpush1.bf16.msra.mxu0 %v4167_v55  ;;  %v4745_v58 = vpop.eup %4744  ;;  %v2888_v9 = vadd.f32 1.0, %v4743_v11  ;;  %v2891_v27 = vmul.f32 -0.5, %v4743_v11  ;;  %v2894_v32 = vand.u32 2147483647, %v4743_v11 }
 0x421   : > { %4170 = vmatprep.subr.bf16.mxu0 %v4169_v5  ;;  %v2879_v1 = vadd.f32 1.0, %v4745_v58  ;;  %v2882_v3 = vmul.f32 -0.5, %v4745_v58  ;;  %v2885_v62 = vand.u32 2147483647, %v4745_v58 }
 0x422   : > { %4750 = vlog2.f32 %v2888_v9  ;;  %v2892_v53 = vadd.f32 1.0, %v2891_v27  ;;  %vm6937_vm12 = vcmp.lt.f32.partialorder %v2894_v32, 0.0004427343  ;;  %v3123_v32 = vld [vmem:[#allocation11 + $0x560] sm:$0xff] }
 0x423   : > { %v4747_v13 = vpop.eup %4746  ;;  %4752 = vlog2.f32 %v2879_v1  ;;  %v2883_v54 = vadd.f32 1.0, %v2882_v3  ;;  %vm6941_vm13 = vcmp.lt.f32.partialorder %v2885_v62, 0.0004427343  ;;  %v3115_v1 = vld [vmem:[#allocation11 + $0x520] sm:$0xff]  ;;  %v3121_v3 = vld [vmem:[#allocation11 + $0x550] sm:$0xff] }
 0x424   : > { %4172 = vmatpush1.bf16.msra.mxu0 %v4171_v22  ;;  %v2924_v14 = vadd.f32 1.0, %v4747_v13  ;;  %v2927_v29 = vmul.f32 -0.5, %v4747_v13  ;;  %v6933_v46 = vpop.eup %4748  ;;  %v2930_v6 = vand.u32 2147483647, %v4747_v13  ;;  %v2893_v44 = vmul.f32 %v4743_v11, %v2892_v53  ;;  %v3118_v11 = vld [vmem:[#allocation11 + $0x538] sm:$0xff]  ;;  %v3137_v22 = vld [vmem:[#allocation11 + $0x5d0] sm:$0xff] }
 0x425   : > { %4174 = vmatprep.subr.bf16.mxu0 %v4173_v15  ;;  %v2915_v56 = vadd.f32 1.0, %v6933_v46  ;;  %v2884_v17 = vmul.f32 %v4745_v58, %v2883_v54  ;;  %v4193_v15 = vpack.c.bf16 %v3114_v41, %v3112_v2  ;;  %v2918_v9 = vmul.f32 -0.5, %v6933_v46  ;;  %v3125_v54 = vld [vmem:[#allocation11 + $0x570] sm:$0xff]  ;;  %v3127_v2 = vld [vmem:[#allocation11 + $0x580] sm:$0xff] }
 0x426   : > { %4754 = vlog2.f32 %v2924_v14  ;;  %v2928_v24 = vadd.f32 1.0, %v2927_v29  ;;  %vm6946_vm15 = vcmp.lt.f32.partialorder %v2930_v6, 0.0004427343  ;;  %v3120_v14 = vld [vmem:[#allocation11 + $0x548] sm:$0xff]  ;;  %v2921_v29 = vand.u32 2147483647, %v6933_v46 }
 0x427   : > { %4756 = vlog2.f32 %v2915_v56  ;;  %v2919_v50 = vadd.f32 1.0, %v2918_v9  ;;  %v4203_v16 = vpack.c.bf16 %v3121_v3, %v3119_v4  ;;  %v3128_v56 = vld [vmem:[#allocation11 + $0x588] sm:$0xff]  ;;  %v4207_v36 = vpack.c.bf16 %v3125_v54, %v3123_v32  ;;  %v3129_v41 = vld [vmem:[#allocation11 + $0x590] sm:$0xff] }
 0x428   : > { %4176 = vmatpush1.bf16.msra.mxu0 %v4175_v12  ;;  %v2929_v57 = vmul.f32 %v4747_v13, %v2928_v24  ;;  %v3116_v12 = vld [vmem:[#allocation11 + $0x528] sm:$0xff]  ;;  %vm6965_vm1 = vcmp.lt.f32.partialorder %v2921_v29, 0.0004427343 }
 0x429   : > { %4178 = vmatprep.subr.bf16.mxu0 %v4177_v28  ;;  %v4197_v13 = vpack.c.bf16 %v3118_v11, %v3116_v12  ;;  %v2920_v53 = vmul.f32 %v6933_v46, %v2919_v50  ;;  %v3141_v12 = vld [vmem:[#allocation11 + $0x5f0] sm:$0xff] }
 0x42c   : > { %4180 = vmatpush1.bf16.msra.mxu0 %v4179_v52  ;;  %v4751_v33 = vpop.eup %4750  ;;  %v3117_v52 = vld [vmem:[#allocation11 + $0x530] sm:$0xff] }
 0x42d   : > { %4182 = vmatprep.subr.bf16.mxu0 %v4181_v10  ;;  %v4753_v55 = vpop.eup %4752  ;;  %v2890_v5 = vmul.f32 0.6931472, %v4751_v33  ;;  %v3122_v10 = vld [vmem:[#allocation11 + $0x558] sm:$0xff]  ;;  %v4199_v45 = vpack.c.bf16 %v3117_v52, %v3115_v1 }
 0x42e   : > { %v2881_v8 = vmul.f32 0.6931472, %v4753_v55  ;;  %v4201_v49 = vpack.c.bf16 %v3122_v10, %v3120_v14 }
 0x42f   : > { %v2896_v35 = vsel %vm6937_vm12, %v2893_v44, %v2890_v5  ;;  %v3133_v5 = vld [vmem:[#allocation11 + $0x5b0] sm:$0xff] }
 0x430   : > { %4184 = vmatpush1.bf16.msra.mxu0 %v4183_v0  ;;  %v4755_v43 = vpop.eup %4754  ;;  %v2934_v28 = vsel %vm2856_vm11, %v6918_v51, %v2896_v35  ;;  %v2887_v39 = vsel %vm6941_vm13, %v2884_v17, %v2881_v8  ;;  %v3124_v0 = vld [vmem:[#allocation11 + $0x568] sm:$0xff]  ;;  %v4211_v17 = vpack.c.bf16 %v3129_v41, %v3127_v2  ;;  %v3135_v8 = vld [vmem:[#allocation11 + $0x5c0] sm:$0xff] }
 0x431   : > { %4186 = vmatprep.subr.bf16.mxu0 %v4185_v37  ;;  %v2926_v38 = vmul.f32 0.6931472, %v4755_v43  ;;  %4758 = vtanh.f32 %v2934_v28  ;;  %v2933_v63 = vsel %vm2855_vm14, %v6920_v42, %v2887_v39  ;;  %v4757_v27 = vpop.eup %4756  ;;  %v3126_v37 = vld [vmem:[#allocation11 + $0x578] sm:$0xff]  ;;  %v4219_v26 = vpack.c.bf16 %v3137_v22, %v3135_v8 }
 0x432   : > { %4760 = vtanh.f32 %v2933_v63  ;;  %v2917_v20 = vmul.f32 0.6931472, %v4757_v27  ;;  %v4205_v31 = vpack.c.bf16 %v3126_v37, %v3124_v0  ;;  %v3143_v63 = vld [vmem:[#allocation13] sm:$0x3] }
 0x433   : > { %v2932_v58 = vsel %vm6946_vm15, %v2929_v57, %v2926_v38  ;;  %v3138_v57 = vld [vmem:[#allocation11 + $0x5d8] sm:$0xff]  ;;  %v3139_v38 = vld [vmem:[#allocation11 + $0x5e0] sm:$0xff] }
 0x434   : > { %4188 = vmatpush1.bf16.msra.mxu0 %v4187_v48  ;;  %v2938_v34 = vsel %vm2860_vm0, %v6924_v30, %v2932_v58  ;;  %v3130_v48 = vld [vmem:[#allocation11 + $0x598] sm:$0xff]  ;;  %v2923_v44 = vsel %vm6965_vm1, %v2920_v53, %v2917_v20  ;;  %v4223_v28 = vpack.c.bf16 %v3141_v12, %v3139_v38  ;;  %v3148_v58 = vrot.slane %v3143_v63, %v6899_v40 }
 0x435   : > { %4190 = vmatprep.subr.bf16.mxu0 %v4189_v18  ;;  %4762 = vtanh.f32 %v2938_v34  ;;  %v4209_v33 = vpack.c.bf16 %v3130_v48, %v3128_v56 }
 0x438   : > { %4192 = vmatpush1.bf16.msra.mxu0 %v4191_v21  ;;  %v4217_v21 = vpack.c.bf16 %v3138_v57, %v3136_v19 }
 0x439   : > { %4194 = vmatprep.subr.bf16.mxu0 %v4193_v15  ;;  %v3140_v15 = vld [vmem:[#allocation11 + $0x5e8] sm:$0xff] }
 0x43a   : > { %v4221_v35 = vpack.c.bf16 %v3142_v47, %v3140_v15 }
 0x43b   : > { %v4759_v23 = vpop.eup %4758 }
 0x43c   : > { %4196 = vmatpush1.bf16.msra.mxu0 %v4195_v25  ;;  %v4761_v24 = vpop.eup %4760  ;;  %v2946_v6 = vmul.f32 %v4759_v23, %v6918_v51  ;;  %v3134_v51 = vld [vmem:[#allocation11 + $0x5b8] sm:$0xff] }
 0x43d   : > { %4198 = vmatprep.subr.bf16.mxu0 %v4197_v13  ;;  %v2945_v59 = vmul.f32 %v4761_v24, %v6920_v42  ;;  %v2937_v42 = vsel %vm2859_vm2, %v6928_v7, %v2923_v44  ;;  %v4213_v55 = vpack.c.bf16 %v3134_v51, %v3132_v60  ;;  %v3152_v13 = vrot.slane %v3143_v63, %v6896_v61 }
 0x43e   : > { %3219 = vmatprep.mubr.f32.mxu1 %v2946_v6  ;;  %4764 = vtanh.f32 %v2937_v42 }
 0x43f   : > { %v4763_v18 = vpop.eup %4762  ;;  %3220 = vmatmul.mubr.f32.vlgmr.msra.gmra.mrb[0].mxu1 %v2945_v59 }
 0x440   : > { %4200 = vmatpush1.bf16.msra.mxu0 %v4199_v45  ;;  %v2950_v46 = vmul.f32 %v4763_v18, %v6924_v30  ;;  %v3131_v30 = vld [vmem:[#allocation11 + $0x5a0] sm:$0xff] }
 0x441   : > { %4202 = vmatprep.subr.bf16.mxu0 %v4201_v49  ;;  %v4215_v43 = vpack.c.bf16 %v3133_v5, %v3131_v30 }
 0x442   : > { %3361 = vmatprep.mubr.f32.mxu0 %v2950_v46 }
 0x444   : > { %4204 = vmatpush1.bf16.msra.mxu0 %v4203_v16 }
 0x445   : > { %4206 = vmatprep.subr.bf16.mxu0 %v4205_v31 }
 0x448   : > { %4208 = vmatpush1.bf16.msra.mxu0 %v4207_v36  ;;  %v4765_v11 = vpop.eup %4764 }
 0x449   : > { %4210 = vmatprep.subr.bf16.mxu0 %v4209_v33  ;;  %v2949_v39 = vmul.f32 %v4765_v11, %v6928_v7 }
 0x44c   : > { %4212 = vmatpush1.bf16.msra.mxu0 %v4211_v17 }
 0x44d   : > { %4214 = vmatprep.subr.bf16.mxu0 %v4213_v55 }
 0x450   : > { %4216 = vmatpush1.bf16.msra.mxu0 %v4215_v43 }
 0x451   : > { %4218 = vmatprep.subr.bf16.mxu0 %v4217_v21 }
 0x454   : > { %4220 = vmatpush1.bf16.msra.mxu0 %v4219_v26 }
 0x455   : > { %4222 = vmatprep.subr.bf16.mxu0 %v4221_v35 }
 0x458   : > { %4224 = vmatpush1.bf16.msra.mxu0 %v4223_v28 }
 0x45b   : > { %3362 = vmatmul.mubr.f32.vlgmr.msra.gmra.mrb[0].mxu0 %v2949_v39 }
 0x512   : > { %v3221_v25 = vpop.f32.mrb[0].mxu1 }
 0x513   : > { %v3222_v34 = vadd.f32 %v3221_v25, %v3148_v58  ;;  %v3223_v9 = vpop.f32.mrb[1].mxu1 }
 0x514   : > { %v3224_v1 = vadd.f32 %v3223_v9, %v3152_v13 }
 0x52e   : > { %v3363_v52 = vpop.f32.mrb[0].mxu0 }
 0x52f   : > { %v4234_v14 = vadd.f32 %v3363_v52, %v3222_v34  ;;  %v3365_v10 = vpop.f32.mrb[1].mxu0 }
 0x530   : > { %v4236_v45 = vadd.f32 %v3365_v10, %v3224_v1 }
 0x531   : > { %3368 = vst [vmem:[%s7028_s7] sm:$0xff] %v4234_v14 }
 0x532   : > { %3369 = vst [vmem:[%s7028_s7 + $0x8] sm:$0xff] %v4236_v45 }
 0x533 PF: > { %p4284_p11 = scmp.eq.s32.totalorder %s5058_s0, 3  ;;  %s4990_s29 = smov [#allocation14]  }
 0x534   : > { %s3382_s22 = sshll.u32 %s4990_s29, 4  ;;  %s3383_s22 = int_to_ptr.vmem [resolvable:$true] %s3382_s22 }
 0x535   : > { %s4906_s25 = scalar_lea.vmem %s3383_s22, 256  ;;  %p4913_p5 = scmp.lt.s32.totalorder %s3383_s22, %s3383_s22 }
 0x536   : > { %p4907_p13 = scmp.ne.s32.totalorder %s3383_s22, %s4906_s25  ;;  %p4914_p8 = scmp.lt.s32.totalorder %s4906_s25, %s4906_s25 }
 0x538   : > { %p4908_p1 = pnand %p4907_p13, %p4284_p11  ;;  %p4915_p4 = por %p4914_p8, %p4913_p5 }
 0x53a   : > { %p4909_p12 = pneg %p4908_p1 }
 0x53c   : > { %p4916_p9 = pnand %p4915_p4, %p4909_p12 }
 0x53e   : > { %4919 = shalt.err (!%p4916_p9)
}
 0x53f   : > { %s4920_s20 = scalar_lea.hbm %s7029_s8, 256 }
 0x540   : > { %p4921_p0 = scmp.ne.s32.totalorder %s7029_s8, %s4920_s20  ;;  %p4926_p3 = scmp.lt.u32.totalorder %s4920_s20, %s7029_s8 }
 0x542   : > { %p4922_p10 = pnand %p4921_p0, %p4284_p11 }
 0x544   : > { %p4923_p2 = pneg %p4922_p10 }
 0x546   : > { %p4928_p6 = pnand %p4926_p3, %p4923_p2 }
 0x548   : > { %4931 = shalt.err (!%p4928_p6)
}
 0x549   : > { %4260 = dma.vmem_to_hbm [thread:$0]  (%p4284_p11), %s3383_s22, 256, %s7029_s8, [#allocation7]  }
 0x54a   : > { %4961 = dma.done.wait (%p4284_p11), [#allocation7], 256  }
 0x54b   : > { %4963 = vsyncadd (%p4284_p11), [#allocation7], 4294967040 }
 0x54c PF: > { %p23_p7 = scmp.ge.s32.totalorder %s5061_s11, 6   ;;  %s7311_s29 = smov %s4970_s30 }
 0x54d   : > { %s7312_s30 = smov %s4974_s9  ;;  %s7313_s9 = smov %s5071_s14 }
 0x54e   : > { %s7314_s10 = smov %s5061_s11  ;;  %25 = sbr.rel (!%p23_p7) target bundleno = 9 (0x9), region = 148 }
 0x555   :  { %3398 = vsyncpa [#allocation6], 1 }
 0x556   :  { %3400 = vsyncpa [#allocation6 + $0x1], 1 }
 0x557   :  { %3401 = vsyncpa [#allocation9], 1 }
 0x558   :  { %3402 = vsyncpa [#allocation12], 1 }
 0x559   :  { %3403 = vsyncpa [#allocation7], 1 }
 0x55a   :  { %3405 = vsyncpa [#allocation7 + $0x1], 1 }

</bundles_post_ra>
